<compile_context>
chip_gen: v7x
topology: tpu7x:2x2x1
jax: 0.10.0
libtpu: 0.0.40
codegen_flags: <defaults>
</compile_context>

<pallas_src>
import jax
import jax.numpy as jnp
from jax.experimental import pallas as pl
from jax.experimental.pallas import tpu as pltpu

INPUT_DIM = 4
HIDDEN_DIM = 128          # forced by the module's channel arithmetic
KERNEL_SIZE = 1           # forced (padding=0, c_next = f * c_cur)
B = 2
L = 256
TILE_L = 256              # full L -> grid = (B,)

assert HIDDEN_DIM == 128, "kernel assumes lane-aligned 128-wide gate slices"


def convlstm_cell_kernel(x_ref, h_ref, c_ref, wx_ref, wh_ref, b_ref,
                         h_out_ref, c_out_ref):
    # x_ref : (1, TILE_L, INPUT_DIM)        f32
    # h_ref : (1, TILE_L, HIDDEN_DIM)       bf16
    # c_ref : (1, TILE_L, HIDDEN_DIM)       bf16
    # wx_ref: (INPUT_DIM, 4*HIDDEN_DIM)     f32   folded weight: wf @ w_conv[:128]
    # wh_ref: (HIDDEN_DIM, 4*HIDDEN_DIM)    bf16  w_conv[128:] (rows applied to h)
    # b_ref : (1, 4*HIDDEN_DIM)             f32   folded bias: bf @ w_conv[:128] + b_conv
    H = HIDDEN_DIM
    x = x_ref[0]                                  # (TILE_L, 4)  f32
    h = h_ref[0]                                  # (TILE_L, H)  bf16
    c = c_ref[0].astype(jnp.float32)              # (TILE_L, H)  f32

    # Single wide-N MXU pass: (TILE_L,128) x (128,512) -> f32 accumulator.
    cc = jnp.dot(h, wh_ref[...], preferred_element_type=jnp.float32)
    cc = cc + b_ref[...]                          # (1,512) broadcast bias

    # K=4 x-contribution as VPU broadcast-FMAs (keeps it off the MXU).
    wx = wx_ref[...]                              # (4, 512) f32
    for k in range(INPUT_DIM):
        cc = cc + x[:, k:k + 1] * wx[k:k + 1, :]

    def sigmoid1(v):                              # one transcendental, not two
        return 0.5 * jnp.tanh(0.5 * v) + 0.5

    # Gate order in the fused conv output: [i, f, o, g].
    i_g = sigmoid1(cc[:, 0 * H:1 * H])
    f_g = sigmoid1(cc[:, 1 * H:2 * H])
    o_g = sigmoid1(cc[:, 2 * H:3 * H])
    g_g = jnp.tanh(cc[:, 3 * H:4 * H])

    c_next = f_g * c + i_g * g_g
    h_next = o_g * jnp.tanh(c_next)

    h_out_ref[0] = h_next
    c_out_ref[0] = c_next


def convlstm_cell(x_blc, h_blc, c_blc, wf, bf, w_conv, b_conv):
    """x_blc: (B, L, INPUT_DIM), h_blc/c_blc: (B, L, HIDDEN_DIM), all f32."""
    Bn, Ln, _ = x_blc.shape
    assert Ln == TILE_L

    w1 = w_conv[:HIDDEN_DIM, :]                  # rows applied to convf(x)
    w2 = w_conv[HIDDEN_DIM:, :]                  # rows applied to h
    # Fold convf (1x1 conv) into the main conv weights/bias (done once in XLA).
    wx = wf @ w1                                 # (INPUT_DIM, 4*HIDDEN_DIM) f32
    b_fold = (bf @ w1 + b_conv).reshape(1, -1)   # (1, 4*HIDDEN_DIM)        f32

    # bf16 for the streamed heavy tensors; accumulation stays f32 in-kernel.
    h_bf = h_blc.astype(jnp.bfloat16)
    c_bf = c_blc.astype(jnp.bfloat16)
    wh_bf = w2.astype(jnp.bfloat16)

    grid = (Bn,)                                 # 2 parallel blocks (v7x megacore)

    def bl_map(b):
        return (b, 0, 0)

    def full_map(b):
        return (0, 0)

    h_next, c_next = pl.pallas_call(
        convlstm_cell_kernel,
        out_shape=(
            jax.ShapeDtypeStruct((Bn, Ln, HIDDEN_DIM), jnp.float32),
            jax.ShapeDtypeStruct((Bn, Ln, HIDDEN_DIM), jnp.float32),
        ),
        grid_spec=pltpu.PrefetchScalarGridSpec(
            num_scalar_prefetch=0,
            grid=grid,
            in_specs=[
                pl.BlockSpec((1, TILE_L, INPUT_DIM), bl_map),
                pl.BlockSpec((1, TILE_L, HIDDEN_DIM), bl_map),
                pl.BlockSpec((1, TILE_L, HIDDEN_DIM), bl_map),
                pl.BlockSpec((INPUT_DIM, 4 * HIDDEN_DIM), full_map),
                pl.BlockSpec((HIDDEN_DIM, 4 * HIDDEN_DIM), full_map),
                pl.BlockSpec((1, 4 * HIDDEN_DIM), full_map),
            ],
            out_specs=[
                pl.BlockSpec((1, TILE_L, HIDDEN_DIM), bl_map),
                pl.BlockSpec((1, TILE_L, HIDDEN_DIM), bl_map),
            ],
        ),
        compiler_params=pltpu.CompilerParams(
            dimension_semantics=("parallel",)),
    )(x_blc, h_bf, c_bf, wx, wh_bf, b_fold)
    return h_next, c_next


def reference(x_blc, h_blc, c_blc, wf, bf, w_conv, b_conv):
    xf = jnp.einsum("blc,co->blo", x_blc, wf) + bf
    combined = jnp.concatenate([xf, h_blc], axis=-1)
    cc = jnp.einsum("blc,co->blo", combined, w_conv) + b_conv
    H = HIDDEN_DIM
    i = jax.nn.sigmoid(cc[..., 0 * H:1 * H])
    f = jax.nn.sigmoid(cc[..., 1 * H:2 * H])
    o = jax.nn.sigmoid(cc[..., 2 * H:3 * H])
    g = jnp.tanh(cc[..., 3 * H:4 * H])
    c_next = f * c_blc + i * g
    h_next = o * jnp.tanh(c_next)
    return h_next, c_next


if __name__ == "__main__":
    key = jax.random.PRNGKey(0)
    k = jax.random.split(key, 7)

    # Inputs in PyTorch layout (B, C, L), then moved to kernel layout (B, L, C).
    x_ncl = jax.random.normal(k[0], (B, INPUT_DIM, L), dtype=jnp.float32)
    h_ncl = jax.random.normal(k[1], (B, HIDDEN_DIM, L), dtype=jnp.float32)
    c_ncl = jax.random.normal(k[2], (B, HIDDEN_DIM, L), dtype=jnp.float32)

    # Deterministic parameter init (Conv1d weight shapes: (out, in, k=1)).
    wf = 0.1 * jax.random.normal(k[3], (INPUT_DIM, 128), dtype=jnp.float32)       # convf.weight.T
    bf = 0.1 * jax.random.normal(k[4], (128,), dtype=jnp.float32)                 # convf.bias
    w_conv = 0.1 * jax.random.normal(k[5], (2 * HIDDEN_DIM, 4 * HIDDEN_DIM),
                                     dtype=jnp.float32)                           # conv.weight.T
    b_conv = 0.1 * jax.random.normal(k[6], (4 * HIDDEN_DIM,), dtype=jnp.float32)  # conv.bias

    x_blc = jnp.transpose(x_ncl, (0, 2, 1))
    h_blc = jnp.transpose(h_ncl, (0, 2, 1))
    c_blc = jnp.transpose(c_ncl, (0, 2, 1))

    h_next, c_next = convlstm_cell(x_blc, h_blc, c_blc, wf, bf, w_conv, b_conv)
    jax.block_until_ready((h_next, c_next))

    h_ref, c_ref = reference(x_blc, h_blc, c_blc, wf, bf, w_conv, b_conv)
    # bf16 streaming of h/c/wh + weight folding perturb low-order bits.
    assert jnp.allclose(h_next, h_ref, atol=5e-2, rtol=5e-2)
    assert jnp.allclose(c_next, c_ref, atol=5e-2, rtol=5e-2)

    # Convert back to PyTorch layout (B, C, L) if needed:
    h_next_ncl = jnp.transpose(h_next, (0, 2, 1))
    c_next_ncl = jnp.transpose(c_next, (0, 2, 1))
    jax.block_until_ready((h_next_ncl, c_next_ncl))

    print("KERNEL_OK")
</pallas_src>

<mosaic_0001>
module attributes {stable_mosaic.version = 11 : i64} {
  func.func @convlstm_cell_kernel(%arg0: i32, %arg1: memref<1x256x4xf32, #tpu.memory_space<vmem>>, %arg2: memref<1x256x128xbf16, #tpu.memory_space<vmem>>, %arg3: memref<1x256x128xbf16, #tpu.memory_space<vmem>>, %arg4: memref<4x512xf32, #tpu.memory_space<vmem>>, %arg5: memref<128x512xbf16, #tpu.memory_space<vmem>>, %arg6: memref<1x512xf32, #tpu.memory_space<vmem>>, %arg7: memref<1x256x128xf32, #tpu.memory_space<vmem>>, %arg8: memref<1x256x128xf32, #tpu.memory_space<vmem>>) attributes {dimension_semantics = [#tpu.dimension_semantics<parallel>], iteration_bounds = array<i64: 2>, scalar_prefetch = 0 : i64, scratch_operands = 0 : i64, tpu.core_type = #tpu.core_type<tc>, window_params = [{transform_indices = @transform_0, window_bounds = array<i64: 1, 256, 4>}, {transform_indices = @transform_1, window_bounds = array<i64: 1, 256, 128>}, {transform_indices = @transform_2, window_bounds = array<i64: 1, 256, 128>}, {pipeline_mode = #tpu.pipeline_mode<synchronous>, transform_indices = @transform_3, window_bounds = array<i64: 4, 512>}, {pipeline_mode = #tpu.pipeline_mode<synchronous>, transform_indices = @transform_4, window_bounds = array<i64: 128, 512>}, {pipeline_mode = #tpu.pipeline_mode<synchronous>, transform_indices = @transform_5, window_bounds = array<i64: 1, 512>}, {transform_indices = @transform_6, window_bounds = array<i64: 1, 256, 128>}, {transform_indices = @transform_7, window_bounds = array<i64: 1, 256, 128>}]} {
    %c0 = arith.constant 0 : index
    %c0_0 = arith.constant 0 : index
    %c0_1 = arith.constant 0 : index
    %0 = vector.load %arg1[%c0, %c0_0, %c0_1] : memref<1x256x4xf32, #tpu.memory_space<vmem>>, vector<1x256x4xf32>
    %1 = vector.shape_cast %0 : vector<1x256x4xf32> to vector<256x4xf32>
    %c0_2 = arith.constant 0 : index
    %c0_3 = arith.constant 0 : index
    %c0_4 = arith.constant 0 : index
    %2 = vector.load %arg2[%c0_2, %c0_3, %c0_4] : memref<1x256x128xbf16, #tpu.memory_space<vmem>>, vector<1x256x128xbf16>
    %3 = vector.shape_cast %2 : vector<1x256x128xbf16> to vector<256x128xbf16>
    %c0_5 = arith.constant 0 : index
    %c0_6 = arith.constant 0 : index
    %c0_7 = arith.constant 0 : index
    %4 = vector.load %arg3[%c0_5, %c0_6, %c0_7] : memref<1x256x128xbf16, #tpu.memory_space<vmem>>, vector<1x256x128xbf16>
    %5 = vector.shape_cast %4 : vector<1x256x128xbf16> to vector<256x128xbf16>
    %6 = arith.extf %5 : vector<256x128xbf16> to vector<256x128xf32>
    %c0_8 = arith.constant 0 : index
    %c0_9 = arith.constant 0 : index
    %7 = vector.load %arg5[%c0_8, %c0_9] : memref<128x512xbf16, #tpu.memory_space<vmem>>, vector<128x512xbf16>
    %cst = arith.constant dense<0.000000e+00> : vector<256x512xf32>
    %8 = tpu.matmul %3, %7, %cst {dimension_numbers = #tpu.dot_dimension_numbers<[1], [0], [0], [1], [0, 0, 1, 1], [], []>} : vector<256x128xbf16>, vector<128x512xbf16>, vector<256x512xf32> -> vector<256x512xf32>
    %c0_10 = arith.constant 0 : index
    %c0_11 = arith.constant 0 : index
    %9 = vector.load %arg6[%c0_10, %c0_11] : memref<1x512xf32, #tpu.memory_space<vmem>>, vector<1x512xf32>
    %10 = vector.broadcast %9 : vector<1x512xf32> to vector<256x512xf32>
    %11 = arith.addf %8, %10 : vector<256x512xf32>
    %c0_12 = arith.constant 0 : index
    %c0_13 = arith.constant 0 : index
    %12 = vector.load %arg4[%c0_12, %c0_13] : memref<4x512xf32, #tpu.memory_space<vmem>>, vector<4x512xf32>
    %13 = vector.extract_strided_slice %1 {offsets = [0, 0], sizes = [256, 1], strides = [1, 1]} : vector<256x4xf32> to vector<256x1xf32>
    %14 = vector.extract_strided_slice %12 {offsets = [0, 0], sizes = [1, 512], strides = [1, 1]} : vector<4x512xf32> to vector<1x512xf32>
    %15 = vector.broadcast %13 : vector<256x1xf32> to vector<256x512xf32>
    %16 = vector.broadcast %14 : vector<1x512xf32> to vector<256x512xf32>
    %17 = arith.mulf %15, %16 : vector<256x512xf32>
    %18 = arith.addf %11, %17 : vector<256x512xf32>
    %19 = vector.extract_strided_slice %1 {offsets = [0, 1], sizes = [256, 1], strides = [1, 1]} : vector<256x4xf32> to vector<256x1xf32>
    %20 = vector.extract_strided_slice %12 {offsets = [1, 0], sizes = [1, 512], strides = [1, 1]} : vector<4x512xf32> to vector<1x512xf32>
    %21 = vector.broadcast %19 : vector<256x1xf32> to vector<256x512xf32>
    %22 = vector.broadcast %20 : vector<1x512xf32> to vector<256x512xf32>
    %23 = arith.mulf %21, %22 : vector<256x512xf32>
    %24 = arith.addf %18, %23 : vector<256x512xf32>
    %25 = vector.extract_strided_slice %1 {offsets = [0, 2], sizes = [256, 1], strides = [1, 1]} : vector<256x4xf32> to vector<256x1xf32>
    %26 = vector.extract_strided_slice %12 {offsets = [2, 0], sizes = [1, 512], strides = [1, 1]} : vector<4x512xf32> to vector<1x512xf32>
    %27 = vector.broadcast %25 : vector<256x1xf32> to vector<256x512xf32>
    %28 = vector.broadcast %26 : vector<1x512xf32> to vector<256x512xf32>
    %29 = arith.mulf %27, %28 : vector<256x512xf32>
    %30 = arith.addf %24, %29 : vector<256x512xf32>
    %31 = vector.extract_strided_slice %1 {offsets = [0, 3], sizes = [256, 1], strides = [1, 1]} : vector<256x4xf32> to vector<256x1xf32>
    %32 = vector.extract_strided_slice %12 {offsets = [3, 0], sizes = [1, 512], strides = [1, 1]} : vector<4x512xf32> to vector<1x512xf32>
    %33 = vector.broadcast %31 : vector<256x1xf32> to vector<256x512xf32>
    %34 = vector.broadcast %32 : vector<1x512xf32> to vector<256x512xf32>
    %35 = arith.mulf %33, %34 : vector<256x512xf32>
    %36 = arith.addf %30, %35 : vector<256x512xf32>
    %37 = vector.extract_strided_slice %36 {offsets = [0, 0], sizes = [256, 128], strides = [1, 1]} : vector<256x512xf32> to vector<256x128xf32>
    %cst_14 = arith.constant 5.000000e-01 : f32
    %38 = vector.broadcast %cst_14 : f32 to vector<256x128xf32>
    %39 = arith.mulf %38, %37 : vector<256x128xf32>
    %40 = math.tanh %39 : vector<256x128xf32>
    %cst_15 = arith.constant 5.000000e-01 : f32
    %41 = vector.broadcast %cst_15 : f32 to vector<256x128xf32>
    %42 = arith.mulf %41, %40 : vector<256x128xf32>
    %cst_16 = arith.constant 5.000000e-01 : f32
    %43 = vector.broadcast %cst_16 : f32 to vector<256x128xf32>
    %44 = arith.addf %42, %43 : vector<256x128xf32>
    %45 = vector.extract_strided_slice %36 {offsets = [0, 128], sizes = [256, 128], strides = [1, 1]} : vector<256x512xf32> to vector<256x128xf32>
    %cst_17 = arith.constant 5.000000e-01 : f32
    %46 = vector.broadcast %cst_17 : f32 to vector<256x128xf32>
    %47 = arith.mulf %46, %45 : vector<256x128xf32>
    %48 = math.tanh %47 : vector<256x128xf32>
    %cst_18 = arith.constant 5.000000e-01 : f32
    %49 = vector.broadcast %cst_18 : f32 to vector<256x128xf32>
    %50 = arith.mulf %49, %48 : vector<256x128xf32>
    %cst_19 = arith.constant 5.000000e-01 : f32
    %51 = vector.broadcast %cst_19 : f32 to vector<256x128xf32>
    %52 = arith.addf %50, %51 : vector<256x128xf32>
    %53 = vector.extract_strided_slice %36 {offsets = [0, 256], sizes = [256, 128], strides = [1, 1]} : vector<256x512xf32> to vector<256x128xf32>
    %cst_20 = arith.constant 5.000000e-01 : f32
    %54 = vector.broadcast %cst_20 : f32 to vector<256x128xf32>
    %55 = arith.mulf %54, %53 : vector<256x128xf32>
    %56 = math.tanh %55 : vector<256x128xf32>
    %cst_21 = arith.constant 5.000000e-01 : f32
    %57 = vector.broadcast %cst_21 : f32 to vector<256x128xf32>
    %58 = arith.mulf %57, %56 : vector<256x128xf32>
    %cst_22 = arith.constant 5.000000e-01 : f32
    %59 = vector.broadcast %cst_22 : f32 to vector<256x128xf32>
    %60 = arith.addf %58, %59 : vector<256x128xf32>
    %61 = vector.extract_strided_slice %36 {offsets = [0, 384], sizes = [256, 128], strides = [1, 1]} : vector<256x512xf32> to vector<256x128xf32>
    %62 = math.tanh %61 : vector<256x128xf32>
    %63 = arith.mulf %52, %6 : vector<256x128xf32>
    %64 = arith.mulf %44, %62 : vector<256x128xf32>
    %65 = arith.addf %63, %64 : vector<256x128xf32>
    %66 = math.tanh %65 : vector<256x128xf32>
    %67 = arith.mulf %60, %66 : vector<256x128xf32>
    %c0_23 = arith.constant 0 : index
    %c0_24 = arith.constant 0 : index
    %c0_25 = arith.constant 0 : index
    %68 = vector.load %arg7[%c0_23, %c0_24, %c0_25] : memref<1x256x128xf32, #tpu.memory_space<vmem>>, vector<1x256x128xf32>
    %69 = vector.shape_cast %68 : vector<1x256x128xf32> to vector<256x128xf32>
    %70 = vector.shape_cast %67 : vector<256x128xf32> to vector<1x256x128xf32>
    tpu.vector_store %arg7[%c0_23, %c0_24, %c0_25], %70 {strides = array<i32>} : memref<1x256x128xf32, #tpu.memory_space<vmem>>, vector<1x256x128xf32>,
    %c0_26 = arith.constant 0 : index
    %c0_27 = arith.constant 0 : index
    %c0_28 = arith.constant 0 : index
    %71 = vector.load %arg8[%c0_26, %c0_27, %c0_28] : memref<1x256x128xf32, #tpu.memory_space<vmem>>, vector<1x256x128xf32>
    %72 = vector.shape_cast %71 : vector<1x256x128xf32> to vector<256x128xf32>
    %73 = vector.shape_cast %65 : vector<256x128xf32> to vector<1x256x128xf32>
    tpu.vector_store %arg8[%c0_26, %c0_27, %c0_28], %73 {strides = array<i32>} : memref<1x256x128xf32, #tpu.memory_space<vmem>>, vector<1x256x128xf32>,
    return
  }
  func.func @transform_0(%arg0: i32) -> (i32, i32, i32) {
    %c0_i32 = arith.constant 0 : i32
    %c0_i32_0 = arith.constant 0 : i32
    %c0_i32_1 = arith.constant 0 : i32
    return %arg0, %c0_i32, %c0_i32_0 : i32, i32, i32
  }
  func.func @transform_1(%arg0: i32) -> (i32, i32, i32) {
    %c0_i32 = arith.constant 0 : i32
    %c0_i32_0 = arith.constant 0 : i32
    %c0_i32_1 = arith.constant 0 : i32
    return %arg0, %c0_i32, %c0_i32_0 : i32, i32, i32
  }
  func.func @transform_2(%arg0: i32) -> (i32, i32, i32) {
    %c0_i32 = arith.constant 0 : i32
    %c0_i32_0 = arith.constant 0 : i32
    %c0_i32_1 = arith.constant 0 : i32
    return %arg0, %c0_i32, %c0_i32_0 : i32, i32, i32
  }
  func.func @transform_3(%arg0: i32) -> (i32, i32) {
    %c0_i32 = arith.constant 0 : i32
    %c0_i32_0 = arith.constant 0 : i32
    %c0_i32_1 = arith.constant 0 : i32
    return %c0_i32, %c0_i32_0 : i32, i32
  }
  func.func @transform_4(%arg0: i32) -> (i32, i32) {
    %c0_i32 = arith.constant 0 : i32
    %c0_i32_0 = arith.constant 0 : i32
    %c0_i32_1 = arith.constant 0 : i32
    return %c0_i32, %c0_i32_0 : i32, i32
  }
  func.func @transform_5(%arg0: i32) -> (i32, i32) {
    %c0_i32 = arith.constant 0 : i32
    %c0_i32_0 = arith.constant 0 : i32
    %c0_i32_1 = arith.constant 0 : i32
    return %c0_i32, %c0_i32_0 : i32, i32
  }
  func.func @transform_6(%arg0: i32) -> (i32, i32, i32) {
    %c0_i32 = arith.constant 0 : i32
    %c0_i32_0 = arith.constant 0 : i32
    %c0_i32_1 = arith.constant 0 : i32
    return %arg0, %c0_i32, %c0_i32_0 : i32, i32, i32
  }
  func.func @transform_7(%arg0: i32) -> (i32, i32, i32) {
    %c0_i32 = arith.constant 0 : i32
    %c0_i32_0 = arith.constant 0 : i32
    %c0_i32_1 = arith.constant 0 : i32
    return %arg0, %c0_i32, %c0_i32_0 : i32, i32, i32
  }
}

</mosaic_0001>

<bundles_post_ra>
// kernel: tpu_custom_call.1
= control target key start
LH: loop header
LB: loop body
LE: loop exit
PB: predicated region body
PF: predicated region fallthrough
CT: control target
= control target key end

     0   :  { %13 = vsyncpa [#allocation3], 0  ;;  %s7928_s0 = inlined_call_operand.vmem [shape: f32[2,256,4], index: 0, kind: input, shape index: {}]   ;;  %s7929_s1 = inlined_call_operand.vmem [shape: bf16[2,256,128], index: 1, kind: input, shape index: {}]   ;;  %s7930_s2 = inlined_call_operand.vmem [shape: bf16[2,256,128], index: 2, kind: input, shape index: {}]   ;;  %s7931_s3 = inlined_call_operand.vmem [shape: f32[4,512], index: 3, kind: input, shape index: {}]   ;;  %s7932_s4 = inlined_call_operand.hbm [shape: bf16[128,512], index: 4, kind: input, shape index: {}]   ;;  %s7933_s5 = inlined_call_operand.vmem [shape: f32[1,512], index: 5, kind: input, shape index: {}]   ;;  %s7934_s6 = inlined_call_operand.hbm [shape: f32[2,256,128], index: 6, kind: output, shape index: {0}]   ;;  %s7935_s7 = inlined_call_operand.hbm [shape: f32[2,256,128], index: 7, kind: output, shape index: {1}]  }
   0x1   :  { %14 = vsyncpa [#allocation4], 0 }
   0x2   :  { %16 = vsyncpa [#allocation4 + $0x1], 0 }
   0x3   :  { %17 = vsyncpa [#allocation7], 0 }
   0x4   :  { %19 = vsyncpa [#allocation7 + $0x1], 0  ;;  %s4487_s24 = smov 0   ;;  %s4489_s25 = smov 0  }
   0x5   :  { %s4491_s26 = smov 0   ;;  %s4493_s27 = smov 0  }
   0x6 LB: > { %s4508_s28 = sadd.s32 4294967295, %s4434_s27   ;;  %s3689_s29 = sadd.s32 4294967294, %s4434_s27   ;;  %s4434_s27 = sphi %s4493_s27, %s8869_s27   ;;  %s4430_s26 = sphi %s4491_s26, %s8868_s26   ;;  %s4426_s25 = sphi %s4489_s25, %s8867_s25   ;;  %s4422_s24 = sphi %s4487_s24, %s8866_s24  }
   0x7   : > { %s4512_s30 = sadd.s32 1, %s4434_s27   ;;  %s173_s8 = sadd.s32 1, %s4430_s26 }
   0x8   : > { %s170_s9 = ssub.s32 %s4434_s27, %s4512_s30  ;;  %p183_p0 = scmp.ne.s32.totalorder %s4430_s26, %s4426_s25 }
   0x9   : > { %p171_p1 = scmp.eq.s32.totalorder %s170_s9, 0  ;;  %p184_p2 = scmp.eq.s32.totalorder %s4508_s28, 1 }
   0xa   : > { %p189_p3 = scmp.ne.s32.totalorder %s4426_s25, %s4422_s24  ;;  %p190_p4 = scmp.eq.s32.totalorder %s3689_s29, 1 }
   0xb   : > { %s4523_s10 = scalar_select %p171_p1, %s4430_s26, %s173_s8  }
   0xc   : > { %p4525_p5 = por %p184_p2, %p183_p0  ;;  %p4529_p6 = por %p190_p4, %p189_p3 }
   0xd   : > { %p3690_p7 = scmp.ge.s32.totalorder %s4434_s27, 1  ;;  %p223_p8 = scmp.lt.s32.totalorder %s4434_s27, 3 }
   0xe   : > { %s7970_s11 = scalar_select %p4525_p5, 1, 0 }
   0xf   : > { %s7971_s12 = scalar_select %p4529_p6, 1, 0 }
  0x10   : > { %p7936_p9 = scmp.eq.s32.totalorder %s4508_s28, 0  ;;  %p4536_p10 = pnand %p3690_p7, %p223_p8 }
  0x11   : > { %s4436_s14 = smov [#allocation2]   ;;  %s4308_s19 = scalar_lea.hbm %s7932_s4, 4096 }
  0x12   : > { %s7972_s13 = scalar_select %p4536_p10, 1, 0 }
  0x13   : > { %s238_s15 = sshll.u32 %s4436_s14, 4  ;;  %p3851_p11 = pneg %p4536_p10  ;;  %s239_s15 = int_to_ptr.vmem [resolvable:$true] %s238_s15 }
  0x14   : > { %p4309_p13 = scmp.ne.s32.totalorder %s7932_s4, %s4308_s19  ;;  %p4315_p3 = scmp.lt.u32.totalorder %s4308_s19, %s7932_s4 }
  0x15   : > { %p4544_p12 = pnand %p7936_p9, %p3851_p11 }
  0x17   : > { %p4310_p0 = pneg %p4544_p12 }
  0x19   : > { %p4311_p1 = pnand %p4310_p0, %p4309_p13 }
  0x1b   : > { %p4312_p2 = pneg %p4311_p1 }
  0x1d   : > { %p4317_p4 = pnand %p4315_p3, %p4312_p2 }
  0x1f   : > { %4320 = shalt.err (!%p4317_p4)
}
  0x20   : > { %s4321_s29 = scalar_lea.vmem %s239_s15, 4096  ;;  %p4329_p9 = scmp.lt.s32.totalorder %s239_s15, %s239_s15 }
  0x21   : > { %p4322_p7 = scmp.ne.s32.totalorder %s239_s15, %s4321_s29  ;;  %p4330_p6 = scmp.lt.s32.totalorder %s4321_s29, %s4321_s29 }
  0x23   : > { %p4324_p8 = pnand %p4322_p7, %p4310_p0  ;;  %p4331_p5 = por %p4330_p6, %p4329_p9 }
  0x25   : > { %p4325_p11 = pneg %p4324_p8 }
  0x27   : > { %p4332_p10 = pnand %p4331_p5, %p4325_p11 }
  0x29   : > { %4335 = shalt.err (!%p4332_p10)
}
  0x2a   : > { %s4437_s8 = smov 256   ;;  %s4438_s9 = smov 16  }
  0x2b   : > { %3854 = dma.hbm_to_vmem [thread:$0]  (!%p4544_p12), %s7932_s4, 4096, %s239_s15, [#allocation3], %s4437_s8, %s4437_s8, %s4438_s9  }
  0x2c   : > { %p7974_p13 = scmp.ne.s32.totalorder %s7972_s13, 0 }
  0x2e   : > { %281 = sbr.rel (%p7974_p13) target bundleno = 803 (0x323), region = 44 }
  0x35   : > { %p7975_p1 = scmp.eq.s32.totalorder %s4508_s28, 0 }
  0x37   : > { %4409 = dma.done.wait (%p7975_p1), [#allocation3], 4096   ;;  %p7976_p0 = pmov %p7975_p1 }
  0x38   : > { %p328_p5 = scmp.lt.s32.totalorder %s4508_s28, 1  ;;  %v4439_v0 = vmov 0   ;;  %v3914_v3 = vld [vmem:[#allocation2 + $0x4] ss:$16 sps:$4 sm:$0xff]   ;;  %v3916_v4 = vld [vmem:[#allocation2 + $0xc] ss:$16 sps:$4 sm:$0xff]  }
  0x39   : > { %4411 = vsyncadd (%p7976_p0), [#allocation3], 4294963200  ;;  %3907 = vset.pattern.permute.xlu1 %v4439_v0  ;;  %3906 = vset.pattern.permute.xlu0 %v4439_v0  ;;  %v3918_v5 = vld [vmem:[#allocation2] ss:$16 sps:$4 sm:$0xff]   ;;  %v3919_v6 = vld [vmem:[#allocation2 + $0x8] ss:$16 sps:$4 sm:$0xff]  }
  0x3a   : > { %s4574_s16 = scalar_select %p328_p5, %s4508_s28, 1  ;;  %814 = vmatprep.mubr.bf16.mxu0 %v4439_v0  ;;  %1007 = vmatprep.mubr.bf16.mxu1 %v4439_v0  ;;  %v3920_v9 = vld [vmem:[#allocation2 + $0x24] ss:$16 sps:$4 sm:$0xff]   ;;  %v3922_v10 = vld [vmem:[#allocation2 + $0x2c] ss:$16 sps:$4 sm:$0xff]  }
  0x3b   : > { %782 = vmatprep.subr.bf16.mxu0 %v3914_v3  ;;  %975 = vmatprep.subr.bf16.mxu1 %v3916_v4  ;;  %v3924_v11 = vld [vmem:[#allocation2 + $0x20] ss:$16 sps:$4 sm:$0xff]   ;;  %v3925_v12 = vld [vmem:[#allocation2 + $0x28] ss:$16 sps:$4 sm:$0xff]   ;;  %v3926_v15 = vld [vmem:[#allocation2 + $0x44] ss:$16 sps:$4 sm:$0xff]  }
  0x3c   : > { %s3759_s13 = sshll.u32 %s4574_s16, 8  ;;  %783 = vmatpush1.bf16.msra.mxu0 %v3918_v5  ;;  %976 = vmatpush1.bf16.msra.mxu1 %v3919_v6  ;;  %v3928_v16 = vld [vmem:[#allocation2 + $0x4c] ss:$16 sps:$4 sm:$0xff]   ;;  %v3930_v17 = vld [vmem:[#allocation2 + $0x40] ss:$16 sps:$4 sm:$0xff]   ;;  %s3760_s20 = sshll.u32 %s4574_s16, 7 }
  0x3d   : > { %s4582_s19 = scalar_lea.vmem %s7928_s0, %s3759_s13  ;;  %784 = vmatprep.subr.bf16.mxu0 %v3920_v9  ;;  %977 = vmatprep.subr.bf16.mxu1 %v3922_v10  ;;  %v3931_v18 = vld [vmem:[#allocation2 + $0x48] ss:$16 sps:$4 sm:$0xff]   ;;  %v3932_v21 = vld [vmem:[#allocation2 + $0x64] ss:$16 sps:$4 sm:$0xff]   ;;  %v3934_v22 = vld [vmem:[#allocation2 + $0x6c] ss:$16 sps:$4 sm:$0xff]   ;;  %s4652_s23 = scalar_lea.vmem %s7929_s1, %s3760_s20 }
  0x3e   : > { %v4585_v1 = vld [vmem:[%s4582_s19 + $0x10] sm:$0xff]  ;;  %v4588_v2 = vld [vmem:[%s4582_s19] sm:$0xff]  ;;  %v4593_v7 = vld [vmem:[%s4582_s19 + $0x18] sm:$0xff]  ;;  %s5820_s21 = scalar_lea.vmem %s7930_s2, %s3760_s20  ;;  %s7037_s16 = sand.u32 1, %s4426_s25  }
  0x3f   : > { %1182 = vperm.xlu1 %3907, %v4585_v1   ;;  %1172 = vperm.xlu0 %3906, %v4588_v2   ;;  %v4596_v8 = vld [vmem:[%s4582_s19 + $0x8] sm:$0xff]  ;;  %v4604_v14 = vld [vmem:[%s4582_s19 + $0x20] sm:$0xff]  ;;  %v4609_v19 = vld [vmem:[%s4582_s19 + $0x38] sm:$0xff]  ;;  %s3530_s17 = scalar_lea.sflag [#allocation7], %s7037_s16  ;;  %p8864_p9 = scmp.ne.s32.totalorder %s7970_s11, 0 }
  0x40   : > { %v4601_v13 = vld [vmem:[%s4582_s19 + $0x28] sm:$0xff]  ;;  %785 = vmatpush1.bf16.msra.mxu0 %v3924_v11  ;;  %978 = vmatpush1.bf16.msra.mxu1 %v3925_v12  ;;  %v4612_v20 = vld [vmem:[%s4582_s19 + $0x30] sm:$0xff]  ;;  %v4619_v26 = vld [vmem:[%s4582_s19 + $0x40] sm:$0xff]  ;;  %v4440_v11 = vmov 1   ;;  %s4443_s15 = smov [#allocation6]  }
  0x41   : > { %786 = vmatprep.subr.bf16.mxu0 %v3926_v15  ;;  %979 = vmatprep.subr.bf16.mxu1 %v3928_v16  ;;  %v3936_v23 = vld [vmem:[#allocation2 + $0x60] ss:$16 sps:$4 sm:$0xff]   ;;  %v3937_v24 = vld [vmem:[#allocation2 + $0x68] ss:$16 sps:$4 sm:$0xff]   ;;  %7977 = vst [vmem:[#allocation11_spill] sm:$0xff] %v4619_v26  ;;  %s4340_s18 = sshll.u32 %s4443_s15, 4  ;;  %s4341_s18 = int_to_ptr.vmem [resolvable:$false] %s4340_s18 }
  0x42   : > { %v4616_v25 = vld [vmem:[%s4582_s19 + $0x48] sm:$0xff]  ;;  %v3938_v27 = vld [vmem:[#allocation2 + $0x84] ss:$16 sps:$4 sm:$0xff]   ;;  %v3942_v29 = vld [vmem:[#allocation2 + $0x80] ss:$16 sps:$4 sm:$0xff]  }
  0x43   : > { %1187 = vperm.xlu1 %3907, %v4593_v7   ;;  %1177 = vperm.xlu0 %3906, %v4596_v8   ;;  %v3940_v28 = vld [vmem:[#allocation2 + $0x8c] ss:$16 sps:$4 sm:$0xff]   ;;  %v3943_v30 = vld [vmem:[#allocation2 + $0x88] ss:$16 sps:$4 sm:$0xff]   ;;  %v3944_v32 = vld [vmem:[#allocation2 + $0xa4] ss:$16 sps:$4 sm:$0xff]  }
  0x44   : > { %787 = vmatpush1.bf16.msra.mxu0 %v3930_v17  ;;  %980 = vmatpush1.bf16.msra.mxu1 %v3931_v18  ;;  %v4624_v31 = vld [vmem:[%s4582_s19 + $0x58] sm:$0xff]  ;;  %v4628_v33 = vld [vmem:[%s4582_s19 + $0x50] sm:$0xff]  ;;  %v4633_v37 = vld [vmem:[%s4582_s19 + $0x68] sm:$0xff] }
  0x45   : > { %788 = vmatprep.subr.bf16.mxu0 %v3932_v21  ;;  %981 = vmatprep.subr.bf16.mxu1 %v3934_v22  ;;  %7978 = vst [vmem:[#allocation12_spill] sm:$0xff] %v4624_v31  ;;  %7979 = vst [vmem:[#allocation13_spill] sm:$0xff] %v4628_v33  ;;  %v3946_v34 = vld [vmem:[#allocation2 + $0xac] ss:$16 sps:$4 sm:$0xff]   ;;  %v3948_v35 = vld [vmem:[#allocation2 + $0xa0] ss:$16 sps:$4 sm:$0xff]  }
  0x46   : > { %v3949_v36 = vld [vmem:[#allocation2 + $0xa8] ss:$16 sps:$4 sm:$0xff]   ;;  %7980 = vst [vmem:[#allocation14_spill] sm:$0xff] %v4633_v37  ;;  %v3950_v38 = vld [vmem:[#allocation2 + $0xc4] ss:$16 sps:$4 sm:$0xff]  }
  0x47   : > { %1197 = vperm.xlu1 %3907, %v4601_v13   ;;  %1192 = vperm.xlu0 %3906, %v4604_v14   ;;  %v4636_v39 = vld [vmem:[%s4582_s19 + $0x60] sm:$0xff]  ;;  %v3952_v40 = vld [vmem:[#allocation2 + $0xcc] ss:$16 sps:$4 sm:$0xff]   ;;  %v3955_v42 = vld [vmem:[#allocation2 + $0xc8] ss:$16 sps:$4 sm:$0xff]  }
  0x48   : > { %789 = vmatpush1.bf16.msra.mxu0 %v3936_v23  ;;  %982 = vmatpush1.bf16.msra.mxu1 %v3937_v24  ;;  %7981 = vst [vmem:[#allocation15_spill] sm:$0xff] %v4636_v39  ;;  %v3954_v41 = vld [vmem:[#allocation2 + $0xc0] ss:$16 sps:$4 sm:$0xff]   ;;  %v4642_v43 = vld [vmem:[%s4582_s19 + $0x78] sm:$0xff]  ;;  %v3956_v45 = vld [vmem:[#allocation2 + $0xe4] ss:$16 sps:$4 sm:$0xff]  }
  0x49   : > { %790 = vmatprep.subr.bf16.mxu0 %v3938_v27  ;;  %983 = vmatprep.subr.bf16.mxu1 %v3940_v28  ;;  %7982 = vst [vmem:[#allocation16_spill] sm:$0xff] %v4642_v43  ;;  %v4645_v44 = vld [vmem:[%s4582_s19 + $0x70] sm:$0xff]  ;;  %v3958_v46 = vld [vmem:[#allocation2 + $0xec] ss:$16 sps:$4 sm:$0xff]   ;;  %v3961_v48 = vld [vmem:[#allocation2 + $0xe8] ss:$16 sps:$4 sm:$0xff]  }
  0x4a   : > { %7983 = vst [vmem:[#allocation17_spill] sm:$0xff] %v4645_v44  ;;  %v3960_v47 = vld [vmem:[#allocation2 + $0xe0] ss:$16 sps:$4 sm:$0xff]   ;;  %v4657_v49 = vld [vmem:[%s4582_s19 + $0x88] sm:$0xff]  ;;  %v4666_v52 = vld [vmem:[%s4582_s19 + $0x98] sm:$0xff]  ;;  %v4441_v28 = vmov 2  }
  0x4b   : > { %1207 = vperm.xlu1 %3907, %v4609_v19   ;;  %1202 = vperm.xlu0 %3906, %v4612_v20   ;;  %7984 = vst [vmem:[#allocation18_spill] sm:$0xff] %v4657_v49  ;;  %v4660_v50 = vld [vmem:[%s4582_s19 + $0x80] sm:$0xff]  ;;  %7986 = vst [vmem:[#allocation20_spill] sm:$0xff] %v4666_v52  ;;  %v4669_v53 = vld [vmem:[%s4582_s19 + $0x90] sm:$0xff] }
  0x4c   : > { %791 = vmatpush1.bf16.msra.mxu0 %v3942_v29  ;;  %984 = vmatpush1.bf16.msra.mxu1 %v3943_v30  ;;  %7985 = vst [vmem:[#allocation19_spill] sm:$0xff] %v4660_v50  ;;  %v3962_v51 = vld [vmem:[%s4652_s23] sm:$0xff]   ;;  %v4674_v54 = vld [vmem:[%s4582_s19 + $0xa8] sm:$0xff]  ;;  %v4685_v57 = vld [vmem:[%s4582_s19 + $0xb8] sm:$0xff] }
  0x4d   : > { %792 = vmatprep.subr.bf16.mxu0 %v3944_v32  ;;  %985 = vmatprep.subr.bf16.mxu1 %v3946_v34  ;;  %7987 = vst [vmem:[#allocation21_spill] sm:$0xff] %v4674_v54  ;;  %v4679_v55 = vld [vmem:[%s4582_s19 + $0xa0] sm:$0xff]  ;;  %v3963_v56 = vld [vmem:[%s4652_s23 + $0x8] sm:$0xff]   ;;  %7988 = vst [vmem:[#allocation22_spill] sm:$0xff] %v4685_v57 }
  0x4e   : > { %v4688_v58 = vld [vmem:[%s4582_s19 + $0xb0] sm:$0xff]  ;;  %v4693_v59 = vld [vmem:[%s4582_s19 + $0xc8] sm:$0xff]  ;;  %v4698_v60 = vld [vmem:[%s4582_s19 + $0xc0] sm:$0xff] }
  0x4f   : > { %1217 = vperm.xlu1 %3907, %v4616_v25   ;;  %1212 = vperm.xlu0 %3906, %v4619_v26   ;;  %v3964_v61 = vld [vmem:[%s4652_s23 + $0x10] sm:$0xff]   ;;  %v4704_v62 = vld [vmem:[%s4582_s19 + $0xd8] sm:$0xff]  ;;  %v4714_v3 = vld [vmem:[%s4582_s19 + $0xe8] sm:$0xff] }
  0x50   : > { %793 = vmatpush1.bf16.msra.mxu0 %v3948_v35  ;;  %986 = vmatpush1.bf16.msra.mxu1 %v3949_v36  ;;  %v4707_v63 = vld [vmem:[%s4582_s19 + $0xd0] sm:$0xff]  ;;  %v4717_v4 = vld [vmem:[%s4582_s19 + $0xe0] sm:$0xff]  ;;  %v3965_v5 = vld [vmem:[%s4652_s23 + $0x18] sm:$0xff]  }
  0x51   : > { %794 = vmatprep.subr.bf16.mxu0 %v3950_v38  ;;  %987 = vmatprep.subr.bf16.mxu1 %v3952_v40  ;;  %v4723_v6 = vld [vmem:[%s4582_s19 + $0xf8] sm:$0xff]  ;;  %v4726_v9 = vld [vmem:[%s4582_s19 + $0xf0] sm:$0xff]  ;;  %v3966_v10 = vld [vmem:[%s4652_s23 + $0x20] sm:$0xff]  }
  0x52   : > { %v3967_v12 = vld [vmem:[%s4652_s23 + $0x28] sm:$0xff]   ;;  %v3968_v15 = vld [vmem:[%s4652_s23 + $0x30] sm:$0xff]   ;;  %v3969_v16 = vld [vmem:[%s4652_s23 + $0x38] sm:$0xff]  }
  0x53   : > { %1227 = vperm.xlu1 %3907, %v4624_v31   ;;  %1222 = vperm.xlu0 %3906, %v4628_v33   ;;  %v3970_v17 = vld [vmem:[%s4652_s23 + $0x40] sm:$0xff]   ;;  %v3971_v18 = vld [vmem:[%s4652_s23 + $0x48] sm:$0xff]   ;;  %v3972_v21 = vld [vmem:[%s4652_s23 + $0x50] sm:$0xff]  }
  0x54   : > { %795 = vmatpush1.bf16.msra.mxu0 %v3954_v41  ;;  %988 = vmatpush1.bf16.msra.mxu1 %v3955_v42  ;;  %v3973_v22 = vld [vmem:[%s4652_s23 + $0x58] sm:$0xff]   ;;  %v3974_v23 = vld [vmem:[%s4652_s23 + $0x60] sm:$0xff]   ;;  %v3975_v32 = vld [vmem:[%s4652_s23 + $0x68] sm:$0xff]  }
  0x55   : > { %796 = vmatprep.subr.bf16.mxu0 %v3956_v45  ;;  %989 = vmatprep.subr.bf16.mxu1 %v3958_v46  ;;  %v3976_v40 = vld [vmem:[%s4652_s23 + $0x70] sm:$0xff]  }
  0x57   : > { %1237 = vperm.xlu1 %3907, %v4633_v37   ;;  %1232 = vperm.xlu0 %3906, %v4636_v39  }
  0x58   : > { %797 = vmatpush1.bf16.msra.mxu0 %v3960_v47  ;;  %990 = vmatpush1.bf16.msra.mxu1 %v3961_v48  ;;  %v3977_v47 = vld [vmem:[%s4652_s23 + $0x78] sm:$0xff]   ;;  %s3762_s23 = sshll.u32 %s4508_s28, 12 }
  0x59   : > { %s7839_s14 = scalar_lea.hbm %s7935_s7, %s3762_s23 }
  0x5b   : > { %1247 = vperm.xlu1 %3907, %v4642_v43   ;;  %1242 = vperm.xlu0 %3906, %v4645_v44  }
  0x5c   : > { %815 = vmatmul.mubr.bf16.vlgmr.msra.gmra.mrb[0].mxu0 %v3962_v51  ;;  %1008 = vmatmul.mubr.bf16.vlgmr.msra.gmra.mrb[0].mxu1 %v3962_v51 }
  0x5d   : > { %824 = vmatprep.mubr.bf16.mxu0 %v4439_v0  ;;  %1017 = vmatprep.mubr.bf16.mxu1 %v4439_v0 }
  0x5f   : > { %1257 = vperm.xlu1 %3907, %v4657_v49   ;;  %1252 = vperm.xlu0 %3906, %v4660_v50  }
  0x63   : > { %1267 = vperm.xlu1 %3907, %v4666_v52   ;;  %1262 = vperm.xlu0 %3906, %v4669_v53  }
  0x64   : > { %825 = vmatmul.mubr.bf16.gmra.mrb[4].mxu0 %v3963_v56  ;;  %1018 = vmatmul.mubr.bf16.gmra.mrb[4].mxu1 %v3963_v56 }
  0x65   : > { %834 = vmatprep.mubr.bf16.mxu0 %v4439_v0  ;;  %1027 = vmatprep.mubr.bf16.mxu1 %v4439_v0 }
  0x67   : > { %1277 = vperm.xlu1 %3907, %v4674_v54   ;;  %1272 = vperm.xlu0 %3906, %v4679_v55  }
  0x6b   : > { %1287 = vperm.xlu1 %3907, %v4685_v57   ;;  %1282 = vperm.xlu0 %3906, %v4688_v58  }
  0x6c   : > { %835 = vmatmul.mubr.bf16.gmra.mrb[8].mxu0 %v3964_v61  ;;  %1028 = vmatmul.mubr.bf16.gmra.mrb[8].mxu1 %v3964_v61 }
  0x6d   : > { %844 = vmatprep.mubr.bf16.mxu0 %v4439_v0  ;;  %1037 = vmatprep.mubr.bf16.mxu1 %v4439_v0 }
  0x6f   : > { %1297 = vperm.xlu1 %3907, %v4693_v59   ;;  %1292 = vperm.xlu0 %3906, %v4698_v60  }
  0x73   : > { %1307 = vperm.xlu1 %3907, %v4704_v62   ;;  %1302 = vperm.xlu0 %3906, %v4707_v63  }
  0x74   : > { %845 = vmatmul.mubr.bf16.gmra.mrb[12].mxu0 %v3965_v5  ;;  %1038 = vmatmul.mubr.bf16.gmra.mrb[12].mxu1 %v3965_v5 }
  0x75   : > { %854 = vmatprep.mubr.bf16.mxu0 %v4439_v0  ;;  %1047 = vmatprep.mubr.bf16.mxu1 %v4439_v0 }
  0x77   : > { %1317 = vperm.xlu1 %3907, %v4714_v3   ;;  %1312 = vperm.xlu0 %3906, %v4717_v4  }
  0x7b   : > { %1327 = vperm.xlu1 %3907, %v4723_v6   ;;  %1322 = vperm.xlu0 %3906, %v4726_v9  }
  0x7c   : > { %855 = vmatmul.mubr.bf16.gmra.mrb[16].mxu0 %v3966_v10  ;;  %1048 = vmatmul.mubr.bf16.gmra.mrb[16].mxu1 %v3966_v10 }
  0x7d   : > { %864 = vmatprep.mubr.bf16.mxu0 %v4439_v0  ;;  %1057 = vmatprep.mubr.bf16.mxu1 %v4439_v0 }
  0x7f   : > { %3909 = vset.pattern.permute.xlu1 %v4440_v11  ;;  %3908 = vset.pattern.permute.xlu0 %v4440_v11 }
  0x80   : > { %1629 = vperm.xlu1 %3909, %v4596_v8   ;;  %1625 = vperm.xlu0 %3908, %v4588_v2  }
  0x84   : > { %1633 = vperm.xlu1 %3909, %v4585_v1   ;;  %1637 = vperm.xlu0 %3908, %v4593_v7  }
  0x85   : > { %865 = vmatmul.mubr.bf16.gmra.mrb[20].mxu0 %v3967_v12  ;;  %1058 = vmatmul.mubr.bf16.gmra.mrb[20].mxu1 %v3967_v12  ;;  %v506_v12 = vlaneseq }
  0x86   : > { %874 = vmatprep.mubr.bf16.mxu0 %v4439_v0  ;;  %1067 = vmatprep.mubr.bf16.mxu1 %v4439_v0 }
  0x88   : > { %1641 = vperm.xlu1 %3909, %v4604_v14   ;;  %1645 = vperm.xlu0 %3908, %v4601_v13  }
  0x8c   : > { %1649 = vperm.xlu1 %3909, %v4612_v20   ;;  %1653 = vperm.xlu0 %3908, %v4609_v19  }
  0x8d   : > { %875 = vmatmul.mubr.bf16.gmra.mrb[24].mxu0 %v3968_v15  ;;  %1068 = vmatmul.mubr.bf16.gmra.mrb[24].mxu1 %v3968_v15 }
  0x8e   : > { %884 = vmatprep.mubr.bf16.mxu0 %v4439_v0  ;;  %1077 = vmatprep.mubr.bf16.mxu1 %v4439_v0 }
  0x90   : > { %1657 = vperm.xlu1 %3909, %v4619_v26   ;;  %1661 = vperm.xlu0 %3908, %v4616_v25  }
  0x94   : > { %1665 = vperm.xlu1 %3909, %v4628_v33   ;;  %1669 = vperm.xlu0 %3908, %v4624_v31  }
  0x95   : > { %885 = vmatmul.mubr.bf16.gmra.mrb[28].mxu0 %v3969_v16  ;;  %1078 = vmatmul.mubr.bf16.gmra.mrb[28].mxu1 %v3969_v16 }
  0x96   : > { %894 = vmatprep.mubr.bf16.mxu0 %v4439_v0  ;;  %1087 = vmatprep.mubr.bf16.mxu1 %v4439_v0 }
  0x98   : > { %1673 = vperm.xlu1 %3909, %v4636_v39   ;;  %1677 = vperm.xlu0 %3908, %v4633_v37  }
  0x9c   : > { %1681 = vperm.xlu1 %3909, %v4645_v44   ;;  %1685 = vperm.xlu0 %3908, %v4642_v43  }
  0x9d   : > { %895 = vmatmul.mubr.bf16.gmra.mrb[32].mxu0 %v3970_v17  ;;  %1088 = vmatmul.mubr.bf16.gmra.mrb[32].mxu1 %v3970_v17  ;;  %v4862_v17 = vshrl.u32 %v506_v12, 7 }
  0x9e   : > { %904 = vmatprep.mubr.bf16.mxu0 %v4439_v0  ;;  %1097 = vmatprep.mubr.bf16.mxu1 %v4439_v0 }
  0x9f   : > { %7989 = vst [vmem:[#allocation23_spill] sm:$0xff] %v4862_v17 }
  0xa0   : > { %1689 = vperm.xlu1 %3909, %v4660_v50   ;;  %1693 = vperm.xlu0 %3908, %v4657_v49  }
  0xa4   : > { %1697 = vperm.xlu1 %3909, %v4669_v53   ;;  %1701 = vperm.xlu0 %3908, %v4666_v52  }
  0xa5   : > { %905 = vmatmul.mubr.bf16.gmra.mrb[36].mxu0 %v3971_v18  ;;  %1098 = vmatmul.mubr.bf16.gmra.mrb[36].mxu1 %v3971_v18 }
  0xa6   : > { %914 = vmatprep.mubr.bf16.mxu0 %v4439_v0  ;;  %1107 = vmatprep.mubr.bf16.mxu1 %v4439_v0 }
  0xa8   : > { %1705 = vperm.xlu1 %3909, %v4679_v55   ;;  %1709 = vperm.xlu0 %3908, %v4674_v54  }
  0xac   : > { %1713 = vperm.xlu1 %3909, %v4688_v58   ;;  %1717 = vperm.xlu0 %3908, %v4685_v57  }
  0xad   : > { %915 = vmatmul.mubr.bf16.gmra.mrb[40].mxu0 %v3972_v21  ;;  %1108 = vmatmul.mubr.bf16.gmra.mrb[40].mxu1 %v3972_v21  ;;  %v508_v21 = vsub.s32 0, %v4862_v17 }
  0xae   : > { %924 = vmatprep.mubr.bf16.mxu0 %v4439_v0  ;;  %1117 = vmatprep.mubr.bf16.mxu1 %v4439_v0 }
  0xb0   : > { %1721 = vperm.xlu1 %3909, %v4698_v60   ;;  %1725 = vperm.xlu0 %3908, %v4693_v59  }
  0xb4   : > { %1729 = vperm.xlu1 %3909, %v4707_v63   ;;  %1733 = vperm.xlu0 %3908, %v4704_v62  }
  0xb5   : > { %925 = vmatmul.mubr.bf16.gmra.mrb[44].mxu0 %v3973_v22  ;;  %1118 = vmatmul.mubr.bf16.gmra.mrb[44].mxu1 %v3973_v22  ;;  %v4874_v22 = vld [vmem:[%s7931_s3] sm:$0xff] }
  0xb6   : > { %934 = vmatprep.mubr.bf16.mxu0 %v4439_v0  ;;  %1127 = vmatprep.mubr.bf16.mxu1 %v4439_v0 }
  0xb8   : > { %1737 = vperm.xlu1 %3909, %v4717_v4   ;;  %1741 = vperm.xlu0 %3908, %v4714_v3  }
  0xbc   : > { %1745 = vperm.xlu1 %3909, %v4726_v9   ;;  %1749 = vperm.xlu0 %3908, %v4723_v6  }
  0xbd   : > { %935 = vmatmul.mubr.bf16.gmra.mrb[48].mxu0 %v3974_v23  ;;  %1128 = vmatmul.mubr.bf16.gmra.mrb[48].mxu1 %v3974_v23 }
  0xbe   : > { %v4789_v24 = vpop.permute.xlu1 %1182  ;;  %v4791_v27 = vpop.permute.xlu0 %1172  ;;  %944 = vmatprep.mubr.bf16.mxu0 %v4439_v0  ;;  %1137 = vmatprep.mubr.bf16.mxu1 %v4439_v0 }
  0xc0   : > { %3910 = vset.pattern.permute.xlu1 %v4441_v28  ;;  %3911 = vset.pattern.permute.xlu0 %v4441_v28  ;;  %v512_v28 = vsub.s32 1, %v4862_v17 }
  0xc1   : > { %2045 = vperm.xlu1 %3910, %v4588_v2   ;;  %2049 = vperm.xlu0 %3911, %v4596_v8  }
  0xc2   : > { %v4794_v29 = vpop.permute.xlu1 %1187  ;;  %v4797_v30 = vpop.permute.xlu0 %1177 }
  0xc5   : > { %2053 = vperm.xlu1 %3910, %v4585_v1   ;;  %2061 = vperm.xlu0 %3911, %v4604_v14  }
  0xc6   : > { %v4803_v34 = vpop.permute.xlu1 %1197  ;;  %v4806_v35 = vpop.permute.xlu0 %1192  ;;  %945 = vmatmul.mubr.bf16.gmra.mrb[52].mxu0 %v3975_v32  ;;  %1138 = vmatmul.mubr.bf16.gmra.mrb[52].mxu1 %v3975_v32  ;;  %v1758_v32 = vsub.s32 5, %v4862_v17 }
  0xc7   : > { %954 = vmatprep.mubr.bf16.mxu0 %v4439_v0  ;;  %1147 = vmatprep.mubr.bf16.mxu1 %v4439_v0 }
  0xc9   : > { %2057 = vperm.xlu1 %3910, %v4593_v7   ;;  %2069 = vperm.xlu0 %3911, %v4612_v20  }
  0xca   : > { %v4809_v36 = vpop.permute.xlu1 %1207  ;;  %v4812_v38 = vpop.permute.xlu0 %1202 }
  0xcd   : > { %2065 = vperm.xlu1 %3910, %v4601_v13   ;;  %2077 = vperm.xlu0 %3911, %v4619_v26  }
  0xce   : > { %v4818_v41 = vpop.permute.xlu1 %1217  ;;  %v4821_v42 = vpop.permute.xlu0 %1212  ;;  %955 = vmatmul.mubr.bf16.gmra.mrb[56].mxu0 %v3976_v40  ;;  %1148 = vmatmul.mubr.bf16.gmra.mrb[56].mxu1 %v3976_v40 }
  0xcf   : > { %964 = vmatprep.mubr.bf16.mxu0 %v4439_v0  ;;  %1157 = vmatprep.mubr.bf16.mxu1 %v4439_v0 }
  0xd1   : > { %2073 = vperm.xlu1 %3910, %v4609_v19   ;;  %2085 = vperm.xlu0 %3911, %v4628_v33   ;;  %v516_v33 = vsub.s32 2, %v4862_v17 }
  0xd2   : > { %v4824_v45 = vpop.permute.xlu1 %1227  ;;  %v4827_v46 = vpop.permute.xlu0 %1222 }
  0xd5   : > { %2081 = vperm.xlu1 %3910, %v4616_v25   ;;  %2093 = vperm.xlu0 %3911, %v4636_v39  }
  0xd6   : > { %v4833_v48 = vpop.permute.xlu1 %1237  ;;  %v4836_v51 = vpop.permute.xlu0 %1232  ;;  %965 = vmatmul.mubr.bf16.gmra.mrb[60].mxu0 %v3977_v47  ;;  %1158 = vmatmul.mubr.bf16.gmra.mrb[60].mxu1 %v3977_v47  ;;  %v1335_v47 = vrot.slane %v4874_v22, %v508_v21 }
  0xd9   : > { %2089 = vperm.xlu1 %3910, %v4624_v31   ;;  %2101 = vperm.xlu0 %3911, %v4645_v44   ;;  %v1755_v44 = vrot.slane %v4874_v22, %v512_v28 }
  0xda   : > { %v4839_v56 = vpop.permute.xlu1 %1247  ;;  %v4842_v61 = vpop.permute.xlu0 %1242 }
  0xdb   : > { %v4923_v26 = vrot.slane %v1755_v44, %v512_v28 }
  0xdd   : > { %2097 = vperm.xlu1 %3910, %v4633_v37   ;;  %2109 = vperm.xlu0 %3911, %v4660_v50  }
  0xde   : > { %v4845_v0 = vpop.permute.xlu1 %1257  ;;  %v4848_v5 = vpop.permute.xlu0 %1252 }
  0xe1   : > { %2105 = vperm.xlu1 %3910, %v4642_v43   ;;  %2117 = vperm.xlu0 %3911, %v4669_v53  }
  0xe2   : > { %v4851_v10 = vpop.permute.xlu1 %1267  ;;  %v4854_v11 = vpop.permute.xlu0 %1262 }
  0xe5   : > { %2113 = vperm.xlu1 %3910, %v4657_v49   ;;  %2125 = vperm.xlu0 %3911, %v4679_v55   ;;  %v1338_v55 = vsub.s32 4, %v4862_v17  ;;  %v1759_v49 = vrot.slane %v4874_v22, %v1758_v32 }
  0xe6   : > { %v4857_v15 = vpop.permute.xlu1 %1277  ;;  %v4860_v16 = vpop.permute.xlu0 %1272 }
  0xe9   : > { %2121 = vperm.xlu1 %3910, %v4666_v52   ;;  %2133 = vperm.xlu0 %3911, %v4688_v58   ;;  %v4884_v58 = vld [vmem:[%s7931_s3 + $0x8] sm:$0xff] }
  0xea   : > { %v4865_v18 = vpop.permute.xlu1 %1287  ;;  %v4868_v53 = vpop.permute.xlu0 %1282  ;;  %v1343_v12 = vrot.slane %v4884_v58, %v508_v21  ;;  %v1347_v50 = vrot.slane %v4884_v58, %v1338_v55  ;;  %v1767_v43 = vrot.slane %v4884_v58, %v1758_v32 }
  0xec   : > { %v4913_v37 = vrot.slane %v1343_v12, %v508_v21 }
  0xed   : > { %2129 = vperm.xlu1 %3910, %v4674_v54   ;;  %2141 = vperm.xlu0 %3911, %v4698_v60   ;;  %v1339_v54 = vrot.slane %v4874_v22, %v1338_v55  ;;  %v1763_v60 = vrot.slane %v4884_v58, %v512_v28  ;;  %v504_v55 = vld [vmem:[%s7933_s5] sm:$0xf] }
  0xee   : > { %v4878_v23 = vpop.permute.xlu1 %1297  ;;  %v4888_v40 = vpop.permute.xlu0 %1292  ;;  %7995 = vst [vmem:[#allocation29_spill] sm:$0xff] %v4913_v37  ;;  %v4936_v31 = vrot.slane %v504_v55, %v516_v33 }
  0xef   : > { %7990 = vst [vmem:[#allocation24_spill] sm:$0xff] %v4878_v23  ;;  %7991 = vst [vmem:[#allocation25_spill] sm:$0xff] %v4888_v40  ;;  %v4915_v40 = vrot.slane %v1339_v54, %v508_v21  ;;  %v4925_v23 = vrot.slane %v1759_v49, %v512_v28  ;;  %v4932_v54 = vrot.slane %v1767_v43, %v512_v28 }
  0xf0   : > { %v4946_v49 = vmul.f32 %v4913_v37, %v4791_v27 }
  0xf1   : > { %2137 = vperm.xlu1 %3910, %v4685_v57   ;;  %2149 = vperm.xlu0 %3911, %v4707_v63   ;;  %v4908_v57 = vrot.slane %v1335_v47, %v508_v21  ;;  %7996 = vst [vmem:[#allocation30_spill] sm:$0xff] %v4915_v40  ;;  %v4917_v63 = vrot.slane %v1347_v50, %v508_v21 }
  0xf2   : > { %v4895_v52 = vpop.permute.xlu1 %1307  ;;  %v4901_v39 = vpop.permute.xlu0 %1302  ;;  %v4927_v47 = vrot.slane %v1763_v60, %v512_v28  ;;  %v4934_v50 = vrot.slane %v504_v55, %v508_v21  ;;  %7999 = vst [vmem:[#allocation33_spill] sm:$0xff] %v4946_v49 }
  0xf3   : > { %7992 = vst [vmem:[#allocation26_spill] sm:$0xff] %v4895_v52  ;;  %7993 = vst [vmem:[#allocation27_spill] sm:$0xff] %v4901_v39  ;;  %v4911_v52 = vsub.s32 3, %v4862_v17  ;;  %v2178_v39 = vsub.s32 6, %v4862_v17  ;;  %v4938_v17 = vrot.slane %v504_v55, %v512_v28  ;;  %v4942_v44 = vmul.f32 %v4908_v57, %v4791_v27 }
  0xf4   : > { %7994 = vst [vmem:[#allocation28_spill] sm:$0xff] %v4908_v57  ;;  %7997 = vst [vmem:[#allocation31_spill] sm:$0xff] %v4917_v63  ;;  %v4957_v21 = vmul.f32 %v4917_v63, %v4791_v27  ;;  %v2175_v28 = vrot.slane %v4874_v22, %v516_v33 }
  0xf5   : > { %2145 = vperm.xlu1 %3910, %v4693_v59   ;;  %2157 = vperm.xlu0 %3911, %v4717_v4   ;;  %7998 = vst [vmem:[#allocation32_spill] sm:$0xff] %v4942_v44  ;;  %v4950_v4 = vmul.f32 %v4915_v40, %v4791_v27  ;;  %v4953_v43 = vrot.slane %v504_v55, %v4911_v52 }
  0xf6   : > { %v4921_v32 = vpop.permute.xlu1 %1317  ;;  %v4930_v12 = vpop.permute.xlu0 %1312  ;;  %8002 = vst [vmem:[#allocation36_spill] sm:$0xff] %v4957_v21  ;;  %v2179_v60 = vrot.slane %v4874_v22, %v2178_v39  ;;  %v2183_v44 = vrot.slane %v4884_v58, %v516_v33  ;;  %v4971_v55 = vmul.f32 %v4913_v37, %v4789_v24  ;;  %v4975_v27 = vmul.f32 %v4915_v40, %v4789_v24 }
  0xf7   : > { %8000 = vst [vmem:[#allocation34_spill] sm:$0xff] %v4950_v4  ;;  %8001 = vst [vmem:[#allocation35_spill] sm:$0xff] %v4953_v43  ;;  %v4967_v4 = vmul.f32 %v4908_v57, %v4789_v24  ;;  %v2187_v21 = vrot.slane %v4884_v58, %v2178_v39  ;;  %v4999_v39 = vmul.f32 %v4908_v57, %v4797_v30 }
  0xf8   : > { %8005 = vst [vmem:[#allocation39_spill] sm:$0xff] %v4971_v55  ;;  %8006 = vst [vmem:[#allocation40_spill] sm:$0xff] %v4975_v27  ;;  %v4991_v55 = vmul.f32 %v4913_v37, %v4794_v29  ;;  %v4995_v27 = vmul.f32 %v4915_v40, %v4794_v29 }
  0xf9   : > { %2153 = vperm.xlu1 %3910, %v4704_v62   ;;  %8004 = vst [vmem:[#allocation38_spill] sm:$0xff] %v4967_v4  ;;  %2165 = vperm.xlu0 %3911, %v4726_v9   ;;  %v4987_v4 = vmul.f32 %v4908_v57, %v4794_v29  ;;  %v5003_v9 = vmul.f32 %v4913_v37, %v4797_v30 }
  0xfa   : > { %v4963_v49 = vpop.permute.xlu1 %1327  ;;  %v4979_v43 = vpop.permute.xlu0 %1322  ;;  %8010 = vst [vmem:[#allocation44_spill] sm:$0xff] %v4991_v55  ;;  %8011 = vst [vmem:[#allocation45_spill] sm:$0xff] %v4995_v27  ;;  %v5015_v55 = vmul.f32 %v4917_v63, %v4794_v29  ;;  %v5017_v27 = vrot.slane %v2175_v28, %v516_v33  ;;  %v5036_v29 = vmul.f32 %v4908_v57, %v4803_v34  ;;  %v4442_v28 = vmov 3  }
  0xfb   : > { %8003 = vst [vmem:[#allocation37_spill] sm:$0xff] %v4963_v49  ;;  %8007 = vst [vmem:[#allocation41_spill] sm:$0xff] %v4979_v43  ;;  %v4983_v49 = vmul.f32 %v4917_v63, %v4789_v24  ;;  %v5007_v24 = vmul.f32 %v4915_v40, %v4797_v30  ;;  %v5011_v43 = vmul.f32 %v4917_v63, %v4797_v30 }
  0xfc   : > { %8009 = vst [vmem:[#allocation43_spill] sm:$0xff] %v4987_v4  ;;  %8012 = vst [vmem:[#allocation46_spill] sm:$0xff] %v5003_v9  ;;  %v5019_v4 = vrot.slane %v2179_v60, %v516_v33  ;;  %v5024_v9 = vrot.slane %v2187_v21, %v516_v33  ;;  %v5032_v30 = vmul.f32 %v4913_v37, %v4806_v35 }
  0xfd   : > { %8008 = vst [vmem:[#allocation42_spill] sm:$0xff] %v4983_v49  ;;  %8013 = vst [vmem:[#allocation47_spill] sm:$0xff] %v5007_v24  ;;  %v5021_v49 = vrot.slane %v2183_v44, %v516_v33  ;;  %2161 = vperm.xlu1 %3910, %v4714_v3   ;;  %v5028_v24 = vmul.f32 %v4908_v57, %v4806_v35  ;;  %3912 = vset.pattern.permute.xlu0 %v4442_v28 }
  0xfe   : > { %8014 = vst [vmem:[#allocation48_spill] sm:$0xff] %v5024_v9  ;;  %8015 = vst [vmem:[#allocation49_spill] sm:$0xff] %v5032_v30  ;;  %v5042_v33 = vmul.f32 %v4915_v40, %v4806_v35  ;;  %v5046_v3 = vmul.f32 %v4917_v63, %v4806_v35  ;;  %v5050_v21 = vmul.f32 %v4913_v37, %v4803_v34  ;;  %2465 = vperm.xlu0 %3912, %v4588_v2  }
  0xff   : > { %8016 = vst [vmem:[#allocation50_spill] sm:$0xff] %v5036_v29  ;;  %v5038_v44 = vpop.permute.xlu1 %1629  ;;  %v5054_v60 = vmul.f32 %v4915_v40, %v4803_v34  ;;  %v5057_v29 = vpop.permute.xlu0 %1625  ;;  %v5061_v30 = vmul.f32 %v4917_v63, %v4803_v34  ;;  %v5065_v35 = vmul.f32 %v4908_v57, %v4809_v36  ;;  %v5077_v2 = vmul.f32 %v4908_v57, %v4812_v38 }
 0x100   : > { %8017 = vst [vmem:[#allocation51_spill] sm:$0xff] %v5046_v3  ;;  %8018 = vst [vmem:[#allocation52_spill] sm:$0xff] %v5050_v21  ;;  %v5069_v3 = vmul.f32 %v4913_v37, %v4809_v36  ;;  %v5073_v21 = vmul.f32 %v4915_v40, %v4809_v36  ;;  %v5081_v34 = vmul.f32 %v4913_v37, %v4812_v38 }
 0x101   : > { %8019 = vst [vmem:[#allocation53_spill] sm:$0xff] %v5061_v30  ;;  %8020 = vst [vmem:[#allocation54_spill] sm:$0xff] %v5065_v35  ;;  %v5085_v30 = vmul.f32 %v4915_v40, %v4812_v38  ;;  %v5089_v35 = vmul.f32 %v4917_v63, %v4812_v38  ;;  %2169 = vperm.xlu1 %3910, %v4723_v6   ;;  %v5112_v6 = vmul.f32 %v4908_v57, %v4821_v42 }
 0x102   : > { %8021 = vst [vmem:[#allocation55_spill] sm:$0xff] %v5069_v3  ;;  %8022 = vst [vmem:[#allocation56_spill] sm:$0xff] %v5073_v21  ;;  %v5094_v21 = vmul.f32 %v4917_v63, %v4809_v36  ;;  %v5098_v3 = vmul.f32 %v4908_v57, %v4818_v41  ;;  %v5116_v36 = vmul.f32 %v4913_v37, %v4821_v42  ;;  %2477 = vperm.xlu0 %3912, %v4593_v7  }
 0x103   : > { %8023 = vst [vmem:[#allocation57_spill] sm:$0xff] %v5077_v2  ;;  %8024 = vst [vmem:[#allocation58_spill] sm:$0xff] %v5081_v34  ;;  %v5102_v34 = vmul.f32 %v4913_v37, %v4818_v41  ;;  %v5108_v38 = vpop.permute.xlu1 %1633  ;;  %v5147_v7 = vmul.f32 %v4908_v57, %v4827_v46 }
 0x104   : > { %8025 = vst [vmem:[#allocation59_spill] sm:$0xff] %v5085_v30  ;;  %8026 = vst [vmem:[#allocation60_spill] sm:$0xff] %v5089_v35  ;;  %v5106_v30 = vmul.f32 %v4915_v40, %v4818_v41 }
 0x105   : > { %8027 = vst [vmem:[#allocation61_spill] sm:$0xff] %v5094_v21  ;;  %8028 = vst [vmem:[#allocation62_spill] sm:$0xff] %v5098_v3  ;;  %v5120_v3 = vmul.f32 %v4915_v40, %v4821_v42  ;;  %v5131_v21 = vmul.f32 %v4917_v63, %v4821_v42  ;;  %v5151_v42 = vmul.f32 %v4913_v37, %v4827_v46  ;;  %3913 = vset.pattern.permute.xlu1 %v4442_v28 }
 0x106   : > { %8029 = vst [vmem:[#allocation63_spill] sm:$0xff] %v5102_v34  ;;  %8030 = vst [vmem:[#allocation64_spill] sm:$0xff] %v5106_v30  ;;  %v5124_v34 = vmul.f32 %v4917_v63, %v4818_v41  ;;  %v5127_v30 = vpop.permute.xlu0 %1637  ;;  %v5143_v41 = vmul.f32 %v4915_v40, %v4824_v45  ;;  %2469 = vperm.xlu1 %3913, %v4596_v8   ;;  %v5186_v28 = vmul.f32 %v4913_v37, %v4836_v51 }
 0x107   : > { %8031 = vst [vmem:[#allocation65_spill] sm:$0xff] %v5112_v6  ;;  %8032 = vst [vmem:[#allocation66_spill] sm:$0xff] %v5116_v36  ;;  %v5135_v6 = vmul.f32 %v4908_v57, %v4824_v45  ;;  %v5139_v36 = vmul.f32 %v4913_v37, %v4824_v45  ;;  %2485 = vperm.xlu0 %3912, %v4601_v13   ;;  %v5217_v13 = vmul.f32 %v4908_v57, %v4842_v61 }
 0x108   : > { %8033 = vst [vmem:[#allocation67_spill] sm:$0xff] %v5120_v3  ;;  %8034 = vst [vmem:[#allocation68_spill] sm:$0xff] %v5124_v34  ;;  %v5155_v34 = vmul.f32 %v4915_v40, %v4827_v46 }
 0x109   : > { %8035 = vst [vmem:[#allocation69_spill] sm:$0xff] %v5131_v21  ;;  %8036 = vst [vmem:[#allocation70_spill] sm:$0xff] %v5135_v6  ;;  %v5159_v6 = vmul.f32 %v4917_v63, %v4827_v46  ;;  %v5178_v46 = vpop.permute.xlu1 %1641 }
 0x10a   : > { %8037 = vst [vmem:[#allocation71_spill] sm:$0xff] %v5139_v36  ;;  %8038 = vst [vmem:[#allocation72_spill] sm:$0xff] %v5143_v41  ;;  %v5163_v41 = vmul.f32 %v4917_v63, %v4824_v45  ;;  %v5167_v36 = vmul.f32 %v4908_v57, %v4833_v48  ;;  %v5182_v45 = vmul.f32 %v4908_v57, %v4836_v51  ;;  %v5197_v8 = vpop.permute.xlu0 %1645  ;;  %2473 = vperm.xlu1 %3913, %v4585_v1  }
 0x10b   : > { %8039 = vst [vmem:[#allocation73_spill] sm:$0xff] %v5147_v7  ;;  %8040 = vst [vmem:[#allocation74_spill] sm:$0xff] %v5151_v42  ;;  %v5171_v42 = vmul.f32 %v4913_v37, %v4833_v48  ;;  %2493 = vperm.xlu0 %3912, %v4609_v19   ;;  %v5285_v19 = vmul.f32 %v4908_v57, %v4851_v10 }
 0x10c   : > { %8041 = vst [vmem:[#allocation75_spill] sm:$0xff] %v5155_v34  ;;  %8042 = vst [vmem:[#allocation76_spill] sm:$0xff] %v5159_v6  ;;  %v5175_v34 = vmul.f32 %v4915_v40, %v4833_v48 }
 0x10d   : > { %8043 = vst [vmem:[#allocation77_spill] sm:$0xff] %v5163_v41  ;;  %8044 = vst [vmem:[#allocation78_spill] sm:$0xff] %v5167_v36  ;;  %v5190_v36 = vmul.f32 %v4915_v40, %v4836_v51 }
 0x10e   : > { %8045 = vst [vmem:[#allocation79_spill] sm:$0xff] %v5171_v42  ;;  %8046 = vst [vmem:[#allocation80_spill] sm:$0xff] %v5175_v34  ;;  %v5194_v42 = vmul.f32 %v4917_v63, %v4833_v48  ;;  %v5201_v34 = vmul.f32 %v4917_v63, %v4836_v51  ;;  %v5213_v48 = vmul.f32 %v4915_v40, %v4839_v56  ;;  %2481 = vperm.xlu1 %3913, %v4604_v14  }
 0x10f   : > { %8047 = vst [vmem:[#allocation81_spill] sm:$0xff] %v5182_v45  ;;  %8048 = vst [vmem:[#allocation82_spill] sm:$0xff] %v5186_v28  ;;  %v5205_v45 = vmul.f32 %v4908_v57, %v4839_v56  ;;  %v5209_v28 = vmul.f32 %v4913_v37, %v4839_v56  ;;  %v5221_v51 = vmul.f32 %v4913_v37, %v4842_v61  ;;  %2501 = vperm.xlu0 %3912, %v4616_v25  }
 0x110   : > { %8049 = vst [vmem:[#allocation83_spill] sm:$0xff] %v5190_v36  ;;  %8050 = vst [vmem:[#allocation84_spill] sm:$0xff] %v5194_v42  ;;  %v5225_v42 = vmul.f32 %v4915_v40, %v4842_v61  ;;  %v5349_v25 = vmul.f32 %v4913_v37, %v4860_v16  ;;  %v8109_v36 = vld [vmem:[#allocation24_spill] sm:$0xff] }
 0x111   : > { %8051 = vst [vmem:[#allocation85_spill] sm:$0xff] %v5201_v34  ;;  %8052 = vst [vmem:[#allocation86_spill] sm:$0xff] %v5205_v45  ;;  %v5229_v45 = vmul.f32 %v4917_v63, %v4839_v56  ;;  %v1650_v56 = vpop.permute.xlu1 %1649  ;;  %v5419_v34 = vmul.f32 %v4917_v63, %v4868_v53 }
 0x112   : > { %8053 = vst [vmem:[#allocation87_spill] sm:$0xff] %v5209_v28  ;;  %8054 = vst [vmem:[#allocation88_spill] sm:$0xff] %v5213_v48  ;;  %v5233_v28 = vmul.f32 %v4917_v63, %v4842_v61  ;;  %v5237_v48 = vmul.f32 %v4908_v57, %v4845_v0  ;;  %v5254_v61 = vmul.f32 %v4913_v37, %v4848_v5  ;;  %2489 = vperm.xlu1 %3913, %v4612_v20  }
 0x113   : > { %8055 = vst [vmem:[#allocation89_spill] sm:$0xff] %v5217_v13  ;;  %8056 = vst [vmem:[#allocation90_spill] sm:$0xff] %v5221_v51  ;;  %v5241_v13 = vmul.f32 %v4913_v37, %v4845_v0  ;;  %v5245_v51 = vmul.f32 %v4915_v40, %v4845_v0  ;;  %v5266_v1 = vmul.f32 %v4923_v26, %v1650_v56 }
 0x114   : > { %8057 = vst [vmem:[#allocation91_spill] sm:$0xff] %v5225_v42  ;;  %8058 = vst [vmem:[#allocation92_spill] sm:$0xff] %v5229_v45  ;;  %v5250_v45 = vmul.f32 %v4908_v57, %v4848_v5  ;;  %v5365_v42 = vmul.f32 %v4908_v57, %v4865_v18 }
 0x115   : > { %8059 = vst [vmem:[#allocation93_spill] sm:$0xff] %v5233_v28  ;;  %8060 = vst [vmem:[#allocation94_spill] sm:$0xff] %v5237_v48  ;;  %v5258_v48 = vmul.f32 %v4915_v40, %v4848_v5  ;;  %v5277_v28 = vpop.permute.xlu0 %1653 }
 0x116   : > { %8061 = vst [vmem:[#allocation95_spill] sm:$0xff] %v5241_v13  ;;  %8062 = vst [vmem:[#allocation96_spill] sm:$0xff] %v5245_v51  ;;  %v5262_v13 = vmul.f32 %v4917_v63, %v4845_v0  ;;  %v5269_v51 = vmul.f32 %v4925_v23, %v1650_v56  ;;  %v5281_v0 = vmul.f32 %v4917_v63, %v4848_v5 }
 0x117   : > { %8063 = vst [vmem:[#allocation97_spill] sm:$0xff] %v5250_v45  ;;  %8064 = vst [vmem:[#allocation98_spill] sm:$0xff] %v5254_v61  ;;  %v5272_v45 = vmul.f32 %v4927_v47, %v1650_v56  ;;  %v5275_v61 = vmul.f32 %v4932_v54, %v1650_v56  ;;  %v5297_v56 = vmul.f32 %v4908_v57, %v4854_v11 }
 0x118   : > { %8065 = vst [vmem:[#allocation99_spill] sm:$0xff] %v5258_v48  ;;  %8066 = vst [vmem:[#allocation100_spill] sm:$0xff] %v5262_v13  ;;  %v5289_v13 = vmul.f32 %v4913_v37, %v4851_v10  ;;  %v5293_v48 = vmul.f32 %v4915_v40, %v4851_v10  ;;  %v5301_v5 = vmul.f32 %v4913_v37, %v4854_v11 }
 0x119   : > { %8067 = vst [vmem:[#allocation101_spill] sm:$0xff] %v5266_v1  ;;  %8068 = vst [vmem:[#allocation102_spill] sm:$0xff] %v5269_v51 }
 0x11a   : > { %8069 = vst [vmem:[#allocation103_spill] sm:$0xff] %v5272_v45  ;;  %8070 = vst [vmem:[#allocation104_spill] sm:$0xff] %v5275_v61 }
 0x11b   : > { %8071 = vst [vmem:[#allocation105_spill] sm:$0xff] %v5281_v0  ;;  %8072 = vst [vmem:[#allocation106_spill] sm:$0xff] %v5285_v19  ;;  %v5305_v0 = vmul.f32 %v4915_v40, %v4854_v11  ;;  %v5309_v19 = vmul.f32 %v4917_v63, %v4851_v10 }
 0x11c   : > { %8073 = vst [vmem:[#allocation107_spill] sm:$0xff] %v5289_v13  ;;  %8074 = vst [vmem:[#allocation108_spill] sm:$0xff] %v5293_v48  ;;  %v1658_v13 = vpop.permute.xlu1 %1657  ;;  %v5314_v48 = vmul.f32 %v4917_v63, %v4854_v11 }
 0x11d   : > { %8075 = vst [vmem:[#allocation109_spill] sm:$0xff] %v5297_v56  ;;  %8076 = vst [vmem:[#allocation110_spill] sm:$0xff] %v5301_v5  ;;  %v5318_v56 = vmul.f32 %v4908_v57, %v4857_v15  ;;  %v5322_v5 = vmul.f32 %v4913_v37, %v4857_v15  ;;  %v5330_v14 = vmul.f32 %v4923_v26, %v1658_v13 }
 0x11e   : > { %8077 = vst [vmem:[#allocation111_spill] sm:$0xff] %v5305_v0  ;;  %8078 = vst [vmem:[#allocation112_spill] sm:$0xff] %v5309_v19  ;;  %v5326_v0 = vmul.f32 %v4915_v40, %v4857_v15  ;;  %v5333_v10 = vmul.f32 %v4925_v23, %v1658_v13  ;;  %v5336_v11 = vmul.f32 %v4927_v47, %v1658_v13  ;;  %v5341_v19 = vpop.permute.xlu0 %1661 }
 0x11f   : > { %8079 = vst [vmem:[#allocation113_spill] sm:$0xff] %v5314_v48  ;;  %8080 = vst [vmem:[#allocation114_spill] sm:$0xff] %v5318_v56  ;;  %v5339_v56 = vmul.f32 %v4932_v54, %v1658_v13  ;;  %v5357_v48 = vmul.f32 %v4917_v63, %v4857_v15  ;;  %v5361_v13 = vmul.f32 %v4917_v63, %v4860_v16 }
 0x120   : > { %8081 = vst [vmem:[#allocation115_spill] sm:$0xff] %v5322_v5  ;;  %8082 = vst [vmem:[#allocation116_spill] sm:$0xff] %v5326_v0  ;;  %v5345_v5 = vmul.f32 %v4908_v57, %v4860_v16  ;;  %v5353_v0 = vmul.f32 %v4915_v40, %v4860_v16  ;;  %v1666_v15 = vpop.permute.xlu1 %1665  ;;  %v5382_v16 = vmul.f32 %v4913_v37, %v4868_v53 }
 0x121   : > { %8083 = vst [vmem:[#allocation117_spill] sm:$0xff] %v5330_v14  ;;  %8084 = vst [vmem:[#allocation118_spill] sm:$0xff] %v5333_v10  ;;  %v5394_v20 = vmul.f32 %v4923_v26, %v1666_v15  ;;  %v8175_v14 = vld [vmem:[#allocation21_spill] sm:$0xff] }
 0x122   : > { %8085 = vst [vmem:[#allocation119_spill] sm:$0xff] %v5336_v11  ;;  %8086 = vst [vmem:[#allocation120_spill] sm:$0xff] %v5339_v56 }
 0x123   : > { %8087 = vst [vmem:[#allocation121_spill] sm:$0xff] %v5345_v5  ;;  %8088 = vst [vmem:[#allocation122_spill] sm:$0xff] %v5349_v25  ;;  %v5369_v5 = vmul.f32 %v4913_v37, %v4865_v18  ;;  %v5373_v25 = vmul.f32 %v4915_v40, %v4865_v18 }
 0x124   : > { %8089 = vst [vmem:[#allocation123_spill] sm:$0xff] %v5353_v0  ;;  %8090 = vst [vmem:[#allocation124_spill] sm:$0xff] %v5357_v48  ;;  %v5378_v48 = vmul.f32 %v4908_v57, %v4868_v53  ;;  %v1670_v0 = vpop.permute.xlu0 %1669 }
 0x125   : > { %8091 = vst [vmem:[#allocation125_spill] sm:$0xff] %v5361_v13  ;;  %8092 = vst [vmem:[#allocation126_spill] sm:$0xff] %v5365_v42  ;;  %v5386_v42 = vmul.f32 %v4915_v40, %v4868_v53  ;;  %v5397_v13 = vmul.f32 %v4925_v23, %v1666_v15 }
 0x126   : > { %8093 = vst [vmem:[#allocation127_spill] sm:$0xff] %v5369_v5  ;;  %8094 = vst [vmem:[#allocation128_spill] sm:$0xff] %v5373_v25  ;;  %v5390_v5 = vmul.f32 %v4917_v63, %v4865_v18  ;;  %v8099_v25 = vld [vmem:[#allocation12_spill] sm:$0xff]  ;;  %v5409_v18 = vmul.f32 %v4925_v23, %v1670_v0 }
 0x127   : > { %8095 = vst [vmem:[#allocation129_spill] sm:$0xff] %v5378_v48  ;;  %8096 = vst [vmem:[#allocation130_spill] sm:$0xff] %v5382_v16  ;;  %2509 = vperm.xlu0 %3912, %v8099_v25   ;;  %v5400_v48 = vmul.f32 %v4927_v47, %v1666_v15  ;;  %v5403_v16 = vmul.f32 %v4932_v54, %v1666_v15  ;;  %v5412_v25 = vmul.f32 %v4927_v47, %v1670_v0 }
 0x128   : > { %8097 = vst [vmem:[#allocation131_spill] sm:$0xff] %v5386_v42  ;;  %8098 = vst [vmem:[#allocation132_spill] sm:$0xff] %v5390_v5  ;;  %v5406_v42 = vmul.f32 %v4923_v26, %v1670_v0  ;;  %v5415_v5 = vmul.f32 %v4932_v54, %v1670_v0  ;;  %v5423_v15 = vmul.f32 %v4908_v57, %v8109_v36  ;;  %v1674_v0 = vpop.permute.xlu1 %1673  ;;  %v1678_v41 = vpop.permute.xlu0 %1677 }
 0x129   : > { %8100 = vst [vmem:[#allocation12_spill] sm:$0xff] %v5394_v20  ;;  %8101 = vst [vmem:[#allocation133_spill] sm:$0xff] %v5397_v13 }
 0x12a   : > { %8102 = vst [vmem:[#allocation134_spill] sm:$0xff] %v5400_v48  ;;  %8103 = vst [vmem:[#allocation135_spill] sm:$0xff] %v5403_v16  ;;  %v8149_v48 = vld [vmem:[#allocation18_spill] sm:$0xff] }
 0x12b   : > { %8104 = vst [vmem:[#allocation136_spill] sm:$0xff] %v5406_v42  ;;  %8105 = vst [vmem:[#allocation137_spill] sm:$0xff] %v5409_v18  ;;  %v5427_v42 = vmul.f32 %v4913_v37, %v8109_v36  ;;  %v5431_v18 = vmul.f32 %v4915_v40, %v8109_v36 }
 0x12c   : > { %8106 = vst [vmem:[#allocation138_spill] sm:$0xff] %v5412_v25  ;;  %8107 = vst [vmem:[#allocation139_spill] sm:$0xff] %v5415_v5  ;;  %v8113_v25 = vld [vmem:[#allocation11_spill] sm:$0xff]  ;;  %v8114_v5 = vld [vmem:[#allocation25_spill] sm:$0xff] }
 0x12d   : > { %8108 = vst [vmem:[#allocation140_spill] sm:$0xff] %v5419_v34  ;;  %8110 = vst [vmem:[#allocation24_spill] sm:$0xff] %v5423_v15  ;;  %2497 = vperm.xlu1 %3913, %v8113_v25   ;;  %v5436_v16 = vmul.f32 %v4908_v57, %v8114_v5  ;;  %v5440_v53 = vmul.f32 %v4913_v37, %v8114_v5  ;;  %v5444_v15 = vmul.f32 %v4915_v40, %v8114_v5 }
 0x12e   : > { %8111 = vst [vmem:[#allocation141_spill] sm:$0xff] %v5427_v42  ;;  %8112 = vst [vmem:[#allocation142_spill] sm:$0xff] %v5431_v18  ;;  %v5448_v42 = vmul.f32 %v4917_v63, %v8109_v36  ;;  %v8119_v18 = vld [vmem:[#allocation14_spill] sm:$0xff]  ;;  %v5452_v25 = vmul.f32 %v4923_v26, %v1674_v0  ;;  %v5455_v34 = vmul.f32 %v4925_v23, %v1674_v0 }
 0x12f   : > { %8115 = vst [vmem:[#allocation11_spill] sm:$0xff] %v5436_v16  ;;  %8116 = vst [vmem:[#allocation25_spill] sm:$0xff] %v5440_v53  ;;  %2517 = vperm.xlu0 %3912, %v8119_v18   ;;  %v5458_v16 = vmul.f32 %v4927_v47, %v1674_v0  ;;  %v5461_v53 = vmul.f32 %v4932_v54, %v1674_v0  ;;  %v5467_v36 = vmul.f32 %v4925_v23, %v1678_v41 }
 0x130   : > { %8117 = vst [vmem:[#allocation143_spill] sm:$0xff] %v5444_v15  ;;  %8118 = vst [vmem:[#allocation144_spill] sm:$0xff] %v5448_v42  ;;  %v5464_v15 = vmul.f32 %v4923_v26, %v1678_v41  ;;  %v5470_v18 = vmul.f32 %v4927_v47, %v1678_v41  ;;  %v5473_v42 = vmul.f32 %v4932_v54, %v1678_v41 }
 0x131   : > { %8120 = vst [vmem:[#allocation14_spill] sm:$0xff] %v5452_v25  ;;  %8121 = vst [vmem:[#allocation145_spill] sm:$0xff] %v5455_v34  ;;  %v5477_v34 = vmul.f32 %v4917_v63, %v8114_v5  ;;  %v5493_v41 = vmul.f32 %v4923_v26, %v5038_v44  ;;  %v5497_v5 = vmul.f32 %v4925_v23, %v5038_v44 }
 0x132   : > { %8122 = vst [vmem:[#allocation146_spill] sm:$0xff] %v5458_v16  ;;  %8123 = vst [vmem:[#allocation147_spill] sm:$0xff] %v5461_v53  ;;  %v8129_v16 = vld [vmem:[#allocation27_spill] sm:$0xff] }
 0x133   : > { %8124 = vst [vmem:[#allocation148_spill] sm:$0xff] %v5464_v15  ;;  %8125 = vst [vmem:[#allocation149_spill] sm:$0xff] %v5467_v36  ;;  %v5481_v0 = vmul.f32 %v4908_v57, %v8129_v16  ;;  %v5485_v15 = vmul.f32 %v4913_v37, %v8129_v16  ;;  %v5489_v36 = vmul.f32 %v4915_v40, %v8129_v16 }
 0x134   : > { %8126 = vst [vmem:[#allocation150_spill] sm:$0xff] %v5470_v18  ;;  %8127 = vst [vmem:[#allocation151_spill] sm:$0xff] %v5473_v42  ;;  %v1682_v42 = vpop.permute.xlu1 %1681 }
 0x135   : > { %8128 = vst [vmem:[#allocation152_spill] sm:$0xff] %v5477_v34  ;;  %8130 = vst [vmem:[#allocation27_spill] sm:$0xff] %v5481_v0  ;;  %v5501_v34 = vmul.f32 %v4927_v47, %v5038_v44  ;;  %v8133_v0 = vld [vmem:[#allocation13_spill] sm:$0xff]  ;;  %v5510_v18 = vmul.f32 %v4923_v26, %v1682_v42  ;;  %v5513_v53 = vmul.f32 %v4925_v23, %v1682_v42 }
 0x136   : > { %8131 = vst [vmem:[#allocation153_spill] sm:$0xff] %v5485_v15  ;;  %8132 = vst [vmem:[#allocation154_spill] sm:$0xff] %v5489_v36  ;;  %2505 = vperm.xlu1 %3913, %v8133_v0   ;;  %v5506_v15 = vmul.f32 %v4917_v63, %v8129_v16  ;;  %v8135_v36 = vld [vmem:[#allocation16_spill] sm:$0xff]  ;;  %v5516_v25 = vmul.f32 %v4927_v47, %v1682_v42  ;;  %v5519_v13 = vmul.f32 %v4932_v54, %v1682_v42  ;;  %v1686_v0 = vpop.permute.xlu0 %1685 }
 0x137   : > { %2525 = vperm.xlu0 %3912, %v8135_v36   ;;  %8136 = vst [vmem:[#allocation16_spill] sm:$0xff] %v5510_v18  ;;  %8137 = vst [vmem:[#allocation155_spill] sm:$0xff] %v5513_v53  ;;  %v5522_v6 = vmul.f32 %v4923_v26, %v1686_v0  ;;  %v5525_v16 = vmul.f32 %v4925_v23, %v1686_v0  ;;  %v5528_v36 = vmul.f32 %v4927_v47, %v1686_v0 }
 0x138   : > { %8134 = vst [vmem:[#allocation13_spill] sm:$0xff] %v5506_v15  ;;  %8138 = vst [vmem:[#allocation156_spill] sm:$0xff] %v5516_v25  ;;  %v5531_v15 = vmul.f32 %v4932_v54, %v1686_v0  ;;  %v5535_v53 = vmul.f32 %v4932_v54, %v5038_v44  ;;  %v5539_v42 = vmul.f32 %v4923_v26, %v5057_v29  ;;  %v1690_v44 = vpop.permute.xlu1 %1689 }
 0x139   : > { %8139 = vst [vmem:[#allocation157_spill] sm:$0xff] %v5519_v13  ;;  %8140 = vst [vmem:[#allocation158_spill] sm:$0xff] %v5522_v6  ;;  %v5543_v6 = vmul.f32 %v4925_v23, %v5057_v29  ;;  %v5551_v0 = vmul.f32 %v4932_v54, %v5057_v29  ;;  %v5574_v20 = vmul.f32 %v4927_v47, %v1690_v44 }
 0x13a   : > { %8141 = vst [vmem:[#allocation159_spill] sm:$0xff] %v5525_v16  ;;  %8142 = vst [vmem:[#allocation160_spill] sm:$0xff] %v5528_v36  ;;  %v5547_v16 = vmul.f32 %v4927_v47, %v5057_v29  ;;  %v8145_v36 = vld [vmem:[#allocation26_spill] sm:$0xff]  ;;  %v5568_v29 = vmul.f32 %v4923_v26, %v1690_v44  ;;  %v1694_v7 = vpop.permute.xlu0 %1693 }
 0x13b   : > { %8143 = vst [vmem:[#allocation161_spill] sm:$0xff] %v5531_v15  ;;  %v8144_v15 = vld [vmem:[#allocation15_spill] sm:$0xff]  ;;  %v5556_v13 = vmul.f32 %v4908_v57, %v8145_v36  ;;  %v5560_v25 = vmul.f32 %v4913_v37, %v8145_v36  ;;  %v5564_v18 = vmul.f32 %v4915_v40, %v8145_v36  ;;  %2533 = vperm.xlu0 %3912, %v8149_v48   ;;  %8152 = vst [vmem:[#allocation164_spill] sm:$0xff] %v5574_v20  ;;  %v8159_v20 = vld [vmem:[#allocation17_spill] sm:$0xff] }
 0x13c   : > { %2513 = vperm.xlu1 %3913, %v8144_v15   ;;  %8150 = vst [vmem:[#allocation18_spill] sm:$0xff] %v5568_v29  ;;  %v5571_v15 = vmul.f32 %v4925_v23, %v1690_v44  ;;  %v5586_v48 = vmul.f32 %v4927_v47, %v1694_v7  ;;  %v5589_v29 = vmul.f32 %v4932_v54, %v1694_v7 }
 0x13d   : > { %8146 = vst [vmem:[#allocation15_spill] sm:$0xff] %v5556_v13  ;;  %8147 = vst [vmem:[#allocation26_spill] sm:$0xff] %v5560_v25  ;;  %v5577_v13 = vmul.f32 %v4932_v54, %v1690_v44  ;;  %v5580_v25 = vmul.f32 %v4923_v26, %v1694_v7  ;;  %v5597_v44 = vmul.f32 %v4925_v23, %v5108_v38 }
 0x13e   : > { %8148 = vst [vmem:[#allocation162_spill] sm:$0xff] %v5564_v18  ;;  %8151 = vst [vmem:[#allocation163_spill] sm:$0xff] %v5571_v15  ;;  %v5583_v18 = vmul.f32 %v4925_v23, %v1694_v7  ;;  %v5593_v15 = vmul.f32 %v4923_v26, %v5108_v38  ;;  %v5609_v7 = vmul.f32 %v4932_v54, %v5108_v38  ;;  %v1702_v3 = vpop.permute.xlu0 %1701 }
 0x13f   : > { %8153 = vst [vmem:[#allocation165_spill] sm:$0xff] %v5577_v13  ;;  %8154 = vst [vmem:[#allocation166_spill] sm:$0xff] %v5580_v25  ;;  %v5601_v25 = vmul.f32 %v4927_v47, %v5108_v38  ;;  %v5621_v13 = vmul.f32 %v4927_v47, %v5127_v30  ;;  %v5638_v11 = vmul.f32 %v4923_v26, %v1702_v3 }
 0x140   : > { %8155 = vst [vmem:[#allocation167_spill] sm:$0xff] %v5583_v18  ;;  %8156 = vst [vmem:[#allocation168_spill] sm:$0xff] %v5586_v48  ;;  %v5605_v18 = vmul.f32 %v4917_v63, %v8145_v36  ;;  %v5617_v48 = vmul.f32 %v4925_v23, %v5127_v30  ;;  %2521 = vperm.xlu1 %3913, %v8159_v20   ;;  %v1698_v36 = vpop.permute.xlu1 %1697  ;;  %v5641_v20 = vmul.f32 %v4925_v23, %v1702_v3 }
 0x141   : > { %8157 = vst [vmem:[#allocation169_spill] sm:$0xff] %v5589_v29  ;;  %v5613_v29 = vmul.f32 %v4923_v26, %v5127_v30  ;;  %v5626_v38 = vmul.f32 %v4923_v26, %v1698_v36  ;;  %v5629_v56 = vmul.f32 %v4925_v23, %v1698_v36  ;;  %v5632_v10 = vmul.f32 %v4927_v47, %v1698_v36 }
 0x142   : > { %8158 = vst [vmem:[#allocation170_spill] sm:$0xff] %v5605_v18  ;;  %v8160_v18 = vld [vmem:[#allocation20_spill] sm:$0xff]  ;;  %v5635_v21 = vmul.f32 %v4932_v54, %v1698_v36  ;;  %8165 = vst [vmem:[#allocation173_spill] sm:$0xff] %v5638_v11  ;;  %v5655_v36 = vmul.f32 %v4923_v26, %v5178_v46  ;;  %v5659_v11 = vmul.f32 %v4925_v23, %v5178_v46  ;;  %v1710_v45 = vpop.permute.xlu0 %1709 }
 0x143   : > { %2541 = vperm.xlu0 %3912, %v8160_v18   ;;  %8161 = vst [vmem:[#allocation17_spill] sm:$0xff] %v5626_v38  ;;  %8162 = vst [vmem:[#allocation20_spill] sm:$0xff] %v5629_v56  ;;  %v5644_v18 = vmul.f32 %v4927_v47, %v1702_v3  ;;  %v5647_v38 = vmul.f32 %v4932_v54, %v1702_v3  ;;  %v5651_v56 = vmul.f32 %v4932_v54, %v5127_v30 }
 0x144   : > { %8163 = vst [vmem:[#allocation171_spill] sm:$0xff] %v5632_v10  ;;  %8164 = vst [vmem:[#allocation172_spill] sm:$0xff] %v5635_v21  ;;  %v5667_v3 = vmul.f32 %v4932_v54, %v5178_v46  ;;  %v5671_v30 = vmul.f32 %v4923_v26, %v5197_v8  ;;  %v8174_v21 = vld [vmem:[#allocation19_spill] sm:$0xff]  ;;  %v1706_v10 = vpop.permute.xlu1 %1705  ;;  %v5696_v1 = vmul.f32 %v4923_v26, %v1710_v45 }
 0x145   : > { %8166 = vst [vmem:[#allocation174_spill] sm:$0xff] %v5641_v20  ;;  %8167 = vst [vmem:[#allocation175_spill] sm:$0xff] %v5644_v18  ;;  %v5663_v20 = vmul.f32 %v4927_v47, %v5178_v46  ;;  %v5679_v18 = vmul.f32 %v4927_v47, %v5197_v8  ;;  %2529 = vperm.xlu1 %3913, %v8174_v21   ;;  %v5684_v46 = vmul.f32 %v4923_v26, %v1706_v10 }
 0x146   : > { %8168 = vst [vmem:[#allocation176_spill] sm:$0xff] %v5647_v38  ;;  %8169 = vst [vmem:[#allocation177_spill] sm:$0xff] %v5659_v11  ;;  %v5675_v38 = vmul.f32 %v4925_v23, %v5197_v8  ;;  %v5687_v61 = vmul.f32 %v4925_v23, %v1706_v10  ;;  %v5690_v51 = vmul.f32 %v4927_v47, %v1706_v10 }
 0x147   : > { %8170 = vst [vmem:[#allocation178_spill] sm:$0xff] %v5667_v3  ;;  %8171 = vst [vmem:[#allocation179_spill] sm:$0xff] %v5671_v30  ;;  %2549 = vperm.xlu0 %3912, %v8175_v14   ;;  %v5693_v35 = vmul.f32 %v4932_v54, %v1706_v10  ;;  %v5699_v21 = vmul.f32 %v4925_v23, %v1710_v45  ;;  %v5702_v14 = vmul.f32 %v4927_v47, %v1710_v45  ;;  %v8235_v30 = vld [vmem:[#allocation34_spill] sm:$0xff] }
 0x148   : > { %8172 = vst [vmem:[#allocation180_spill] sm:$0xff] %v5675_v38  ;;  %8173 = vst [vmem:[#allocation181_spill] sm:$0xff] %v5679_v18  ;;  %v5713_v10 = vmul.f32 %v4923_v26, %v5277_v28  ;;  %v8234_v38 = vld [vmem:[#allocation33_spill] sm:$0xff] }
 0x149   : > { %8176 = vst [vmem:[#allocation19_spill] sm:$0xff] %v5684_v46  ;;  %8177 = vst [vmem:[#allocation21_spill] sm:$0xff] %v5687_v61  ;;  %v5705_v46 = vmul.f32 %v4932_v54, %v1710_v45  ;;  %v5709_v61 = vmul.f32 %v4932_v54, %v5197_v8  ;;  %v5725_v45 = vmul.f32 %v4932_v54, %v5277_v28 }
 0x14a   : > { %8178 = vst [vmem:[#allocation182_spill] sm:$0xff] %v5690_v51  ;;  %8179 = vst [vmem:[#allocation183_spill] sm:$0xff] %v5693_v35  ;;  %v5729_v8 = vmul.f32 %v4923_v26, %v5341_v19  ;;  %v1714_v35 = vpop.permute.xlu1 %1713  ;;  %v8191_v51 = vld [vmem:[#allocation23_spill] sm:$0xff] }
 0x14b   : > { %8180 = vst [vmem:[#allocation184_spill] sm:$0xff] %v5696_v1  ;;  %8181 = vst [vmem:[#allocation185_spill] sm:$0xff] %v5699_v21  ;;  %v5717_v1 = vmul.f32 %v4925_v23, %v5277_v28  ;;  %v5721_v21 = vmul.f32 %v4927_v47, %v5277_v28  ;;  %v5742_v28 = vmul.f32 %v4925_v23, %v1714_v35 }
 0x14c   : > { %8182 = vst [vmem:[#allocation186_spill] sm:$0xff] %v5702_v14  ;;  %8183 = vst [vmem:[#allocation187_spill] sm:$0xff] %v5705_v46  ;;  %v5733_v46 = vmul.f32 %v4925_v23, %v5341_v19  ;;  %v4298_v14 = vld [vmem:[%s4582_s19 + $0x90] sm:$0xff] }
 0x14d   : > { %8184 = vst [vmem:[#allocation188_spill] sm:$0xff] %v5709_v61  ;;  %8185 = vst [vmem:[#allocation189_spill] sm:$0xff] %v5713_v10  ;;  %2537 = vperm.xlu1 %3913, %v4298_v14   ;;  %v8192_v10 = vld [vmem:[#allocation22_spill] sm:$0xff] }
 0x14e   : > { %8186 = vst [vmem:[#allocation190_spill] sm:$0xff] %v5717_v1  ;;  %8187 = vst [vmem:[#allocation191_spill] sm:$0xff] %v5721_v21  ;;  %v2598_v1 = vsub.s32 7, %v8191_v51  ;;  %2557 = vperm.xlu0 %3912, %v8192_v10   ;;  %v5739_v21 = vmul.f32 %v4923_v26, %v1714_v35 }
 0x14f   : > { %8188 = vst [vmem:[#allocation192_spill] sm:$0xff] %v5725_v45  ;;  %8189 = vst [vmem:[#allocation193_spill] sm:$0xff] %v5729_v8  ;;  %v5745_v8 = vmul.f32 %v4927_v47, %v1714_v35  ;;  %v5748_v45 = vmul.f32 %v4932_v54, %v1714_v35  ;;  %v5768_v35 = vmul.f32 %v4932_v54, %v5341_v19 }
 0x150   : > { %8190 = vst [vmem:[#allocation194_spill] sm:$0xff] %v5733_v46  ;;  %8193 = vst [vmem:[#allocation23_spill] sm:$0xff] %v5739_v21  ;;  %v1718_v46 = vpop.permute.xlu0 %1717 }
 0x151   : > { %8194 = vst [vmem:[#allocation22_spill] sm:$0xff] %v5742_v28  ;;  %8195 = vst [vmem:[#allocation195_spill] sm:$0xff] %v5745_v8  ;;  %v5751_v14 = vmul.f32 %v4923_v26, %v1718_v46  ;;  %v5754_v51 = vmul.f32 %v4925_v23, %v1718_v46  ;;  %v5757_v10 = vmul.f32 %v4927_v47, %v1718_v46 }
 0x152   : > { %8196 = vst [vmem:[#allocation196_spill] sm:$0xff] %v5748_v45  ;;  %v5760_v21 = vmul.f32 %v4932_v54, %v1718_v46  ;;  %v5764_v28 = vmul.f32 %v4927_v47, %v5341_v19  ;;  %8202 = vst [vmem:[#allocation202_spill] sm:$0xff] %v5768_v35  ;;  %v1722_v46 = vpop.permute.xlu1 %1721  ;;  %v2599_v45 = vrot.slane %v4874_v22, %v2598_v1  ;;  %2565 = vperm.xlu0 %3912, %v4693_v59  }
 0x153   : > { %8197 = vst [vmem:[#allocation197_spill] sm:$0xff] %v5751_v14  ;;  %8198 = vst [vmem:[#allocation198_spill] sm:$0xff] %v5754_v51  ;;  %v5772_v14 = vmul.f32 %v4908_v57, %v4930_v12  ;;  %v5776_v51 = vmul.f32 %v4913_v37, %v4930_v12  ;;  %v5784_v19 = vmul.f32 %v4915_v40, %v4930_v12 }
 0x154   : > { %8199 = vst [vmem:[#allocation199_spill] sm:$0xff] %v5757_v10  ;;  %8200 = vst [vmem:[#allocation200_spill] sm:$0xff] %v5760_v21  ;;  %v4299_v10 = vld [vmem:[%s4582_s19 + $0xa0] sm:$0xff]  ;;  %v2595_v21 = vrot.slane %v4874_v22, %v4911_v52  ;;  %v5798_v8 = vmul.f32 %v4927_v47, %v1722_v46  ;;  %v5801_v22 = vmul.f32 %v4932_v54, %v1722_v46 }
 0x155   : > { %8201 = vst [vmem:[#allocation201_spill] sm:$0xff] %v5764_v28  ;;  %8203 = vst [vmem:[#allocation203_spill] sm:$0xff] %v5772_v14  ;;  %2545 = vperm.xlu1 %3913, %v4299_v10   ;;  %v5788_v14 = vmul.f32 %v4917_v63, %v4930_v12  ;;  %v5792_v10 = vmul.f32 %v4923_v26, %v1722_v46 }
 0x156   : > { %8204 = vst [vmem:[#allocation204_spill] sm:$0xff] %v5776_v51  ;;  %8205 = vst [vmem:[#allocation205_spill] sm:$0xff] %v5784_v19  ;;  %v5795_v51 = vmul.f32 %v4925_v23, %v1722_v46  ;;  %v1726_v19 = vpop.permute.xlu0 %1725  ;;  %v2603_v46 = vrot.slane %v4884_v58, %v4911_v52  ;;  %2573 = vperm.xlu0 %3912, %v4704_v62  }
 0x157   : > { %8206 = vst [vmem:[#allocation206_spill] sm:$0xff] %v5788_v14  ;;  %8207 = vst [vmem:[#allocation207_spill] sm:$0xff] %v5792_v10  ;;  %v5804_v35 = vmul.f32 %v4923_v26, %v1726_v19  ;;  %v5807_v12 = vmul.f32 %v4925_v23, %v1726_v19  ;;  %v5810_v59 = vmul.f32 %v4927_v47, %v1726_v19 }
 0x158   : > { %8208 = vst [vmem:[#allocation208_spill] sm:$0xff] %v5795_v51  ;;  %8209 = vst [vmem:[#allocation209_spill] sm:$0xff] %v5798_v8  ;;  %v5813_v14 = vmul.f32 %v4932_v54, %v1726_v19  ;;  %v5834_v19 = vmul.f32 %v4915_v40, %v4921_v32  ;;  %v5839_v51 = vrot.slane %v2595_v21, %v4911_v52 }
 0x159   : > { %8210 = vst [vmem:[#allocation210_spill] sm:$0xff] %v5801_v22  ;;  %8211 = vst [vmem:[#allocation211_spill] sm:$0xff] %v5804_v35  ;;  %v5826_v35 = vmul.f32 %v4908_v57, %v4921_v32  ;;  %v2607_v22 = vrot.slane %v4884_v58, %v2598_v1  ;;  %v5842_v8 = vrot.slane %v2599_v45, %v4911_v52  ;;  %v816_v45 = vpop.f32.mrb[0].mxu0 }
 0x15a   : > { %8212 = vst [vmem:[#allocation212_spill] sm:$0xff] %v5807_v12  ;;  %8213 = vst [vmem:[#allocation213_spill] sm:$0xff] %v5810_v59  ;;  %v5830_v12 = vmul.f32 %v4913_v37, %v4921_v32  ;;  %v1730_v59 = vpop.permute.xlu1 %1729  ;;  %v1734_v21 = vpop.permute.xlu0 %1733 }
 0x15b   : > { %8214 = vst [vmem:[#allocation214_spill] sm:$0xff] %v5813_v14  ;;  %8215 = vst [vmem:[#allocation215_spill] sm:$0xff] %v5826_v35  ;;  %v4300_v14 = vld [vmem:[%s4582_s19 + $0xb0] sm:$0xff]  ;;  %v5846_v35 = vmul.f32 %v4917_v63, %v4921_v32  ;;  %v5856_v58 = vmul.f32 %v4927_v47, %v1730_v59  ;;  %v5859_v1 = vmul.f32 %v4932_v54, %v1730_v59 }
 0x15c   : > { %8216 = vst [vmem:[#allocation216_spill] sm:$0xff] %v5830_v12  ;;  %8217 = vst [vmem:[#allocation217_spill] sm:$0xff] %v5834_v19  ;;  %2553 = vperm.xlu1 %3913, %v4300_v14   ;;  %v5850_v12 = vmul.f32 %v4923_v26, %v1730_v59  ;;  %v5853_v14 = vmul.f32 %v4925_v23, %v1730_v59  ;;  %v5862_v19 = vld [vmem:[%s5820_s21] sm:$0xff]   ;;  %v5865_v32 = vmul.f32 %v4923_v26, %v1734_v21  ;;  %v818_v59 = vpop.f32.mrb[1].mxu0 }
 0x15d   : > { %8218 = vst [vmem:[#allocation218_spill] sm:$0xff] %v5839_v51  ;;  %8219 = vst [vmem:[#allocation219_spill] sm:$0xff] %v5842_v8  ;;  %v5868_v62 = vmul.f32 %v4925_v23, %v1734_v21  ;;  %v819_v10 = vadd.f32 %v818_v59, %v4938_v17  ;;  %v5880_v51 = vrot.slane %v2603_v46, %v4911_v52  ;;  %v8233_v59 = vld [vmem:[#allocation32_spill] sm:$0xff] }
 0x15e   : > { %8220 = vst [vmem:[#allocation220_spill] sm:$0xff] %v5846_v35  ;;  %8221 = vst [vmem:[#allocation221_spill] sm:$0xff] %v5850_v12  ;;  %v5871_v35 = vmul.f32 %v4927_v47, %v1734_v21  ;;  %v1738_v3 = vpop.permute.xlu1 %1737 }
 0x15f   : > { %8222 = vst [vmem:[#allocation222_spill] sm:$0xff] %v5853_v14  ;;  %8223 = vst [vmem:[#allocation223_spill] sm:$0xff] %v5856_v58  ;;  %v5874_v14 = vmul.f32 %v4932_v54, %v1734_v21  ;;  %v1009_v58 = vpop.f32.mrb[0].mxu1  ;;  %v1497_v46 = vadd.f32 %v8235_v30, %v819_v10 }
 0x160   : > { %8224 = vst [vmem:[#allocation224_spill] sm:$0xff] %v5859_v1  ;;  %8225 = vst [vmem:[#allocation225_spill] sm:$0xff] %v5862_v19  ;;  %v817_v1 = vadd.f32 %v816_v45, %v4934_v50  ;;  %v1010_v12 = vadd.f32 %v1009_v58, %v4936_v31  ;;  %v1011_v8 = vpop.f32.mrb[1].mxu1  ;;  %v5887_v58 = vrot.slane %v2607_v22, %v4911_v52  ;;  %v8317_v19 = vld [vmem:[#allocation192_spill] sm:$0xff] }
 0x161   : > { %8226 = vst [vmem:[#allocation226_spill] sm:$0xff] %v5865_v32  ;;  %8227 = vst [vmem:[#allocation227_spill] sm:$0xff] %v5868_v62  ;;  %v820_v32 = vpop.f32.mrb[2].mxu0  ;;  %v8231_v62 = vld [vmem:[#allocation35_spill] sm:$0xff]  ;;  %v1013_v21 = vpop.f32.mrb[2].mxu1  ;;  %v5905_v10 = vadd.f32 %v5543_v6, %v1497_v46  ;;  %v5921_v6 = vmul.f32 %v4923_v26, %v1738_v3 }
 0x162   : > { %8228 = vst [vmem:[#allocation228_spill] sm:$0xff] %v5871_v35  ;;  %8229 = vst [vmem:[#allocation229_spill] sm:$0xff] %v5874_v14  ;;  %v1012_v28 = vadd.f32 %v1011_v8, %v8231_v62  ;;  %v821_v35 = vadd.f32 %v820_v32, %v4934_v50  ;;  %v4301_v14 = vld [vmem:[%s4582_s19 + $0xc0] sm:$0xff]  ;;  %v822_v2 = vpop.f32.mrb[3].mxu0  ;;  %v1496_v61 = vadd.f32 %v8233_v59, %v817_v1  ;;  %v4302_v8 = vld [vmem:[%s4582_s19 + $0xe8] sm:$0xff]  ;;  %v1015_v32 = vpop.f32.mrb[3].mxu1 }
 0x163   : > { %8230 = vst [vmem:[#allocation230_spill] sm:$0xff] %v5880_v51  ;;  %2561 = vperm.xlu1 %3913, %v4301_v14   ;;  %8232 = vst [vmem:[#allocation35_spill] sm:$0xff] %v5887_v58  ;;  %v1498_v18 = vadd.f32 %v8234_v38, %v1010_v12  ;;  %v1014_v51 = vadd.f32 %v1013_v21, %v4936_v31  ;;  %2581 = vperm.xlu0 %3912, %v4302_v8   ;;  %v8236_v14 = vld [vmem:[#allocation36_spill] sm:$0xff]  ;;  %v1742_v1 = vpop.permute.xlu0 %1741  ;;  %v8237_v12 = vld [vmem:[#allocation46_spill] sm:$0xff]  ;;  %v1019_v8 = vpop.f32.mrb[4].mxu1 }
 0x164   : > { %v1499_v11 = vadd.f32 %v8236_v14, %v1012_v28  ;;  %v1500_v45 = vadd.f32 %v4999_v39, %v821_v35  ;;  %v823_v52 = vadd.f32 %v822_v2, %v4938_v17  ;;  %v1016_v22 = vadd.f32 %v1015_v32, %v8231_v62  ;;  %v8238_v2 = vld [vmem:[#allocation47_spill] sm:$0xff]  ;;  %8239 = vst [vmem:[#allocation32_spill] sm:$0xff] %v5921_v6 }
 0x165   : > { %v5899_v38 = vadd.f32 %v5539_v42, %v1496_v61  ;;  %v5902_v30 = vadd.f32 %v5547_v16, %v1498_v18  ;;  %v1502_v21 = vadd.f32 %v8237_v12, %v1014_v51  ;;  %v4303_v61 = vld [vmem:[%s4582_s19 + $0xd0] sm:$0xff]  ;;  %v5924_v42 = vmul.f32 %v4925_v23, %v1738_v3  ;;  %v826_v18 = vpop.f32.mrb[4].mxu0  ;;  %v8362_v58 = vld [vmem:[#allocation75_spill] sm:$0xff] }
 0x166   : > { %v5909_v28 = vadd.f32 %v5551_v0, %v1499_v11  ;;  %v5912_v39 = vadd.f32 %v5493_v41, %v1500_v45  ;;  %v1501_v35 = vadd.f32 %v8238_v2, %v823_v52  ;;  %v1503_v59 = vadd.f32 %v5011_v43, %v1016_v22  ;;  %v4304_v41 = vld [vmem:[%s4582_s19 + $0xf8] sm:$0xff]  ;;  %v1746_v0 = vpop.permute.xlu1 %1745  ;;  %v1021_v52 = vpop.f32.mrb[5].mxu1 }
 0x167   : > { %2569 = vperm.xlu1 %3913, %v4303_v61   ;;  %v5918_v16 = vadd.f32 %v5501_v34, %v1502_v21  ;;  %8240 = vst [vmem:[#allocation33_spill] sm:$0xff] %v5924_v42  ;;  %v5927_v11 = vmul.f32 %v4927_v47, %v1738_v3  ;;  %2589 = vperm.xlu0 %3912, %v4304_v41   ;;  %v1750_v46 = vpop.permute.xlu0 %1749 }
 0x168   : > { %v5931_v43 = vadd.f32 %v5497_v5, %v1501_v35  ;;  %v5934_v51 = vadd.f32 %v5535_v53, %v1503_v59  ;;  %v5937_v34 = vmul.f32 %v4932_v54, %v1738_v3  ;;  %v5940_v45 = vmul.f32 %v4923_v26, %v1742_v1  ;;  %v828_v3 = vpop.f32.mrb[5].mxu0  ;;  %v4305_v59 = vld [vmem:[%s4582_s19 + $0xe0] sm:$0xff] }
 0x169   : > { %8241 = vst [vmem:[#allocation34_spill] sm:$0xff] %v5927_v11  ;;  %v5943_v32 = vmul.f32 %v4925_v23, %v1742_v1  ;;  %v5946_v14 = vmul.f32 %v4927_v47, %v1742_v1  ;;  %v5949_v5 = vmul.f32 %v4932_v54, %v1742_v1  ;;  %v5952_v53 = vmul.f32 %v4923_v26, %v1746_v0  ;;  %v830_v35 = vpop.f32.mrb[6].mxu0  ;;  %v1023_v1 = vpop.f32.mrb[6].mxu1 }
 0x16a   : > { %8242 = vst [vmem:[#allocation36_spill] sm:$0xff] %v5937_v34  ;;  %8243 = vst [vmem:[#allocation46_spill] sm:$0xff] %v5940_v45  ;;  %v5955_v22 = vmul.f32 %v4925_v23, %v1746_v0  ;;  %v5958_v12 = vmul.f32 %v4927_v47, %v1746_v0  ;;  %v5961_v21 = vmul.f32 %v4932_v54, %v1746_v0  ;;  %v832_v0 = vpop.f32.mrb[7].mxu0  ;;  %v8259_v45 = vld [vmem:[#allocation43_spill] sm:$0xff]  ;;  %v4306_v34 = vld [vmem:[%s4582_s19 + $0xf0] sm:$0xff]  ;;  %s3695_s19 = sshll.u32 %s7037_s16, 8 }
 0x16b   : > { %8244 = vst [vmem:[#allocation47_spill] sm:$0xff] %v5943_v32  ;;  %8245 = vst [vmem:[#allocation231_spill] sm:$0xff] %v5946_v14  ;;  %v5964_v2 = vmul.f32 %v4923_v26, %v1750_v46  ;;  %2577 = vperm.xlu1 %3913, %v4305_v59   ;;  %v5968_v61 = vmul.f32 %v4925_v23, %v1750_v46  ;;  %v5971_v41 = vmul.f32 %v4927_v47, %v1750_v46  ;;  %v8257_v32 = vld [vmem:[#allocation40_spill] sm:$0xff]  ;;  %v8258_v14 = vld [vmem:[#allocation42_spill] sm:$0xff]  ;;  %s7081_s20 = scalar_lea.vmem [#allocation6], %s3695_s19  ;;  %s7138_s22 = scalar_lea.vmem [#allocation5], %s3695_s19 }
 0x16c   : > { %8246 = vst [vmem:[#allocation232_spill] sm:$0xff] %v5949_v5  ;;  %8247 = vst [vmem:[#allocation233_spill] sm:$0xff] %v5952_v53  ;;  %v1020_v26 = vadd.f32 %v1019_v8, %v4936_v31  ;;  %v1022_v59 = vadd.f32 %v1021_v52, %v8231_v62  ;;  %v831_v23 = vadd.f32 %v830_v35, %v4934_v50  ;;  %v8255_v53 = vld [vmem:[#allocation38_spill] sm:$0xff]  ;;  %s3559_s29 = sshll.u32 %s7081_s20, 4  ;;  %s7841_s29 = int_to_ptr.vmem [resolvable:$true] %s3559_s29 }
 0x16d   : > { %8248 = vst [vmem:[#allocation234_spill] sm:$0xff] %v5955_v22  ;;  %8249 = vst [vmem:[#allocation235_spill] sm:$0xff] %v5958_v12  ;;  %v5974_v22 = vmul.f32 %v4932_v54, %v1750_v46  ;;  %v827_v12 = vadd.f32 %v826_v18, %v4934_v50  ;;  %v833_v54 = vadd.f32 %v832_v0, %v4938_v17  ;;  %v2050_v46 = vpop.permute.xlu0 %2049  ;;  %s4336_s13 = scalar_lea.vmem %s7841_s29, 4096  ;;  %p4343_p2 = scmp.lt.s32.totalorder %s7841_s29, %s4341_s18 }
 0x16e   : > { %8250 = vst [vmem:[#allocation236_spill] sm:$0xff] %v5961_v21  ;;  %8251 = vst [vmem:[#allocation237_spill] sm:$0xff] %v5964_v2  ;;  %v1025_v21 = vpop.f32.mrb[7].mxu1  ;;  %v829_v2 = vadd.f32 %v828_v3, %v4938_v17  ;;  %v1507_v3 = vadd.f32 %v8258_v14, %v1022_v59  ;;  %v1508_v52 = vadd.f32 %v8259_v45, %v831_v23  ;;  %p4337_p6 = scmp.ne.s32.totalorder %s7841_s29, %s4336_s13 }
 0x16f   : > { %8252 = vst [vmem:[#allocation238_spill] sm:$0xff] %v5968_v61  ;;  %8253 = vst [vmem:[#allocation239_spill] sm:$0xff] %v5971_v41  ;;  %v2046_v61 = vpop.permute.xlu1 %2045  ;;  %v1504_v47 = vadd.f32 %v8255_v53, %v827_v12  ;;  %v1024_v41 = vadd.f32 %v1023_v1, %v4936_v31  ;;  %v1026_v18 = vadd.f32 %v1025_v21, %v8231_v62  ;;  %2585 = vperm.xlu1 %3913, %v4306_v34   ;;  %v8260_v53 = vld [vmem:[#allocation44_spill] sm:$0xff]  ;;  %v8261_v1 = vld [vmem:[#allocation45_spill] sm:$0xff]  ;;  %v836_v21 = vpop.f32.mrb[8].mxu0 }
 0x170   : > { %8254 = vst [vmem:[#allocation240_spill] sm:$0xff] %v5974_v22  ;;  %v8256_v22 = vld [vmem:[#allocation39_spill] sm:$0xff]  ;;  %v1505_v8 = vadd.f32 %v8257_v32, %v829_v2  ;;  %v1509_v42 = vadd.f32 %v8261_v1, %v833_v54  ;;  %v1927_v32 = vadd.f32 %v5609_v7, %v1507_v3  ;;  %v5998_v14 = vadd.f32 %v5613_v29, %v1508_v52  ;;  %v1029_v45 = vpop.f32.mrb[8].mxu1  ;;  %p4338_p10 = pnand %p4337_p6, %p8864_p9 }
 0x171   : > { %v1506_v5 = vadd.f32 %v8256_v22, %v1020_v26  ;;  %v1924_v35 = vadd.f32 %v5593_v15, %v1504_v47  ;;  %v1510_v12 = vadd.f32 %v8260_v53, %v1024_v41  ;;  %v1511_v0 = vadd.f32 %v5015_v55, %v1026_v18  ;;  %v2062_v41 = vpop.permute.xlu0 %2061  ;;  %v1031_v7 = vpop.f32.mrb[9].mxu1 }
 0x172   : > { %v1925_v22 = vadd.f32 %v5597_v44, %v1505_v8  ;;  %v6004_v2 = vadd.f32 %v5617_v48, %v1509_v42  ;;  %v2212_v29 = vmul.f32 %v5017_v27, %v2050_v46  ;;  %v6027_v42 = vmul.f32 %v5017_v27, %v2046_v61  ;;  %v1033_v54 = vpop.f32.mrb[10].mxu1  ;;  %p4339_p12 = pneg %p4338_p10 }
 0x173   : > { %v1926_v11 = vadd.f32 %v5601_v25, %v1506_v5  ;;  %v2054_v34 = vpop.permute.xlu1 %2053  ;;  %v6001_v15 = vadd.f32 %v5621_v13, %v1510_v12  ;;  %v6007_v55 = vadd.f32 %v5651_v56, %v1511_v0  ;;  %v838_v25 = vpop.f32.mrb[9].mxu0  ;;  %v8262_v5 = vld [vmem:[#allocation41_spill] sm:$0xff]  ;;  %v2213_v59 = vmul.f32 %v5019_v4, %v2050_v46 }
 0x174   : > { %v6011_v44 = vmul.f32 %v4908_v57, %v8262_v5  ;;  %v840_v26 = vpop.f32.mrb[10].mxu0  ;;  %v6016_v13 = vmul.f32 %v4913_v37, %v8262_v5  ;;  %v6020_v48 = vmul.f32 %v4915_v40, %v8262_v5  ;;  %v6024_v56 = vmul.f32 %v4917_v63, %v8262_v5  ;;  %v1035_v12 = vpop.f32.mrb[11].mxu1 }
 0x175   : > { %v2214_v23 = vmul.f32 %v5021_v49, %v2050_v46  ;;  %v2215_v47 = vmul.f32 %v5024_v9, %v2050_v46  ;;  %v842_v18 = vpop.f32.mrb[11].mxu0  ;;  %v6033_v8 = vmul.f32 %v5019_v4, %v2046_v61  ;;  %v6036_v3 = vmul.f32 %v5021_v49, %v2046_v61  ;;  %v6054_v40 = vpop.permute.xlu0 %2069 }
 0x176   : > { %8263 = vst [vmem:[#allocation38_spill] sm:$0xff] %v6011_v44  ;;  %8264 = vst [vmem:[#allocation39_spill] sm:$0xff] %v6016_v13  ;;  %v6039_v52 = vmul.f32 %v5024_v9, %v2046_v61  ;;  %v6042_v53 = vadd.f32 %v2212_v29, %v5912_v39  ;;  %v6045_v0 = vadd.f32 %v2213_v59, %v5931_v43 }
 0x177   : > { %8265 = vst [vmem:[#allocation40_spill] sm:$0xff] %v6020_v48  ;;  %8266 = vst [vmem:[#allocation42_spill] sm:$0xff] %v6024_v56  ;;  %v2058_v1 = vpop.permute.xlu1 %2057  ;;  %v6048_v46 = vadd.f32 %v2214_v23, %v5918_v16  ;;  %v6051_v5 = vadd.f32 %v2215_v47, %v5934_v51  ;;  %v837_v63 = vadd.f32 %v836_v21, %v4934_v50  ;;  %v846_v23 = vpop.f32.mrb[12].mxu0  ;;  %v8271_v21 = vld [vmem:[#allocation49_spill] sm:$0xff] }
 0x178   : > { %8267 = vst [vmem:[#allocation43_spill] sm:$0xff] %v6042_v53  ;;  %8268 = vst [vmem:[#allocation44_spill] sm:$0xff] %v6045_v0  ;;  %v1030_v61 = vadd.f32 %v1029_v45, %v4936_v31  ;;  %v2216_v39 = vmul.f32 %v5017_v27, %v2054_v34  ;;  %v2217_v29 = vmul.f32 %v5019_v4, %v2054_v34  ;;  %v1039_v48 = vpop.f32.mrb[12].mxu1 }
 0x179   : > { %8269 = vst [vmem:[#allocation45_spill] sm:$0xff] %v6048_v46  ;;  %8270 = vst [vmem:[#allocation41_spill] sm:$0xff] %v6051_v5  ;;  %v2218_v37 = vmul.f32 %v5021_v49, %v2054_v34  ;;  %v1512_v43 = vadd.f32 %v5028_v24, %v837_v63  ;;  %v2219_v16 = vmul.f32 %v5024_v9, %v2054_v34  ;;  %v6078_v6 = vpop.permute.xlu0 %2077  ;;  %v8283_v5 = vld [vmem:[#allocation178_spill] sm:$0xff] }
 0x17a   : > { %v2224_v59 = vmul.f32 %v5017_v27, %v2062_v41  ;;  %v2225_v51 = vmul.f32 %v5019_v4, %v2062_v41  ;;  %v1514_v47 = vadd.f32 %v8271_v21, %v1030_v61  ;;  %v6065_v57 = vadd.f32 %v2216_v39, %v1924_v35  ;;  %v6080_v61 = vpop.f32.mrb[13].mxu0  ;;  %v6086_v39 = vpop.f32.mrb[13].mxu1 }
 0x17b   : > { %v6067_v45 = vadd.f32 %v2217_v29, %v1925_v22  ;;  %v6069_v56 = vadd.f32 %v2218_v37, %v1926_v11  ;;  %v6071_v13 = vpop.permute.xlu1 %2065  ;;  %v1932_v63 = vadd.f32 %v5655_v36, %v1512_v43  ;;  %v6074_v24 = vadd.f32 %v2219_v16, %v1927_v32  ;;  %v6088_v36 = vpop.f32.mrb[14].mxu0 }
 0x17c   : > { %8272 = vst [vmem:[#allocation49_spill] sm:$0xff] %v6065_v57  ;;  %v2226_v34 = vmul.f32 %v5021_v49, %v2062_v41  ;;  %v2227_v44 = vmul.f32 %v5024_v9, %v2062_v41  ;;  %v1934_v35 = vadd.f32 %v5663_v20, %v1514_v47  ;;  %v839_v37 = vadd.f32 %v838_v25, %v4938_v17  ;;  %v6095_v16 = vpop.f32.mrb[14].mxu1  ;;  %v6097_v20 = vpop.f32.mrb[15].mxu0  ;;  %v8279_v47 = vld [vmem:[#allocation50_spill] sm:$0xff] }
 0x17d   : > { %8273 = vst [vmem:[#allocation241_spill] sm:$0xff] %v6067_v45  ;;  %8274 = vst [vmem:[#allocation242_spill] sm:$0xff] %v6069_v56  ;;  %v1032_v11 = vadd.f32 %v1031_v7, %v8231_v62  ;;  %v841_v22 = vadd.f32 %v840_v26, %v4934_v50  ;;  %v6090_v32 = vadd.f32 %v2224_v59, %v1932_v63  ;;  %v8278_v26 = vld [vmem:[#allocation51_spill] sm:$0xff]  ;;  %v1045_v59 = vpop.f32.mrb[15].mxu1  ;;  %v8280_v63 = vld [vmem:[#allocation52_spill] sm:$0xff] }
 0x17e   : > { %8275 = vst [vmem:[#allocation243_spill] sm:$0xff] %v6074_v24  ;;  %v1034_v41 = vadd.f32 %v1033_v54, %v4936_v31  ;;  %v843_v29 = vadd.f32 %v842_v18, %v4938_v17  ;;  %v1036_v43 = vadd.f32 %v1035_v12, %v8231_v62  ;;  %v6099_v25 = vadd.f32 %v2226_v34, %v1934_v35  ;;  %v8281_v18 = vld [vmem:[#allocation53_spill] sm:$0xff]  ;;  %v8284_v35 = vld [vmem:[#allocation179_spill] sm:$0xff] }
 0x17f   : > { %8276 = vst [vmem:[#allocation244_spill] sm:$0xff] %v6090_v32  ;;  %v1513_v7 = vadd.f32 %v5042_v33, %v839_v37  ;;  %v1515_v21 = vadd.f32 %v8278_v26, %v1032_v11  ;;  %v1516_v24 = vadd.f32 %v8279_v47, %v841_v22  ;;  %v2220_v12 = vmul.f32 %v5017_v27, %v2058_v1  ;;  %v8282_v45 = vld [vmem:[#allocation177_spill] sm:$0xff]  ;;  %v8286_v22 = vld [vmem:[#allocation180_spill] sm:$0xff] }
 0x180   : > { %8277 = vst [vmem:[#allocation245_spill] sm:$0xff] %v6099_v25  ;;  %v1518_v32 = vadd.f32 %v8280_v63, %v1034_v41  ;;  %v1517_v54 = vadd.f32 %v5054_v60, %v843_v29  ;;  %v1519_v56 = vadd.f32 %v8281_v18, %v1036_v43  ;;  %v2221_v33 = vmul.f32 %v5019_v4, %v2058_v1  ;;  %v8285_v37 = vld [vmem:[#allocation181_spill] sm:$0xff]  ;;  %v8287_v41 = vld [vmem:[#allocation188_spill] sm:$0xff]  ;;  %v6120_v43 = vpop.f32.mrb[16].mxu0 }
 0x181   : > { %v1933_v57 = vadd.f32 %v8282_v45, %v1513_v7  ;;  %v1935_v34 = vadd.f32 %v8283_v5, %v1515_v21  ;;  %v6111_v25 = vadd.f32 %v8284_v35, %v1516_v24  ;;  %v2222_v29 = vmul.f32 %v5021_v49, %v2058_v1  ;;  %v6133_v21 = vpop.f32.mrb[16].mxu1 }
 0x182   : > { %v1938_v11 = vadd.f32 %v8285_v37, %v1518_v32  ;;  %v6116_v26 = vadd.f32 %v8286_v22, %v1517_v54  ;;  %v1939_v60 = vadd.f32 %v8287_v41, %v1519_v56  ;;  %v6124_v45 = vadd.f32 %v6027_v42, %v5899_v38  ;;  %v6131_v32 = vpop.permute.xlu1 %2073  ;;  %v6152_v42 = vpop.f32.mrb[17].mxu0  ;;  %v8301_v41 = vld [vmem:[#allocation101_spill] sm:$0xff] }
 0x183   : > { %v6126_v5 = vadd.f32 %v2225_v51, %v1933_v57  ;;  %v6128_v24 = vadd.f32 %v2227_v44, %v1935_v34  ;;  %v2223_v7 = vmul.f32 %v5024_v9, %v2058_v1  ;;  %v6137_v56 = vadd.f32 %v6033_v8, %v5905_v10  ;;  %v6150_v44 = vpop.permute.xlu0 %2085 }
 0x184   : > { %8288 = vst [vmem:[#allocation51_spill] sm:$0xff] %v6124_v45  ;;  %v6141_v47 = vadd.f32 %v6036_v3, %v5902_v30  ;;  %v6145_v57 = vadd.f32 %v6039_v52, %v5909_v28  ;;  %v6148_v38 = vadd.f32 %v2220_v12, %v5998_v14  ;;  %v6155_v1 = vadd.f32 %v2221_v33, %v6004_v2  ;;  %v6163_v28 = vpop.f32.mrb[17].mxu1  ;;  %v6165_v3 = vpop.f32.mrb[18].mxu0  ;;  %v8361_v45 = vld [vmem:[#allocation134_spill] sm:$0xff] }
 0x185   : > { %8289 = vst [vmem:[#allocation50_spill] sm:$0xff] %v6126_v5  ;;  %8290 = vst [vmem:[#allocation52_spill] sm:$0xff] %v6128_v24  ;;  %v6158_v10 = vadd.f32 %v2222_v29, %v6001_v15  ;;  %v2232_v30 = vmul.f32 %v5017_v27, %v6054_v40  ;;  %v847_v8 = vadd.f32 %v846_v23, %v4934_v50  ;;  %v6175_v51 = vpop.f32.mrb[18].mxu1  ;;  %v6177_v63 = vpop.f32.mrb[19].mxu0 }
 0x186   : > { %8291 = vst [vmem:[#allocation53_spill] sm:$0xff] %v6137_v56  ;;  %8292 = vst [vmem:[#allocation177_spill] sm:$0xff] %v6141_v47  ;;  %v6168_v14 = vadd.f32 %v2223_v7, %v6007_v55  ;;  %v2233_v52 = vmul.f32 %v5019_v4, %v6054_v40  ;;  %v1040_v2 = vadd.f32 %v1039_v48, %v4936_v31  ;;  %v8298_v55 = vld [vmem:[#allocation57_spill] sm:$0xff]  ;;  %v6186_v34 = vpop.f32.mrb[19].mxu1  ;;  %v8299_v48 = vld [vmem:[#allocation58_spill] sm:$0xff] }
 0x187   : > { %8293 = vst [vmem:[#allocation178_spill] sm:$0xff] %v6145_v57  ;;  %8294 = vst [vmem:[#allocation179_spill] sm:$0xff] %v6148_v38  ;;  %v2230_v15 = vmul.f32 %v5021_v49, %v6071_v13  ;;  %v2234_v23 = vmul.f32 %v5021_v49, %v6054_v40  ;;  %v2235_v54 = vmul.f32 %v5024_v9, %v6054_v40  ;;  %v8334_v38 = vld [vmem:[#allocation63_spill] sm:$0xff]  ;;  %v8338_v47 = vld [vmem:[#allocation68_spill] sm:$0xff] }
 0x188   : > { %8295 = vst [vmem:[#allocation181_spill] sm:$0xff] %v6155_v1  ;;  %8296 = vst [vmem:[#allocation180_spill] sm:$0xff] %v6158_v10  ;;  %v1520_v18 = vadd.f32 %v8298_v55, %v847_v8  ;;  %v2231_v12 = vmul.f32 %v5024_v9, %v6071_v13  ;;  %v1522_v35 = vadd.f32 %v8299_v48, %v1040_v2  ;;  %v8303_v2 = vld [vmem:[#allocation103_spill] sm:$0xff]  ;;  %v8333_v10 = vld [vmem:[#allocation62_spill] sm:$0xff] }
 0x189   : > { %8297 = vst [vmem:[#allocation188_spill] sm:$0xff] %v6168_v14  ;;  %v2228_v33 = vmul.f32 %v5017_v27, %v6071_v13  ;;  %v2229_v37 = vmul.f32 %v5019_v4, %v6071_v13  ;;  %v6193_v22 = vadd.f32 %v2230_v15, %v1938_v11  ;;  %v6200_v7 = vmul.f32 %v5017_v27, %v6078_v6 }
 0x18a   : > { %v1940_v29 = vadd.f32 %v8301_v41, %v1520_v18  ;;  %v6196_v40 = vadd.f32 %v2231_v12, %v1939_v60  ;;  %v6204_v8 = vmul.f32 %v5019_v4, %v6078_v6  ;;  %v1942_v55 = vadd.f32 %v8303_v2, %v1522_v35  ;;  %v6213_v60 = vpop.f32.mrb[20].mxu0  ;;  %v2082_v41 = vpop.permute.xlu1 %2081 }
 0x18b   : > { %8300 = vst [vmem:[#allocation57_spill] sm:$0xff] %v6193_v22  ;;  %v849_v48 = vadd.f32 %v6080_v61, %v4938_v17  ;;  %v1042_v13 = vadd.f32 %v6086_v39, %v8231_v62  ;;  %v851_v11 = vadd.f32 %v6088_v36, %v4934_v50  ;;  %v1044_v18 = vadd.f32 %v6095_v16, %v4936_v31  ;;  %v6222_v61 = vpop.f32.mrb[20].mxu1  ;;  %v8306_v39 = vld [vmem:[#allocation59_spill] sm:$0xff]  ;;  %v8307_v36 = vld [vmem:[#allocation60_spill] sm:$0xff] }
 0x18c   : > { %8302 = vst [vmem:[#allocation58_spill] sm:$0xff] %v6196_v40  ;;  %v6215_v15 = vadd.f32 %v2232_v30, %v1940_v29  ;;  %v853_v12 = vadd.f32 %v6097_v20, %v4938_v17  ;;  %v1046_v35 = vadd.f32 %v1045_v59, %v8231_v62  ;;  %v6224_v2 = vadd.f32 %v2234_v23, %v1942_v55  ;;  %v8308_v40 = vld [vmem:[#allocation54_spill] sm:$0xff]  ;;  %v6229_v29 = vpop.permute.xlu0 %2093  ;;  %v8309_v16 = vld [vmem:[#allocation55_spill] sm:$0xff]  ;;  %v8310_v20 = vld [vmem:[#allocation56_spill] sm:$0xff]  ;;  %v6238_v55 = vpop.f32.mrb[21].mxu1 }
 0x18d   : > { %v1521_v24 = vadd.f32 %v8306_v39, %v849_v48  ;;  %v1523_v5 = vadd.f32 %v8307_v36, %v1042_v13  ;;  %v1524_v30 = vadd.f32 %v8308_v40, %v851_v11  ;;  %v1526_v22 = vadd.f32 %v8309_v16, %v1044_v18  ;;  %v8311_v59 = vld [vmem:[#allocation61_spill] sm:$0xff]  ;;  %v8312_v13 = vld [vmem:[#allocation102_spill] sm:$0xff]  ;;  %v8313_v40 = vld [vmem:[#allocation104_spill] sm:$0xff]  ;;  %v6247_v16 = vpop.f32.mrb[22].mxu1 }
 0x18e   : > { %8304 = vst [vmem:[#allocation101_spill] sm:$0xff] %v6215_v15  ;;  %8305 = vst [vmem:[#allocation103_spill] sm:$0xff] %v6224_v2  ;;  %v6231_v15 = vpop.f32.mrb[21].mxu0  ;;  %v1525_v46 = vadd.f32 %v8310_v20, %v853_v12  ;;  %v1527_v0 = vadd.f32 %v8311_v59, %v1046_v35  ;;  %v2236_v23 = vmul.f32 %v5017_v27, %v6131_v32  ;;  %v8314_v36 = vld [vmem:[#allocation189_spill] sm:$0xff]  ;;  %v8315_v35 = vld [vmem:[#allocation191_spill] sm:$0xff] }
 0x18f   : > { %v6240_v48 = vpop.f32.mrb[22].mxu0  ;;  %v1941_v39 = vadd.f32 %v8312_v13, %v1521_v24  ;;  %v1943_v11 = vadd.f32 %v8313_v40, %v1523_v5  ;;  %v1944_v2 = vadd.f32 %v8314_v36, %v1524_v30  ;;  %v2237_v18 = vmul.f32 %v5019_v4, %v6131_v32  ;;  %v8316_v59 = vld [vmem:[#allocation190_spill] sm:$0xff]  ;;  %v6256_v13 = vpop.f32.mrb[23].mxu1 }
 0x190   : > { %v6249_v12 = vpop.f32.mrb[23].mxu0  ;;  %v1946_v20 = vadd.f32 %v8315_v35, %v1526_v22  ;;  %v1945_v53 = vadd.f32 %v8316_v59, %v1525_v46  ;;  %v1947_v14 = vadd.f32 %v8317_v19, %v1527_v0  ;;  %v2238_v24 = vmul.f32 %v5021_v49, %v6131_v32  ;;  %v2102_v35 = vpop.permute.xlu0 %2101  ;;  %v8327_v59 = vld [vmem:[#allocation66_spill] sm:$0xff] }
 0x191   : > { %v6258_v5 = vadd.f32 %v2233_v52, %v1941_v39  ;;  %v6260_v30 = vadd.f32 %v2235_v54, %v1943_v11  ;;  %v2239_v40 = vmul.f32 %v5024_v9, %v6131_v32  ;;  %v6264_v36 = vadd.f32 %v2236_v23, %v1944_v2  ;;  %v8326_v2 = vld [vmem:[#allocation65_spill] sm:$0xff] }
 0x192   : > { %v6267_v22 = vadd.f32 %v2228_v33, %v6111_v25  ;;  %v6270_v46 = vadd.f32 %v2229_v37, %v6116_v26  ;;  %v6272_v19 = vadd.f32 %v2237_v18, %v1945_v53  ;;  %v6274_v0 = vadd.f32 %v2238_v24, %v1946_v20  ;;  %v6284_v25 = vpop.f32.mrb[24].mxu0  ;;  %v6300_v37 = vpop.f32.mrb[24].mxu1 }
 0x193   : > { %8318 = vst [vmem:[#allocation59_spill] sm:$0xff] %v6258_v5  ;;  %8319 = vst [vmem:[#allocation60_spill] sm:$0xff] %v6260_v30  ;;  %v2242_v52 = vmul.f32 %v5021_v49, %v6078_v6  ;;  %v2243_v54 = vmul.f32 %v5024_v9, %v6078_v6  ;;  %v6280_v39 = vadd.f32 %v2239_v40, %v1947_v14  ;;  %v2090_v14 = vpop.permute.xlu1 %2089  ;;  %v6309_v20 = vpop.f32.mrb[25].mxu0 }
 0x194   : > { %8320 = vst [vmem:[#allocation54_spill] sm:$0xff] %v6264_v36  ;;  %8321 = vst [vmem:[#allocation55_spill] sm:$0xff] %v6267_v22  ;;  %v857_v32 = vadd.f32 %v6120_v43, %v4934_v50  ;;  %v6288_v26 = vmul.f32 %v5017_v27, %v6150_v44  ;;  %v6292_v53 = vmul.f32 %v5019_v4, %v6150_v44  ;;  %v6318_v5 = vpop.f32.mrb[26].mxu0  ;;  %v8330_v36 = vld [vmem:[#allocation67_spill] sm:$0xff] }
 0x195   : > { %8322 = vst [vmem:[#allocation56_spill] sm:$0xff] %v6270_v46  ;;  %8323 = vst [vmem:[#allocation61_spill] sm:$0xff] %v6272_v19  ;;  %v6296_v33 = vmul.f32 %v5021_v49, %v6150_v44  ;;  %v1050_v6 = vadd.f32 %v6133_v21, %v4936_v31  ;;  %v6304_v43 = vmul.f32 %v5024_v9, %v6150_v44  ;;  %v6316_v44 = vpop.f32.mrb[25].mxu1 }
 0x196   : > { %8324 = vst [vmem:[#allocation102_spill] sm:$0xff] %v6274_v0  ;;  %8325 = vst [vmem:[#allocation104_spill] sm:$0xff] %v6280_v39  ;;  %v1528_v23 = vadd.f32 %v8326_v2, %v857_v32  ;;  %v2244_v11 = vmul.f32 %v5017_v27, %v2082_v41  ;;  %v2245_v18 = vmul.f32 %v5019_v4, %v2082_v41  ;;  %v8328_v32 = vld [vmem:[#allocation117_spill] sm:$0xff] }
 0x197   : > { %v1530_v24 = vadd.f32 %v8327_v59, %v1050_v6  ;;  %v2246_v21 = vmul.f32 %v5021_v49, %v2082_v41  ;;  %v2247_v40 = vmul.f32 %v5024_v9, %v2082_v41  ;;  %v859_v30 = vadd.f32 %v6152_v42, %v4938_v17  ;;  %v6327_v59 = vpop.f32.mrb[26].mxu1  ;;  %v6329_v41 = vpop.f32.mrb[27].mxu0  ;;  %v8329_v42 = vld [vmem:[#allocation119_spill] sm:$0xff] }
 0x198   : > { %v1948_v2 = vadd.f32 %v8328_v32, %v1528_v23  ;;  %v1052_v39 = vadd.f32 %v6163_v28, %v8231_v62  ;;  %v861_v0 = vadd.f32 %v6165_v3, %v4934_v50  ;;  %v1054_v6 = vadd.f32 %v6175_v51, %v4936_v31  ;;  %v6337_v32 = vpop.f32.mrb[27].mxu1  ;;  %v8332_v51 = vld [vmem:[#allocation69_spill] sm:$0xff] }
 0x199   : > { %v1950_v19 = vadd.f32 %v8329_v42, %v1530_v24  ;;  %v1529_v46 = vadd.f32 %v8330_v36, %v859_v30  ;;  %v863_v23 = vadd.f32 %v6177_v63, %v4938_v17  ;;  %v1056_v28 = vadd.f32 %v6186_v34, %v8231_v62  ;;  %v8336_v30 = vld [vmem:[#allocation118_spill] sm:$0xff]  ;;  %v8337_v42 = vld [vmem:[#allocation64_spill] sm:$0xff] }
 0x19a   : > { %v6340_v3 = vadd.f32 %v6200_v7, %v1948_v2  ;;  %v1531_v22 = vadd.f32 %v8332_v51, %v1052_v39  ;;  %v1532_v1 = vadd.f32 %v8333_v10, %v861_v0  ;;  %v1534_v57 = vadd.f32 %v8334_v38, %v1054_v6  ;;  %v8339_v7 = vld [vmem:[#allocation120_spill] sm:$0xff]  ;;  %v8341_v51 = vld [vmem:[#allocation201_spill] sm:$0xff]  ;;  %v6357_v0 = vpop.f32.mrb[28].mxu0 }
 0x19b   : > { %v6345_v24 = vadd.f32 %v2242_v52, %v1950_v19  ;;  %v1949_v36 = vadd.f32 %v8336_v30, %v1529_v46  ;;  %v1533_v63 = vadd.f32 %v8337_v42, %v863_v23  ;;  %v1535_v56 = vadd.f32 %v8338_v47, %v1056_v28  ;;  %v8343_v47 = vld [vmem:[#allocation194_spill] sm:$0xff]  ;;  %v2098_v23 = vpop.permute.xlu1 %2097  ;;  %v6368_v28 = vpop.f32.mrb[28].mxu1 }
 0x19c   : > { %8331 = vst [vmem:[#allocation189_spill] sm:$0xff] %v6340_v3  ;;  %v6352_v34 = vmul.f32 %v5017_v27, %v6229_v29  ;;  %v1951_v2 = vadd.f32 %v8339_v7, %v1531_v22  ;;  %v8340_v3 = vld [vmem:[#allocation193_spill] sm:$0xff]  ;;  %v1954_v10 = vadd.f32 %v8341_v51, %v1534_v57  ;;  %v6361_v38 = vmul.f32 %v5019_v4, %v6229_v29  ;;  %v8344_v52 = vld [vmem:[#allocation202_spill] sm:$0xff]  ;;  %v6380_v30 = vpop.permute.xlu0 %2109 }
 0x19d   : > { %8335 = vst [vmem:[#allocation191_spill] sm:$0xff] %v6345_v24  ;;  %v1952_v39 = vadd.f32 %v8340_v3, %v1532_v1  ;;  %v6364_v46 = vadd.f32 %v6204_v8, %v1949_v36  ;;  %v1953_v19 = vadd.f32 %v8343_v47, %v1533_v63  ;;  %v1955_v6 = vadd.f32 %v8344_v52, %v1535_v56  ;;  %v6382_v8 = vpop.f32.mrb[29].mxu0  ;;  %v8358_v24 = vld [vmem:[#allocation74_spill] sm:$0xff] }
 0x19e   : > { %v6372_v1 = vmul.f32 %v5021_v49, %v6229_v29  ;;  %v6374_v57 = vadd.f32 %v2243_v54, %v1951_v2  ;;  %v6378_v3 = vadd.f32 %v2246_v21, %v1954_v10  ;;  %v6386_v56 = vmul.f32 %v5024_v9, %v6229_v29  ;;  %v6393_v54 = vpop.f32.mrb[29].mxu1 }
 0x19f   : > { %8342 = vst [vmem:[#allocation190_spill] sm:$0xff] %v6364_v46  ;;  %v6376_v22 = vadd.f32 %v2244_v11, %v1952_v39  ;;  %v6388_v36 = vadd.f32 %v2245_v18, %v1953_v19  ;;  %v6390_v42 = vadd.f32 %v2247_v40, %v1955_v6  ;;  %v2252_v63 = vmul.f32 %v5017_v27, %v2090_v14  ;;  %v6395_v11 = vpop.f32.mrb[30].mxu0  ;;  %v6402_v39 = vpop.f32.mrb[30].mxu1  ;;  %v8357_v19 = vld [vmem:[#allocation73_spill] sm:$0xff] }
 0x1a0   : > { %8345 = vst [vmem:[#allocation192_spill] sm:$0xff] %v6374_v57  ;;  %8347 = vst [vmem:[#allocation66_spill] sm:$0xff] %v6378_v3  ;;  %v2253_v21 = vmul.f32 %v5019_v4, %v2090_v14  ;;  %v2254_v7 = vmul.f32 %v5021_v49, %v2090_v14  ;;  %v2255_v2 = vmul.f32 %v5024_v9, %v2090_v14  ;;  %v6404_v18 = vpop.f32.mrb[31].mxu0  ;;  %v6417_v14 = vpop.f32.mrb[31].mxu1 }
 0x1a1   : > { %8346 = vst [vmem:[#allocation65_spill] sm:$0xff] %v6376_v22  ;;  %8348 = vst [vmem:[#allocation117_spill] sm:$0xff] %v6388_v36  ;;  %v867_v29 = vadd.f32 %v6213_v60, %v4934_v50  ;;  %v6407_v40 = vmul.f32 %v5017_v27, %v2102_v35  ;;  %v6410_v51 = vmul.f32 %v5019_v4, %v2102_v35  ;;  %v2106_v3 = vpop.permute.xlu1 %2105  ;;  %v8359_v36 = vld [vmem:[#allocation12_spill] sm:$0xff] }
 0x1a2   : > { %8349 = vst [vmem:[#allocation119_spill] sm:$0xff] %v6390_v42  ;;  %8350 = vst [vmem:[#allocation67_spill] sm:$0xff] %v6402_v39  ;;  %v6413_v10 = vmul.f32 %v5021_v49, %v2102_v35  ;;  %v1060_v47 = vadd.f32 %v6222_v61, %v4936_v31  ;;  %v6420_v60 = vmul.f32 %v5024_v9, %v2102_v35 }
 0x1a3   : > { %8351 = vst [vmem:[#allocation69_spill] sm:$0xff] %v6404_v18  ;;  %8352 = vst [vmem:[#allocation62_spill] sm:$0xff] %v6407_v40  ;;  %v1536_v52 = vadd.f32 %v8357_v19, %v867_v29  ;;  %v6424_v6 = vmul.f32 %v5017_v27, %v2098_v23  ;;  %v6427_v57 = vmul.f32 %v5019_v4, %v2098_v23  ;;  %v8367_v40 = vld [vmem:[#allocation71_spill] sm:$0xff]  ;;  %v8371_v18 = vld [vmem:[#allocation77_spill] sm:$0xff] }
 0x1a4   : > { %8353 = vst [vmem:[#allocation63_spill] sm:$0xff] %v6410_v51  ;;  %8354 = vst [vmem:[#allocation118_spill] sm:$0xff] %v6413_v10  ;;  %v1538_v46 = vadd.f32 %v8358_v24, %v1060_v47  ;;  %v6431_v42 = vmul.f32 %v5021_v49, %v2098_v23  ;;  %v6434_v61 = vmul.f32 %v5024_v9, %v2098_v23  ;;  %v6445_v47 = vpop.f32.mrb[32].mxu0  ;;  %v8365_v51 = vld [vmem:[#allocation76_spill] sm:$0xff]  ;;  %v8366_v10 = vld [vmem:[#allocation70_spill] sm:$0xff] }
 0x1a5   : > { %8355 = vst [vmem:[#allocation64_spill] sm:$0xff] %v6417_v14  ;;  %8356 = vst [vmem:[#allocation68_spill] sm:$0xff] %v6420_v60  ;;  %v869_v35 = vadd.f32 %v6231_v15, %v4938_v17  ;;  %v1956_v29 = vadd.f32 %v8359_v36, %v1536_v52  ;;  %v1062_v19 = vadd.f32 %v6238_v55, %v8231_v62  ;;  %v2118_v52 = vpop.permute.xlu0 %2117  ;;  %v6453_v55 = vpop.f32.mrb[32].mxu1 }
 0x1a6   : > { %v871_v22 = vadd.f32 %v6240_v48, %v4934_v50  ;;  %v1064_v24 = vadd.f32 %v6247_v16, %v4936_v31  ;;  %8360 = vst [vmem:[#allocation120_spill] sm:$0xff] %v6445_v47  ;;  %v1958_v23 = vadd.f32 %v8361_v45, %v1538_v46  ;;  %v873_v15 = vadd.f32 %v6249_v12, %v4938_v17  ;;  %v6461_v46 = vpop.f32.mrb[33].mxu0  ;;  %v8369_v12 = vld [vmem:[#allocation133_spill] sm:$0xff]  ;;  %v6469_v39 = vpop.f32.mrb[33].mxu1 }
 0x1a7   : > { %v1537_v60 = vadd.f32 %v8362_v58, %v869_v35  ;;  %v1066_v36 = vadd.f32 %v6256_v13, %v8231_v62  ;;  %8363 = vst [vmem:[#allocation193_spill] sm:$0xff] %v6453_v55  ;;  %v6456_v48 = vadd.f32 %v6288_v26, %v1956_v29  ;;  %v1539_v16 = vadd.f32 %v8365_v51, %v1062_v19  ;;  %v8370_v13 = vld [vmem:[#allocation72_spill] sm:$0xff]  ;;  %v6471_v26 = vpop.f32.mrb[34].mxu0 }
 0x1a8   : > { %v1540_v47 = vadd.f32 %v8366_v10, %v871_v22  ;;  %v1542_v45 = vadd.f32 %v8367_v40, %v1064_v24  ;;  %v6464_v58 = vadd.f32 %v6296_v33, %v1958_v23  ;;  %v1541_v14 = vadd.f32 %v8370_v13, %v873_v15  ;;  %v8372_v40 = vld [vmem:[#allocation135_spill] sm:$0xff]  ;;  %v8373_v10 = vld [vmem:[#allocation136_spill] sm:$0xff]  ;;  %v8374_v33 = vld [vmem:[#allocation138_spill] sm:$0xff]  ;;  %v6480_v24 = vpop.f32.mrb[34].mxu1 }
 0x1a9   : > { %8364 = vst [vmem:[#allocation201_spill] sm:$0xff] %v6456_v48  ;;  %v1957_v35 = vadd.f32 %v8369_v12, %v1537_v60  ;;  %v1543_v55 = vadd.f32 %v8371_v18, %v1066_v36  ;;  %v6475_v22 = vmul.f32 %v5017_v27, %v6380_v30  ;;  %v1959_v51 = vadd.f32 %v8372_v40, %v1539_v16  ;;  %v6482_v60 = vpop.f32.mrb[35].mxu0  ;;  %v8376_v15 = vld [vmem:[#allocation137_spill] sm:$0xff]  ;;  %v8377_v12 = vld [vmem:[#allocation139_spill] sm:$0xff]  ;;  %v2114_v16 = vpop.permute.xlu1 %2113  ;;  %v8392_v48 = vld [vmem:[#allocation82_spill] sm:$0xff] }
 0x1aa   : > { %8368 = vst [vmem:[#allocation194_spill] sm:$0xff] %v6464_v58  ;;  %v1960_v29 = vadd.f32 %v8373_v10, %v1540_v47  ;;  %v1962_v19 = vadd.f32 %v8374_v33, %v1542_v45  ;;  %v6486_v18 = vmul.f32 %v5019_v4, %v6380_v30  ;;  %v1961_v36 = vadd.f32 %v8376_v15, %v1541_v14  ;;  %v6493_v40 = vpop.f32.mrb[35].mxu1  ;;  %v2126_v15 = vpop.permute.xlu0 %2125 }
 0x1ab   : > { %v6489_v23 = vadd.f32 %v6292_v53, %v1957_v35  ;;  %v1963_v13 = vadd.f32 %v8377_v12, %v1543_v55  ;;  %v6497_v47 = vmul.f32 %v5021_v49, %v6380_v30  ;;  %v6500_v45 = vadd.f32 %v6304_v43, %v1959_v51 }
 0x1ac   : > { %v6502_v10 = vadd.f32 %v2252_v63, %v1960_v29  ;;  %v6504_v33 = vadd.f32 %v2254_v7, %v1962_v19  ;;  %v6508_v53 = vmul.f32 %v5024_v9, %v6380_v30  ;;  %v6510_v14 = vadd.f32 %v2253_v21, %v1961_v36  ;;  %v6528_v21 = vpop.f32.mrb[36].mxu0  ;;  %v6541_v19 = vpop.f32.mrb[36].mxu1 }
 0x1ad   : > { %8375 = vst [vmem:[#allocation202_spill] sm:$0xff] %v6489_v23  ;;  %8378 = vst [vmem:[#allocation73_spill] sm:$0xff] %v6500_v45  ;;  %v6512_v55 = vadd.f32 %v2255_v2, %v1963_v13  ;;  %v6515_v35 = vmul.f32 %v5017_v27, %v2106_v3  ;;  %v6518_v12 = vmul.f32 %v5019_v4, %v2106_v3  ;;  %v6553_v58 = vpop.f32.mrb[37].mxu0  ;;  %v6555_v23 = vpop.f32.mrb[37].mxu1 }
 0x1ae   : > { %8379 = vst [vmem:[#allocation74_spill] sm:$0xff] %v6502_v10  ;;  %8380 = vst [vmem:[#allocation12_spill] sm:$0xff] %v6504_v33  ;;  %v6521_v43 = vmul.f32 %v5021_v49, %v2106_v3  ;;  %v6524_v63 = vmul.f32 %v5024_v9, %v2106_v3  ;;  %v877_v30 = vadd.f32 %v6284_v25, %v4934_v50  ;;  %v8389_v25 = vld [vmem:[#allocation81_spill] sm:$0xff]  ;;  %v6566_v33 = vpop.f32.mrb[38].mxu0 }
 0x1af   : > { %8381 = vst [vmem:[#allocation134_spill] sm:$0xff] %v6510_v14  ;;  %8382 = vst [vmem:[#allocation75_spill] sm:$0xff] %v6512_v55  ;;  %v6531_v7 = vmul.f32 %v5017_v27, %v2118_v52  ;;  %v6534_v2 = vmul.f32 %v5019_v4, %v2118_v52  ;;  %v6537_v51 = vmul.f32 %v5021_v49, %v2118_v52  ;;  %v8395_v14 = vld [vmem:[#allocation14_spill] sm:$0xff] }
 0x1b0   : > { %8383 = vst [vmem:[#allocation76_spill] sm:$0xff] %v6528_v21  ;;  %v1070_v29 = vadd.f32 %v6300_v37, %v4936_v31  ;;  %8387 = vst [vmem:[#allocation72_spill] sm:$0xff] %v6541_v19  ;;  %v6544_v3 = vmul.f32 %v5024_v9, %v2118_v52  ;;  %v1544_v36 = vadd.f32 %v8389_v25, %v877_v30  ;;  %v2122_v25 = vpop.permute.xlu1 %2121  ;;  %v8404_v19 = vld [vmem:[#allocation79_spill] sm:$0xff] }
 0x1b1   : > { %8384 = vst [vmem:[#allocation70_spill] sm:$0xff] %v6531_v7  ;;  %8385 = vst [vmem:[#allocation71_spill] sm:$0xff] %v6534_v2  ;;  %v6548_v13 = vmul.f32 %v5017_v27, %v2114_v16  ;;  %v6551_v45 = vmul.f32 %v5019_v4, %v2114_v16  ;;  %v6559_v37 = vmul.f32 %v5021_v49, %v2114_v16  ;;  %v6575_v2 = vpop.f32.mrb[38].mxu1  ;;  %v8399_v7 = vld [vmem:[#allocation83_spill] sm:$0xff] }
 0x1b2   : > { %8386 = vst [vmem:[#allocation133_spill] sm:$0xff] %v6537_v51  ;;  %8388 = vst [vmem:[#allocation77_spill] sm:$0xff] %v6544_v3  ;;  %v1546_v55 = vadd.f32 %v8392_v48, %v1070_v29  ;;  %v6562_v52 = vmul.f32 %v5024_v9, %v2114_v16  ;;  %v879_v30 = vadd.f32 %v6309_v20, %v4938_v17  ;;  %v6577_v16 = vpop.f32.mrb[39].mxu0  ;;  %v8398_v51 = vld [vmem:[#allocation146_spill] sm:$0xff] }
 0x1b3   : > { %8390 = vst [vmem:[#allocation135_spill] sm:$0xff] %v6553_v58  ;;  %8391 = vst [vmem:[#allocation136_spill] sm:$0xff] %v6555_v23  ;;  %v1964_v10 = vadd.f32 %v8395_v14, %v1544_v36  ;;  %v1072_v3 = vadd.f32 %v6316_v44, %v8231_v62  ;;  %v881_v48 = vadd.f32 %v6318_v5, %v4934_v50  ;;  %v2134_v36 = vpop.permute.xlu0 %2133  ;;  %v8403_v58 = vld [vmem:[#allocation78_spill] sm:$0xff] }
 0x1b4   : > { %8393 = vst [vmem:[#allocation138_spill] sm:$0xff] %v6562_v52  ;;  %8394 = vst [vmem:[#allocation137_spill] sm:$0xff] %v6566_v33  ;;  %v1074_v29 = vadd.f32 %v6327_v59, %v4936_v31  ;;  %v1966_v20 = vadd.f32 %v8398_v51, %v1546_v55  ;;  %v1545_v23 = vadd.f32 %v8399_v7, %v879_v30  ;;  %v6585_v33 = vpop.f32.mrb[39].mxu1  ;;  %v8402_v59 = vld [vmem:[#allocation85_spill] sm:$0xff]  ;;  %v8407_v30 = vld [vmem:[#allocation80_spill] sm:$0xff] }
 0x1b5   : > { %8396 = vst [vmem:[#allocation139_spill] sm:$0xff] %v6575_v2  ;;  %8397 = vst [vmem:[#allocation81_spill] sm:$0xff] %v6577_v16  ;;  %v883_v14 = vadd.f32 %v6329_v41, %v4938_v17  ;;  %v1076_v44 = vadd.f32 %v6337_v32, %v8231_v62  ;;  %v6588_v5 = vadd.f32 %v6352_v34, %v1964_v10  ;;  %v8406_v51 = vld [vmem:[#allocation145_spill] sm:$0xff]  ;;  %v8408_v32 = vld [vmem:[#allocation84_spill] sm:$0xff] }
 0x1b6   : > { %8400 = vst [vmem:[#allocation82_spill] sm:$0xff] %v6585_v33  ;;  %v1547_v2 = vadd.f32 %v8402_v59, %v1072_v3  ;;  %v1548_v16 = vadd.f32 %v8403_v58, %v881_v48  ;;  %v1550_v55 = vadd.f32 %v8404_v19, %v1074_v29  ;;  %v6594_v7 = vadd.f32 %v6372_v1, %v1966_v20  ;;  %v8409_v34 = vld [vmem:[#allocation147_spill] sm:$0xff]  ;;  %v8411_v59 = vld [vmem:[#allocation150_spill] sm:$0xff]  ;;  %v6605_v48 = vpop.f32.mrb[40].mxu0  ;;  %v8413_v19 = vld [vmem:[#allocation149_spill] sm:$0xff] }
 0x1b7   : > { %8401 = vst [vmem:[#allocation14_spill] sm:$0xff] %v6588_v5  ;;  %v1965_v41 = vadd.f32 %v8406_v51, %v1545_v23  ;;  %v1549_v21 = vadd.f32 %v8407_v30, %v883_v14  ;;  %v1551_v52 = vadd.f32 %v8408_v32, %v1076_v44  ;;  %v6600_v33 = vmul.f32 %v5017_v27, %v2126_v15  ;;  %v8410_v5 = vld [vmem:[#allocation148_spill] sm:$0xff]  ;;  %v8414_v20 = vld [vmem:[#allocation151_spill] sm:$0xff]  ;;  %v6615_v44 = vpop.f32.mrb[40].mxu1  ;;  %v6617_v51 = vpop.f32.mrb[41].mxu0 }
 0x1b8   : > { %8405 = vst [vmem:[#allocation146_spill] sm:$0xff] %v6594_v7  ;;  %v1967_v10 = vadd.f32 %v8409_v34, %v1547_v2  ;;  %v1968_v3 = vadd.f32 %v8410_v5, %v1548_v16  ;;  %v1970_v58 = vadd.f32 %v8411_v59, %v1550_v55  ;;  %v6608_v1 = vmul.f32 %v5019_v4, %v2126_v15  ;;  %v2130_v55 = vpop.permute.xlu1 %2129  ;;  %v6645_v32 = vpop.f32.mrb[42].mxu0  ;;  %v8432_v7 = vld [vmem:[#allocation90_spill] sm:$0xff] }
 0x1b9   : > { %v6611_v23 = vadd.f32 %v6361_v38, %v1965_v41  ;;  %v1969_v29 = vadd.f32 %v8413_v19, %v1549_v21  ;;  %v1971_v14 = vadd.f32 %v8414_v20, %v1551_v52  ;;  %v6620_v2 = vmul.f32 %v5021_v49, %v2126_v15  ;;  %v6631_v21 = vpop.f32.mrb[41].mxu1  ;;  %8421 = vst [vmem:[#allocation147_spill] sm:$0xff] %v6645_v32 }
 0x1ba   : > { %v6623_v16 = vadd.f32 %v6386_v56, %v1967_v10  ;;  %v6626_v5 = vadd.f32 %v6424_v6, %v1968_v3  ;;  %v6629_v38 = vadd.f32 %v6431_v42, %v1970_v58  ;;  %v6634_v52 = vmul.f32 %v5024_v9, %v2126_v15  ;;  %v2142_v6 = vpop.permute.xlu0 %2141  ;;  %v6660_v10 = vpop.f32.mrb[43].mxu0 }
 0x1bb   : > { %8412 = vst [vmem:[#allocation83_spill] sm:$0xff] %v6611_v23  ;;  %v6637_v41 = vadd.f32 %v6427_v57, %v1969_v29  ;;  %v6640_v30 = vadd.f32 %v6434_v61, %v1971_v14  ;;  %v6643_v56 = vmul.f32 %v5017_v27, %v2122_v25  ;;  %v6648_v42 = vmul.f32 %v5019_v4, %v2122_v25  ;;  %v6658_v61 = vpop.f32.mrb[42].mxu1  ;;  %v8429_v29 = vld [vmem:[#allocation89_spill] sm:$0xff] }
 0x1bc   : > { %8415 = vst [vmem:[#allocation85_spill] sm:$0xff] %v6623_v16  ;;  %8416 = vst [vmem:[#allocation78_spill] sm:$0xff] %v6626_v5  ;;  %v6651_v34 = vmul.f32 %v5021_v49, %v2122_v25  ;;  %v6654_v15 = vmul.f32 %v5024_v9, %v2122_v25  ;;  %v887_v57 = vadd.f32 %v6357_v0, %v4934_v50  ;;  %v6673_v19 = vpop.f32.mrb[43].mxu1  ;;  %v8436_v5 = vld [vmem:[#allocation67_spill] sm:$0xff] }
 0x1bd   : > { %8417 = vst [vmem:[#allocation79_spill] sm:$0xff] %v6629_v38  ;;  %8418 = vst [vmem:[#allocation145_spill] sm:$0xff] %v6634_v52  ;;  %v6663_v3 = vmul.f32 %v5017_v27, %v2134_v36  ;;  %v6666_v59 = vmul.f32 %v5019_v4, %v2134_v36  ;;  %v6669_v58 = vmul.f32 %v5021_v49, %v2134_v36  ;;  %v8435_v38 = vld [vmem:[#allocation16_spill] sm:$0xff] }
 0x1be   : > { %8419 = vst [vmem:[#allocation80_spill] sm:$0xff] %v6637_v41  ;;  %8420 = vst [vmem:[#allocation84_spill] sm:$0xff] %v6640_v30  ;;  %v1080_v25 = vadd.f32 %v6368_v28, %v4936_v31  ;;  %v6676_v0 = vmul.f32 %v5024_v9, %v2134_v36  ;;  %v1552_v20 = vadd.f32 %v8429_v29, %v887_v57 }
 0x1bf   : > { %8422 = vst [vmem:[#allocation148_spill] sm:$0xff] %v6658_v61  ;;  %8423 = vst [vmem:[#allocation150_spill] sm:$0xff] %v6660_v10  ;;  %v6680_v14 = vmul.f32 %v5017_v27, %v2130_v55  ;;  %v6683_v16 = vmul.f32 %v5019_v4, %v2130_v55  ;;  %v6687_v30 = vmul.f32 %v5021_v49, %v2130_v55 }
 0x1c0   : > { %8424 = vst [vmem:[#allocation149_spill] sm:$0xff] %v6663_v3  ;;  %8425 = vst [vmem:[#allocation151_spill] sm:$0xff] %v6666_v59  ;;  %v1554_v23 = vadd.f32 %v8432_v7, %v1080_v25  ;;  %v6690_v28 = vmul.f32 %v5024_v9, %v2130_v55  ;;  %v889_v36 = vadd.f32 %v6382_v8, %v4938_v17  ;;  %v2138_v25 = vpop.permute.xlu1 %2137  ;;  %v8438_v59 = vld [vmem:[#allocation156_spill] sm:$0xff]  ;;  %v8440_v8 = vld [vmem:[#allocation69_spill] sm:$0xff] }
 0x1c1   : > { %8426 = vst [vmem:[#allocation246_spill] sm:$0xff] %v6669_v58  ;;  %8427 = vst [vmem:[#allocation247_spill] sm:$0xff] %v6673_v19  ;;  %v1972_v41 = vadd.f32 %v8435_v38, %v1552_v20  ;;  %v1082_v57 = vadd.f32 %v6393_v54, %v8231_v62  ;;  %v891_v29 = vadd.f32 %v6395_v11, %v4934_v50  ;;  %v8439_v58 = vld [vmem:[#allocation91_spill] sm:$0xff]  ;;  %v8441_v38 = vld [vmem:[#allocation64_spill] sm:$0xff]  ;;  %v6709_v54 = vpop.f32.mrb[44].mxu1 }
 0x1c2   : > { %8428 = vst [vmem:[#allocation248_spill] sm:$0xff] %v6676_v0  ;;  %8430 = vst [vmem:[#allocation89_spill] sm:$0xff] %v6680_v14  ;;  %v1084_v7 = vadd.f32 %v8436_v5, %v4936_v31  ;;  %v6701_v0 = vpop.f32.mrb[44].mxu0  ;;  %v1974_v55 = vadd.f32 %v8438_v59, %v1554_v23  ;;  %v1553_v3 = vadd.f32 %v8439_v58, %v889_v36  ;;  %v8444_v11 = vld [vmem:[#allocation62_spill] sm:$0xff]  ;;  %v8446_v5 = vld [vmem:[#allocation93_spill] sm:$0xff]  ;;  %v2150_v58 = vpop.permute.xlu0 %2149 }
 0x1c3   : > { %8431 = vst [vmem:[#allocation249_spill] sm:$0xff] %v6683_v16  ;;  %8433 = vst [vmem:[#allocation90_spill] sm:$0xff] %v6687_v30  ;;  %v1086_v20 = vadd.f32 %v8441_v38, %v8231_v62  ;;  %v6711_v16 = vpop.f32.mrb[45].mxu0  ;;  %v6714_v30 = vadd.f32 %v8444_v11, %v1972_v41  ;;  %v1555_v14 = vadd.f32 %v8446_v5, %v1082_v57  ;;  %v8448_v23 = vld [vmem:[#allocation87_spill] sm:$0xff]  ;;  %v6719_v36 = vpop.f32.mrb[45].mxu1  ;;  %v8457_v5 = vld [vmem:[#allocation160_spill] sm:$0xff] }
 0x1c4   : > { %8434 = vst [vmem:[#allocation250_spill] sm:$0xff] %v6690_v28  ;;  %8437 = vst [vmem:[#allocation16_spill] sm:$0xff] %v6701_v0  ;;  %v893_v28 = vadd.f32 %v8440_v8, %v4938_v17  ;;  %v8447_v0 = vld [vmem:[#allocation86_spill] sm:$0xff]  ;;  %v1558_v59 = vadd.f32 %v8448_v23, %v1084_v7  ;;  %v8451_v38 = vld [vmem:[#allocation155_spill] sm:$0xff]  ;;  %v6727_v41 = vpop.f32.mrb[46].mxu0  ;;  %v6730_v57 = vmul.f32 %v5017_v27, %v2142_v6 }
 0x1c5   : > { %8442 = vst [vmem:[#allocation67_spill] sm:$0xff] %v6709_v54  ;;  %8443 = vst [vmem:[#allocation156_spill] sm:$0xff] %v6711_v16  ;;  %v1556_v19 = vadd.f32 %v8447_v0, %v891_v29  ;;  %v8449_v8 = vld [vmem:[#allocation118_spill] sm:$0xff]  ;;  %v1973_v61 = vadd.f32 %v8451_v38, %v1553_v3  ;;  %v8452_v54 = vld [vmem:[#allocation88_spill] sm:$0xff]  ;;  %v6740_v3 = vmul.f32 %v5019_v4, %v2142_v6 }
 0x1c6   : > { %8445 = vst [vmem:[#allocation91_spill] sm:$0xff] %v6714_v30  ;;  %v6722_v10 = vadd.f32 %v8449_v8, %v1974_v55  ;;  %v1557_v32 = vadd.f32 %v8452_v54, %v893_v28  ;;  %v8453_v16 = vld [vmem:[#allocation92_spill] sm:$0xff]  ;;  %8454 = vst [vmem:[#allocation64_spill] sm:$0xff] %v6730_v57  ;;  %v8455_v0 = vld [vmem:[#allocation157_spill] sm:$0xff]  ;;  %v1978_v23 = vadd.f32 %v8457_v5, %v1558_v59  ;;  %v6735_v30 = vpop.f32.mrb[46].mxu1  ;;  %v6737_v55 = vpop.f32.mrb[47].mxu0 }
 0x1c7   : > { %v1559_v52 = vadd.f32 %v8453_v16, %v1086_v20  ;;  %v1975_v29 = vadd.f32 %v8455_v0, %v1555_v14  ;;  %v8456_v7 = vld [vmem:[#allocation158_spill] sm:$0xff]  ;;  %8458 = vst [vmem:[#allocation62_spill] sm:$0xff] %v6740_v3  ;;  %v8459_v28 = vld [vmem:[#allocation63_spill] sm:$0xff]  ;;  %v8462_v8 = vld [vmem:[#allocation161_spill] sm:$0xff]  ;;  %v6771_v5 = vmul.f32 %v5017_v27, %v2138_v25 }
 0x1c8   : > { %8450 = vst [vmem:[#allocation69_spill] sm:$0xff] %v6722_v10  ;;  %v1976_v11 = vadd.f32 %v8456_v7, %v1556_v19  ;;  %v6743_v16 = vadd.f32 %v8459_v28, %v1973_v61  ;;  %v8461_v20 = vld [vmem:[#allocation159_spill] sm:$0xff]  ;;  %v6747_v10 = vpop.f32.mrb[47].mxu1  ;;  %v6750_v19 = vmul.f32 %v5021_v49, %v2142_v6  ;;  %v8464_v14 = vld [vmem:[#allocation68_spill] sm:$0xff]  ;;  %v6759_v7 = vadd.f32 %v6521_v43, %v1978_v23  ;;  %v6784_v23 = vpop.f32.mrb[48].mxu0 }
 0x1c9   : > { %v1977_v54 = vadd.f32 %v8461_v20, %v1557_v32  ;;  %v1979_v38 = vadd.f32 %v8462_v8, %v1559_v52  ;;  %v6753_v59 = vadd.f32 %v8464_v14, %v1975_v29  ;;  %v6762_v61 = vmul.f32 %v5024_v9, %v2142_v6  ;;  %v2146_v29 = vpop.permute.xlu1 %2145  ;;  %v8471_v6 = vld [vmem:[#allocation120_spill] sm:$0xff]  ;;  %v8475_v8 = vld [vmem:[#allocation193_spill] sm:$0xff]  ;;  %v6799_v14 = vpop.f32.mrb[49].mxu0 }
 0x1ca   : > { %8460 = vst [vmem:[#allocation93_spill] sm:$0xff] %v6743_v16  ;;  %8463 = vst [vmem:[#allocation86_spill] sm:$0xff] %v6750_v19  ;;  %v6756_v0 = vadd.f32 %v6515_v35, %v1976_v11  ;;  %v6774_v28 = vmul.f32 %v5019_v4, %v2138_v25  ;;  %v6777_v35 = vmul.f32 %v5021_v49, %v2138_v25  ;;  %v2158_v11 = vpop.permute.xlu0 %2157 }
 0x1cb   : > { %8465 = vst [vmem:[#allocation87_spill] sm:$0xff] %v6753_v59  ;;  %8467 = vst [vmem:[#allocation155_spill] sm:$0xff] %v6759_v7  ;;  %v6765_v32 = vadd.f32 %v6518_v12, %v1977_v54  ;;  %v6768_v52 = vadd.f32 %v6524_v63, %v1979_v38  ;;  %v6780_v43 = vmul.f32 %v5024_v9, %v2138_v25  ;;  %v6797_v25 = vpop.f32.mrb[48].mxu1  ;;  %v8477_v59 = vld [vmem:[#allocation97_spill] sm:$0xff] }
 0x1cc   : > { %8466 = vst [vmem:[#allocation118_spill] sm:$0xff] %v6756_v0  ;;  %8468 = vst [vmem:[#allocation88_spill] sm:$0xff] %v6762_v61  ;;  %v897_v12 = vadd.f32 %v8471_v6, %v4934_v50  ;;  %v6787_v63 = vmul.f32 %v5017_v27, %v2150_v58  ;;  %v6790_v20 = vmul.f32 %v5019_v4, %v2150_v58 }
 0x1cd   : > { %8469 = vst [vmem:[#allocation92_spill] sm:$0xff] %v6765_v32  ;;  %8470 = vst [vmem:[#allocation157_spill] sm:$0xff] %v6768_v52  ;;  %v6793_v54 = vmul.f32 %v5021_v49, %v2150_v58  ;;  %v1090_v38 = vadd.f32 %v8475_v8, %v4936_v31  ;;  %v6802_v6 = vmul.f32 %v5024_v9, %v2150_v58  ;;  %v6811_v52 = vpop.f32.mrb[49].mxu1 }
 0x1ce   : > { %8472 = vst [vmem:[#allocation158_spill] sm:$0xff] %v6787_v63  ;;  %8473 = vst [vmem:[#allocation160_spill] sm:$0xff] %v6790_v20  ;;  %v1560_v16 = vadd.f32 %v8477_v59, %v897_v12  ;;  %v6806_v63 = vmul.f32 %v5017_v27, %v2146_v29  ;;  %v6809_v20 = vmul.f32 %v5019_v4, %v2146_v29  ;;  %v6822_v59 = vpop.f32.mrb[50].mxu0  ;;  %v8484_v12 = vld [vmem:[#allocation18_spill] sm:$0xff] }
 0x1cf   : > { %8474 = vst [vmem:[#allocation63_spill] sm:$0xff] %v6793_v54  ;;  %8476 = vst [vmem:[#allocation159_spill] sm:$0xff] %v6802_v6  ;;  %v8480_v54 = vld [vmem:[#allocation98_spill] sm:$0xff]  ;;  %v6815_v8 = vmul.f32 %v5021_v49, %v2146_v29  ;;  %v6818_v32 = vmul.f32 %v5024_v9, %v2146_v29  ;;  %v899_v58 = vadd.f32 %v6461_v46, %v4938_v17  ;;  %v6833_v29 = vpop.f32.mrb[51].mxu0  ;;  %v8488_v46 = vld [vmem:[#allocation99_spill] sm:$0xff] }
 0x1d0   : > { %8478 = vst [vmem:[#allocation161_spill] sm:$0xff] %v6806_v63  ;;  %8479 = vst [vmem:[#allocation68_spill] sm:$0xff] %v6809_v20  ;;  %v1562_v7 = vadd.f32 %v8480_v54, %v1090_v38  ;;  %v1980_v6 = vadd.f32 %v8484_v12, %v1560_v16  ;;  %v1092_v0 = vadd.f32 %v6469_v39, %v8231_v62  ;;  %v6831_v38 = vpop.f32.mrb[50].mxu1 }
 0x1d1   : > { %8481 = vst [vmem:[#allocation120_spill] sm:$0xff] %v6815_v8  ;;  %8482 = vst [vmem:[#allocation193_spill] sm:$0xff] %v6818_v32  ;;  %v901_v20 = vadd.f32 %v6471_v26, %v4934_v50  ;;  %v1094_v54 = vadd.f32 %v6480_v24, %v4936_v31  ;;  %v8487_v32 = vld [vmem:[#allocation164_spill] sm:$0xff]  ;;  %v1561_v63 = vadd.f32 %v8488_v46, %v899_v58  ;;  %v6841_v12 = vpop.f32.mrb[51].mxu1  ;;  %v8491_v24 = vld [vmem:[#allocation105_spill] sm:$0xff] }
 0x1d2   : > { %8483 = vst [vmem:[#allocation97_spill] sm:$0xff] %v6822_v59  ;;  %8485 = vst [vmem:[#allocation98_spill] sm:$0xff] %v6831_v38  ;;  %v1982_v8 = vadd.f32 %v8487_v32, %v1562_v7  ;;  %v903_v16 = vadd.f32 %v6482_v60, %v4938_v17  ;;  %v1096_v39 = vadd.f32 %v6493_v40, %v8231_v62  ;;  %v8492_v38 = vld [vmem:[#allocation94_spill] sm:$0xff]  ;;  %v2166_v7 = vpop.permute.xlu0 %2165  ;;  %v8495_v58 = vld [vmem:[#allocation163_spill] sm:$0xff] }
 0x1d3   : > { %8486 = vst [vmem:[#allocation18_spill] sm:$0xff] %v6833_v29  ;;  %8489 = vst [vmem:[#allocation164_spill] sm:$0xff] %v6841_v12  ;;  %v6844_v26 = vadd.f32 %v6475_v22, %v1980_v6  ;;  %v1563_v59 = vadd.f32 %v8491_v24, %v1092_v0  ;;  %v1564_v61 = vadd.f32 %v8492_v38, %v901_v20  ;;  %v8493_v29 = vld [vmem:[#allocation95_spill] sm:$0xff]  ;;  %v8496_v46 = vld [vmem:[#allocation96_spill] sm:$0xff] }
 0x1d4   : > { %v1566_v3 = vadd.f32 %v8493_v29, %v1094_v54  ;;  %v6850_v32 = vadd.f32 %v6497_v47, %v1982_v8  ;;  %v1981_v60 = vadd.f32 %v8495_v58, %v1561_v63  ;;  %v1565_v19 = vadd.f32 %v8496_v46, %v903_v16  ;;  %v8497_v40 = vld [vmem:[#allocation100_spill] sm:$0xff]  ;;  %v8499_v22 = vld [vmem:[#allocation165_spill] sm:$0xff]  ;;  %v8500_v0 = vld [vmem:[#allocation166_spill] sm:$0xff]  ;;  %v2154_v54 = vpop.permute.xlu1 %2153  ;;  %v6861_v29 = vpop.f32.mrb[52].mxu0 }
 0x1d5   : > { %8490 = vst [vmem:[#allocation99_spill] sm:$0xff] %v6844_v26  ;;  %v1567_v57 = vadd.f32 %v8497_v40, %v1096_v39  ;;  %v6856_v12 = vmul.f32 %v5017_v27, %v2158_v11  ;;  %v1983_v6 = vadd.f32 %v8499_v22, %v1563_v59  ;;  %v1984_v24 = vadd.f32 %v8500_v0, %v1564_v61  ;;  %v8501_v20 = vld [vmem:[#allocation168_spill] sm:$0xff]  ;;  %v8504_v8 = vld [vmem:[#allocation167_spill] sm:$0xff]  ;;  %v8505_v39 = vld [vmem:[#allocation169_spill] sm:$0xff]  ;;  %v6871_v46 = vpop.f32.mrb[52].mxu1  ;;  %v6873_v59 = vpop.f32.mrb[53].mxu0 }
 0x1d6   : > { %8494 = vst [vmem:[#allocation105_spill] sm:$0xff] %v6850_v32  ;;  %v1986_v38 = vadd.f32 %v8501_v20, %v1566_v3  ;;  %v6864_v47 = vmul.f32 %v5019_v4, %v2158_v11  ;;  %v6867_v63 = vadd.f32 %v6486_v18, %v1981_v60  ;;  %v1985_v16 = vadd.f32 %v8504_v8, %v1565_v19  ;;  %v6887_v60 = vpop.f32.mrb[53].mxu1  ;;  %v8515_v22 = vld [vmem:[#allocation138_spill] sm:$0xff]  ;;  %v8529_v32 = vld [vmem:[#allocation136_spill] sm:$0xff] }
 0x1d7   : > { %8498 = vst [vmem:[#allocation94_spill] sm:$0xff] %v6856_v12  ;;  %v1987_v58 = vadd.f32 %v8505_v39, %v1567_v57  ;;  %8506 = vst [vmem:[#allocation96_spill] sm:$0xff] %v6871_v46  ;;  %v6876_v61 = vmul.f32 %v5021_v49, %v2158_v11  ;;  %v6879_v3 = vadd.f32 %v6508_v53, %v1983_v6  ;;  %v8533_v12 = vld [vmem:[#allocation230_spill] sm:$0xff] }
 0x1d8   : > { %8502 = vst [vmem:[#allocation95_spill] sm:$0xff] %v6864_v47  ;;  %8503 = vst [vmem:[#allocation163_spill] sm:$0xff] %v6867_v63  ;;  %v6882_v40 = vadd.f32 %v6548_v13, %v1984_v24  ;;  %v6885_v18 = vadd.f32 %v6559_v37, %v1986_v38  ;;  %v6890_v57 = vmul.f32 %v5024_v9, %v2158_v11  ;;  %v8521_v11 = vld [vmem:[#allocation76_spill] sm:$0xff]  ;;  %v8530_v63 = vld [vmem:[#allocation110_spill] sm:$0xff] }
 0x1d9   : > { %8507 = vst [vmem:[#allocation100_spill] sm:$0xff] %v6873_v59  ;;  %8508 = vst [vmem:[#allocation165_spill] sm:$0xff] %v6876_v61  ;;  %v6893_v19 = vadd.f32 %v6551_v45, %v1985_v16  ;;  %v6896_v0 = vadd.f32 %v8515_v22, %v1987_v58  ;;  %v6899_v53 = vmul.f32 %v5017_v27, %v2154_v54  ;;  %v2466_v45 = vpop.permute.xlu0 %2465  ;;  %v8525_v16 = vld [vmem:[#allocation72_spill] sm:$0xff] }
 0x1da   : > { %8509 = vst [vmem:[#allocation166_spill] sm:$0xff] %v6879_v3  ;;  %8510 = vst [vmem:[#allocation168_spill] sm:$0xff] %v6882_v40  ;;  %v6902_v13 = vmul.f32 %v5019_v4, %v2154_v54  ;;  %v6905_v37 = vmul.f32 %v5021_v49, %v2154_v54  ;;  %v6908_v6 = vmul.f32 %v5024_v9, %v2154_v54  ;;  %v8527_v54 = vld [vmem:[#allocation109_spill] sm:$0xff] }
 0x1db   : > { %8511 = vst [vmem:[#allocation167_spill] sm:$0xff] %v6885_v18  ;;  %8512 = vst [vmem:[#allocation169_spill] sm:$0xff] %v6887_v60  ;;  %v907_v24 = vadd.f32 %v8521_v11, %v4934_v50  ;;  %v6913_v20 = vmul.f32 %v5017_v27, %v2166_v7  ;;  %v6916_v38 = vmul.f32 %v5019_v4, %v2166_v7  ;;  %v8528_v11 = vld [vmem:[#allocation135_spill] sm:$0xff]  ;;  %v8542_v60 = vld [vmem:[#allocation70_spill] sm:$0xff] }
 0x1dc   : > { %8513 = vst [vmem:[#allocation251_spill] sm:$0xff] %v6890_v57  ;;  %8514 = vst [vmem:[#allocation252_spill] sm:$0xff] %v6893_v19  ;;  %v6919_v8 = vmul.f32 %v5021_v49, %v2166_v7  ;;  %v1100_v39 = vadd.f32 %v8525_v16, %v4936_v31  ;;  %v6924_v58 = vmul.f32 %v5024_v9, %v2166_v7  ;;  %v8531_v57 = vld [vmem:[#allocation218_spill] sm:$0xff]  ;;  %v8541_v19 = vld [vmem:[#allocation177_spill] sm:$0xff] }
 0x1dd   : > { %8516 = vst [vmem:[#allocation138_spill] sm:$0xff] %v6896_v0  ;;  %8517 = vst [vmem:[#allocation253_spill] sm:$0xff] %v6899_v53  ;;  %v1568_v22 = vadd.f32 %v8527_v54, %v907_v24  ;;  %v909_v3 = vadd.f32 %v8528_v11, %v4938_v17  ;;  %v2628_v47 = vmul.f32 %v8531_v57, %v2466_v45  ;;  %v8536_v24 = vld [vmem:[#allocation113_spill] sm:$0xff]  ;;  %v8538_v53 = vld [vmem:[#allocation171_spill] sm:$0xff] }
 0x1de   : > { %8518 = vst [vmem:[#allocation254_spill] sm:$0xff] %v6902_v13  ;;  %8519 = vst [vmem:[#allocation255_spill] sm:$0xff] %v6905_v37  ;;  %v1570_v26 = vadd.f32 %v8530_v63, %v1100_v39  ;;  %v2630_v16 = vmul.f32 %v8533_v12, %v2466_v45  ;;  %v8537_v37 = vld [vmem:[#allocation35_spill] sm:$0xff]  ;;  %v8540_v63 = vld [vmem:[#allocation53_spill] sm:$0xff] }
 0x1df   : > { %8520 = vst [vmem:[#allocation256_spill] sm:$0xff] %v6908_v6  ;;  %8522 = vst [vmem:[#allocation76_spill] sm:$0xff] %v6913_v20  ;;  %v1102_v20 = vadd.f32 %v8529_v32, %v8231_v62  ;;  %v8534_v6 = vld [vmem:[#allocation17_spill] sm:$0xff]  ;;  %v2631_v11 = vmul.f32 %v8537_v37, %v2466_v45  ;;  %v8539_v32 = vld [vmem:[#allocation51_spill] sm:$0xff] }
 0x1e0   : > { %8523 = vst [vmem:[#allocation257_spill] sm:$0xff] %v6916_v38  ;;  %8524 = vst [vmem:[#allocation258_spill] sm:$0xff] %v6919_v8  ;;  %v2162_v38 = vpop.permute.xlu1 %2161  ;;  %v8532_v8 = vld [vmem:[#allocation219_spill] sm:$0xff]  ;;  %v1988_v7 = vadd.f32 %v8534_v6, %v1568_v22  ;;  %v1990_v0 = vadd.f32 %v8538_v53, %v1570_v26  ;;  %v2756_v18 = vadd.f32 %v2628_v47, %v8539_v32  ;;  %v8545_v6 = vld [vmem:[#allocation20_spill] sm:$0xff] }
 0x1e1   : > { %8526 = vst [vmem:[#allocation72_spill] sm:$0xff] %v6924_v58  ;;  %v2629_v61 = vmul.f32 %v8532_v8, %v2466_v45  ;;  %v8535_v58 = vld [vmem:[#allocation111_spill] sm:$0xff]  ;;  %v1571_v54 = vadd.f32 %v8536_v24, %v1102_v20  ;;  %v2758_v40 = vadd.f32 %v2630_v16, %v8541_v19  ;;  %v6947_v46 = vmul.f32 %v5017_v27, %v2162_v38  ;;  %v8547_v22 = vld [vmem:[#allocation133_spill] sm:$0xff]  ;;  %v8549_v26 = vld [vmem:[#allocation178_spill] sm:$0xff] }
 0x1e2   : > { %v1569_v13 = vadd.f32 %v8535_v58, %v909_v3  ;;  %v6944_v59 = vadd.f32 %v8542_v60, %v1988_v7  ;;  %v8546_v58 = vld [vmem:[#allocation172_spill] sm:$0xff]  ;;  %v6952_v45 = vadd.f32 %v8547_v22, %v1990_v0  ;;  %v2759_v53 = vadd.f32 %v2631_v11, %v8549_v26  ;;  %v8552_v19 = vld [vmem:[#allocation77_spill] sm:$0xff]  ;;  %v6978_v26 = vpop.f32.mrb[54].mxu0 }
 0x1e3   : > { %v2757_v39 = vadd.f32 %v2629_v61, %v8540_v63  ;;  %8544 = vst [vmem:[#allocation135_spill] sm:$0xff] %v6947_v46  ;;  %v1991_v20 = vadd.f32 %v8546_v58, %v1571_v54  ;;  %v2884_v47 = vmul.f32 0.5, %v2756_v18  ;;  %v8550_v61 = vld [vmem:[#allocation71_spill] sm:$0xff]  ;;  %v3140_v16 = vmul.f32 0.5, %v2758_v40  ;;  %v8554_v7 = vld [vmem:[#allocation137_spill] sm:$0xff]  ;;  %v8557_v18 = vld [vmem:[#allocation82_spill] sm:$0xff] }
 0x1e4   : > { %8543 = vst [vmem:[#allocation109_spill] sm:$0xff] %v6944_v59  ;;  %v1989_v3 = vadd.f32 %v8545_v6, %v1569_v13  ;;  %8548 = vst [vmem:[#allocation136_spill] sm:$0xff] %v6952_v45  ;;  %v911_v63 = vadd.f32 %v8554_v7, %v4934_v50  ;;  %v8555_v13 = vld [vmem:[#allocation139_spill] sm:$0xff]  ;;  %v8556_v0 = vld [vmem:[#allocation81_spill] sm:$0xff]  ;;  %v1106_v11 = vadd.f32 %v8557_v18, %v8231_v62 }
 0x1e5   : > { %v3012_v24 = vmul.f32 0.5, %v2757_v39  ;;  %v6959_v60 = vadd.f32 %v8552_v19, %v1991_v20  ;;  %3978 = vtanh.f32 %v2884_v47  ;;  %v1104_v54 = vadd.f32 %v8555_v13, %v4936_v31  ;;  %v6969_v39 = vpop.permute.xlu1 %2169  ;;  %v8561_v20 = vld [vmem:[#allocation106_spill] sm:$0xff]  ;;  %v6980_v47 = vpop.f32.mrb[54].mxu1  ;;  %v8563_v7 = vld [vmem:[#allocation108_spill] sm:$0xff] }
 0x1e6   : > { %v6956_v32 = vadd.f32 %v8550_v61, %v1989_v3  ;;  %v913_v6 = vadd.f32 %v8556_v0, %v4938_v17  ;;  %8558 = vst [vmem:[#allocation219_spill] sm:$0xff] %v6969_v39  ;;  %v2478_v3 = vpop.permute.xlu0 %2477  ;;  %v6972_v58 = vmul.f32 %v5019_v4, %v2162_v38  ;;  %v6975_v40 = vmul.f32 %v5021_v49, %v2162_v38  ;;  %v8562_v61 = vld [vmem:[#allocation107_spill] sm:$0xff]  ;;  %v8564_v0 = vld [vmem:[#allocation112_spill] sm:$0xff]  ;;  %v6987_v45 = vpop.f32.mrb[55].mxu1  ;;  %v8602_v46 = vld [vmem:[#allocation114_spill] sm:$0xff] }
 0x1e7   : > { %8553 = vst [vmem:[#allocation218_spill] sm:$0xff] %v6959_v60  ;;  %3980 = vtanh.f32 %v3012_v24  ;;  %v1572_v22 = vadd.f32 %v8561_v20, %v911_v63  ;;  %v1574_v19 = vadd.f32 %v8562_v61, %v1104_v54  ;;  %v1575_v18 = vadd.f32 %v8564_v0, %v1106_v11  ;;  %v6985_v60 = vpop.f32.mrb[55].mxu0  ;;  %v8566_v24 = vld [vmem:[#allocation173_spill] sm:$0xff]  ;;  %v8569_v61 = vld [vmem:[#allocation174_spill] sm:$0xff] }
 0x1e8   : > { %8551 = vst [vmem:[#allocation110_spill] sm:$0xff] %v6956_v32  ;;  %8559 = vst [vmem:[#allocation230_spill] sm:$0xff] %v6972_v58  ;;  %3982 = vtanh.f32 %v2759_v53  ;;  %v1573_v13 = vadd.f32 %v8563_v7, %v913_v6  ;;  %v6990_v32 = vmul.f32 %v5024_v9, %v2162_v38  ;;  %v6995_v20 = vmul.f32 %v5017_v27, %v6969_v39  ;;  %v8568_v53 = vld [vmem:[#allocation175_spill] sm:$0xff]  ;;  %v8570_v7 = vld [vmem:[#allocation176_spill] sm:$0xff] }
 0x1e9   : > { %8560 = vst [vmem:[#allocation17_spill] sm:$0xff] %v6975_v40  ;;  %3984 = vtanh.f32 %v3140_v16  ;;  %v1992_v63 = vadd.f32 %v8566_v24, %v1572_v22  ;;  %v1994_v54 = vadd.f32 %v8568_v53, %v1574_v19  ;;  %v1995_v11 = vadd.f32 %v8570_v7, %v1575_v18  ;;  %v8571_v18 = vld [vmem:[#allocation179_spill] sm:$0xff]  ;;  %v8572_v53 = vld [vmem:[#allocation181_spill] sm:$0xff]  ;;  %v8574_v7 = vld [vmem:[#allocation188_spill] sm:$0xff] }
 0x1ea   : > { %8565 = vst [vmem:[#allocation111_spill] sm:$0xff] %v6990_v32  ;;  %8567 = vst [vmem:[#allocation113_spill] sm:$0xff] %v6995_v20  ;;  %v1993_v6 = vadd.f32 %v8569_v61, %v1573_v13  ;;  %v2640_v0 = vmul.f32 %v8531_v57, %v2478_v3  ;;  %v2641_v38 = vmul.f32 %v8532_v8, %v2478_v3  ;;  %v8604_v9 = vld [vmem:[#allocation150_spill] sm:$0xff] }
 0x1eb   : > { %v7002_v58 = vadd.f32 %v6643_v56, %v1992_v63  ;;  %v2642_v16 = vmul.f32 %v8533_v12, %v2478_v3  ;;  %v2643_v22 = vmul.f32 %v8537_v37, %v2478_v3  ;;  %v7008_v27 = vadd.f32 %v6651_v34, %v1994_v54  ;;  %v8573_v63 = vld [vmem:[#allocation180_spill] sm:$0xff] }
 0x1ec   : > { %v7011_v19 = vadd.f32 %v6648_v42, %v1993_v6  ;;  %v7014_v13 = vadd.f32 %v6654_v15, %v1995_v11  ;;  %v2768_v24 = vadd.f32 %v2640_v0, %v8571_v18  ;;  %v2769_v56 = vadd.f32 %v2641_v38, %v8572_v53  ;;  %v8576_v38 = vld [vmem:[#allocation121_spill] sm:$0xff] }
 0x1ed   : > { %v2770_v61 = vadd.f32 %v2642_v16, %v8573_v63  ;;  %v2771_v20 = vadd.f32 %v2643_v22, %v8574_v7  ;;  %v917_v3 = vadd.f32 %v6605_v48, %v4934_v50  ;;  %v1110_v42 = vadd.f32 %v6615_v44, %v4936_v31  ;;  %v8577_v22 = vld [vmem:[#allocation122_spill] sm:$0xff]  ;;  %v8578_v44 = vld [vmem:[#allocation123_spill] sm:$0xff]  ;;  %v8579_v53 = vld [vmem:[#allocation125_spill] sm:$0xff]  ;;  %v2470_v7 = vpop.permute.xlu1 %2469 }
 0x1ee   : > { %v2887_v34 = vmul.f32 0.5, %v2768_v24  ;;  %v919_v15 = vadd.f32 %v6617_v51, %v4938_v17  ;;  %v1112_v54 = vadd.f32 %v6631_v21, %v8231_v62  ;;  %v7030_v6 = vmul.f32 %v5019_v4, %v6969_v39 }
 0x1ef   : > { %v3015_v11 = vmul.f32 0.5, %v2769_v56  ;;  %v3143_v0 = vmul.f32 0.5, %v2770_v61  ;;  %v1576_v16 = vadd.f32 %v8576_v38, %v917_v3  ;;  %v3979_v48 = vpop.eup %3978  ;;  %v1578_v18 = vadd.f32 %v8577_v22, %v1110_v42  ;;  %v8581_v56 = vld [vmem:[#allocation19_spill] sm:$0xff]  ;;  %v7045_v42 = vld [vmem:[%s5820_s21 + $0x8] sm:$0xff]   ;;  %v8583_v38 = vld [vmem:[#allocation21_spill] sm:$0xff] }
 0x1f0   : > { %8575 = vst [vmem:[#allocation35_spill] sm:$0xff] %v7030_v6  ;;  %3986 = vtanh.f32 %v2887_v34  ;;  %v1577_v24 = vadd.f32 %v8578_v44, %v919_v15  ;;  %v1579_v51 = vadd.f32 %v8579_v53, %v1112_v54  ;;  %v2948_v21 = vmul.f32 0.5, %v3979_v48  ;;  %v8582_v15 = vld [vmem:[#allocation182_spill] sm:$0xff]  ;;  %v8594_v6 = vld [vmem:[#allocation45_spill] sm:$0xff] }
 0x1f1   : > { %v3981_v63 = vpop.eup %3980  ;;  %v7041_v4 = vmul.f32 %v5021_v49, %v6969_v39  ;;  %3988 = vtanh.f32 %v3015_v11  ;;  %v1996_v61 = vadd.f32 %v8581_v56, %v1576_v16  ;;  %v1998_v54 = vadd.f32 %v8582_v15, %v1578_v18  ;;  %v8585_v49 = vld [vmem:[#allocation183_spill] sm:$0xff]  ;;  %v2486_v18 = vpop.permute.xlu0 %2485 }
 0x1f2   : > { %v3983_v3 = vpop.eup %3982  ;;  %v3076_v34 = vmul.f32 0.5, %v3981_v63  ;;  %3990 = vtanh.f32 %v2771_v20  ;;  %v1997_v22 = vadd.f32 %v8583_v38, %v1577_v24  ;;  %v2980_v48 = vadd.f32 0.5, %v2948_v21 }
 0x1f3   : > { %8580 = vst [vmem:[#allocation171_spill] sm:$0xff] %v7041_v4  ;;  %v3985_v44 = vpop.eup %3984  ;;  %3992 = vtanh.f32 %v3143_v0  ;;  %v7050_v53 = vadd.f32 %v6600_v33, %v1996_v61  ;;  %v1999_v11 = vadd.f32 %v8585_v49, %v1579_v51  ;;  %v7055_v56 = vadd.f32 %v6620_v2, %v1998_v54  ;;  %v8588_v0 = vld [vmem:[#allocation145_spill] sm:$0xff]  ;;  %v8593_v49 = vld [vmem:[#allocation44_spill] sm:$0xff] }
 0x1f4   : > { %v3108_v16 = vadd.f32 0.5, %v3076_v34  ;;  %v7058_v63 = vadd.f32 %v6608_v1, %v1997_v22  ;;  %v2632_v20 = vmul.f32 %v8531_v57, %v2470_v7  ;;  %v3332_v24 = vmul.f32 %v3983_v3, %v2980_v48  ;;  %v8590_v51 = vld [vmem:[#allocation225_spill] sm:$0xff]  ;;  %v8592_v1 = vld [vmem:[#allocation43_spill] sm:$0xff] }
 0x1f5   : > { %8584 = vst [vmem:[#allocation51_spill] sm:$0xff] %v7050_v53  ;;  %8586 = vst [vmem:[#allocation53_spill] sm:$0xff] %v7055_v56  ;;  %v3771_v21 = vunpack.c.h.bf16 %v7045_v42  ;;  %v7063_v15 = vadd.f32 %v8588_v0, %v1999_v11  ;;  %v2633_v33 = vmul.f32 %v8532_v8, %v2470_v7  ;;  %v8591_v61 = vunpack.c.l.bf16 %v8590_v51  ;;  %v8601_v53 = vld [vmem:[#allocation58_spill] sm:$0xff] }
 0x1f6   : > { %8587 = vst [vmem:[#allocation177_spill] sm:$0xff] %v7058_v63  ;;  %v2634_v2 = vmul.f32 %v8533_v12, %v2470_v7  ;;  %v2635_v54 = vmul.f32 %v8537_v37, %v2470_v7  ;;  %v2760_v38 = vadd.f32 %v2632_v20, %v8592_v1  ;;  %v3204_v22 = vmul.f32 0.5, %v3985_v44  ;;  %v8596_v20 = vld [vmem:[#allocation55_spill] sm:$0xff] }
 0x1f7   : > { %8589 = vst [vmem:[#allocation70_spill] sm:$0xff] %v7063_v15  ;;  %v3300_v34 = vmul.f32 %v8591_v61, %v3108_v16  ;;  %v2761_v3 = vadd.f32 %v2633_v33, %v8593_v49  ;;  %v2648_v48 = vmul.f32 %v8531_v57, %v2486_v18  ;;  %v2649_v11 = vmul.f32 %v8532_v8, %v2486_v18  ;;  %v8595_v15 = vld [vmem:[#allocation41_spill] sm:$0xff]  ;;  %v8598_v33 = vld [vmem:[#allocation147_spill] sm:$0xff] }
 0x1f8   : > { %v2762_v4 = vadd.f32 %v2634_v2, %v8594_v6  ;;  %v2763_v51 = vadd.f32 %v2635_v54, %v8595_v15  ;;  %v2885_v16 = vmul.f32 0.5, %v2760_v38  ;;  %v2650_v7 = vmul.f32 %v8533_v12, %v2486_v18  ;;  %v8600_v49 = vld [vmem:[#allocation57_spill] sm:$0xff] }
 0x1f9   : > { %v3364_v0 = vadd.f32 %v3332_v24, %v3300_v34  ;;  %v3013_v61 = vmul.f32 0.5, %v2761_v3  ;;  %v2651_v56 = vmul.f32 %v8537_v37, %v2486_v18  ;;  %v2776_v44 = vadd.f32 %v2648_v48, %v8596_v20  ;;  %v8597_v24 = vld [vmem:[#allocation56_spill] sm:$0xff]  ;;  %v7088_v18 = vld [vmem:[%s5820_s21] sm:$0xff]   ;;  %v7091_v3 = vpop.f32.mrb[56].mxu0  ;;  %v7093_v48 = vpop.f32.mrb[56].mxu1 }
 0x1fa   : > { %v3987_v1 = vpop.eup %3986  ;;  %v3141_v6 = vmul.f32 0.5, %v2762_v4  ;;  %v2777_v15 = vadd.f32 %v2649_v11, %v8597_v24  ;;  %v921_v34 = vadd.f32 %v8598_v33, %v4934_v50  ;;  %v3236_v54 = vadd.f32 0.5, %v3204_v22  ;;  %v7096_v4 = vld [vmem:[%s5820_s21 + $0x10] sm:$0xff]   ;;  %v7098_v33 = vpop.f32.mrb[57].mxu0 }
 0x1fb   : > { %3994 = vtanh.f32 %v3364_v0  ;;  %3492 = vst [vmem:[%s7081_s20] sm:$0xff] %v3364_v0  ;;  %v3989_v2 = vpop.eup %3988  ;;  %v2951_v38 = vmul.f32 0.5, %v3987_v1  ;;  %v2889_v11 = vmul.f32 0.5, %v2776_v44  ;;  %v7100_v22 = vpop.f32.mrb[57].mxu1  ;;  %v2779_v32 = vadd.f32 %v2651_v56, %v8601_v53 }
 0x1fc   : > { %3996 = vtanh.f32 %v2885_v16  ;;  %v3991_v20 = vpop.eup %3990  ;;  %v3079_v0 = vmul.f32 0.5, %v3989_v2  ;;  %v3017_v24 = vmul.f32 0.5, %v2777_v15  ;;  %8599 = vst [vmem:[#allocation20_spill] sm:$0xff] %v7100_v22  ;;  %v2778_v16 = vadd.f32 %v2650_v7, %v8600_v49  ;;  %v8606_v49 = vld [vmem:[#allocation115_spill] sm:$0xff]  ;;  %v2474_v56 = vpop.permute.xlu1 %2473 }
 0x1fd   : > { %3998 = vtanh.f32 %v3013_v61  ;;  %v3993_v1 = vpop.eup %3992  ;;  %v2983_v63 = vadd.f32 0.5, %v2951_v38  ;;  %v1580_v2 = vadd.f32 %v8602_v46, %v921_v34  ;;  %v8603_v61 = vld [vmem:[#allocation148_spill] sm:$0xff]  ;;  %v923_v39 = vadd.f32 %v8604_v9, %v4938_v17  ;;  %v8611_v9 = vld [vmem:[#allocation186_spill] sm:$0xff] }
 0x1fe   : > { %4000 = vtanh.f32 %v3141_v6  ;;  %v3111_v40 = vadd.f32 0.5, %v3079_v0  ;;  %v1114_v59 = vadd.f32 %v8603_v61, %v4936_v31  ;;  %v8605_v6 = vld [vmem:[#allocation184_spill] sm:$0xff]  ;;  %v3145_v46 = vmul.f32 0.5, %v2778_v16 }
 0x1ff   : > { %4002 = vtanh.f32 %v2763_v51  ;;  %v3335_v44 = vmul.f32 %v3991_v20, %v2983_v63  ;;  %v2000_v7 = vadd.f32 %v8605_v6, %v1580_v2  ;;  %v3207_v51 = vmul.f32 0.5, %v3993_v1  ;;  %v8607_v34 = vld [vmem:[#allocation116_spill] sm:$0xff]  ;;  %v8608_v63 = vld [vmem:[#allocation247_spill] sm:$0xff] }
 0x200   : > { %4004 = vtanh.f32 %v2889_v11  ;;  %v3303_v38 = vmul.f32 %v3771_v21, %v3111_v40  ;;  %v1582_v53 = vadd.f32 %v8606_v49, %v1114_v59  ;;  %v1581_v0 = vadd.f32 %v8607_v34, %v923_v39  ;;  %v8609_v11 = vld [vmem:[#allocation89_spill] sm:$0xff]  ;;  %v8613_v2 = vld [vmem:[#allocation124_spill] sm:$0xff]  ;;  %v8614_v39 = vld [vmem:[#allocation90_spill] sm:$0xff] }
 0x201   : > { %4006 = vtanh.f32 %v3017_v24  ;;  %v1116_v20 = vadd.f32 %v8608_v63, %v8231_v62  ;;  %v7116_v15 = vadd.f32 %v8609_v11, %v2000_v7  ;;  %v8612_v21 = vld [vmem:[#allocation185_spill] sm:$0xff]  ;;  %v2636_v6 = vmul.f32 %v8531_v57, %v2474_v56 }
 0x202   : > { %v3367_v61 = vadd.f32 %v3335_v44, %v3303_v38  ;;  %4008 = vtanh.f32 %v2779_v32  ;;  %v2002_v40 = vadd.f32 %v8611_v9, %v1582_v53  ;;  %v2001_v24 = vadd.f32 %v8612_v21, %v1581_v0  ;;  %v8616_v53 = vld [vmem:[#allocation249_spill] sm:$0xff]  ;;  %v8618_v0 = vld [vmem:[#allocation187_spill] sm:$0xff] }
 0x203   : > { %8610 = vst [vmem:[#allocation172_spill] sm:$0xff] %v7116_v15  ;;  %v1583_v59 = vadd.f32 %v8613_v2, %v1116_v20  ;;  %v2637_v1 = vmul.f32 %v8532_v8, %v2474_v56  ;;  %v2638_v32 = vmul.f32 %v8533_v12, %v2474_v56  ;;  %v2639_v38 = vmul.f32 %v8537_v37, %v2474_v56  ;;  %v8619_v20 = vld [vmem:[#allocation49_spill] sm:$0xff] }
 0x204   : > { %4010 = vtanh.f32 %v3367_v61  ;;  %3495 = vst [vmem:[%s7081_s20 + $0x18] sm:$0xff] %v3367_v61  ;;  %v7125_v44 = vadd.f32 %v8614_v39, %v2002_v40  ;;  %v7130_v34 = vadd.f32 %v8616_v53, %v2001_v24  ;;  %v2764_v11 = vadd.f32 %v2636_v6, %v8619_v20  ;;  %v8620_v61 = vld [vmem:[#allocation241_spill] sm:$0xff]  ;;  %v8621_v40 = vld [vmem:[#allocation242_spill] sm:$0xff] }
 0x205   : > { %v3995_v16 = vpop.eup %3994  ;;  %v2003_v63 = vadd.f32 %v8618_v0, %v1583_v59  ;;  %4012 = vtanh.f32 %v3145_v46  ;;  %v2765_v2 = vadd.f32 %v2637_v1, %v8620_v61  ;;  %v2766_v39 = vadd.f32 %v2638_v32, %v8621_v40  ;;  %v8622_v24 = vld [vmem:[#allocation250_spill] sm:$0xff]  ;;  %v8624_v46 = vld [vmem:[#allocation243_spill] sm:$0xff] }
 0x206   : > { %8615 = vst [vmem:[#allocation133_spill] sm:$0xff] %v7125_v44  ;;  %v3997_v7 = vpop.eup %3996  ;;  %v3428_v49 = vmul.f32 %v3995_v16, %v3236_v54  ;;  %8617 = vst [vmem:[#allocation178_spill] sm:$0xff] %v7130_v34  ;;  %v2494_v44 = vpop.permute.xlu0 %2493  ;;  %v3239_v54 = vadd.f32 0.5, %v3207_v51  ;;  %v2886_v6 = vmul.f32 0.5, %v2764_v11  ;;  %v2767_v53 = vadd.f32 %v2639_v38, %v8624_v46  ;;  %v8633_v34 = vld [vmem:[#allocation104_spill] sm:$0xff] }
 0x207   : > { %v3999_v9 = vpop.eup %3998  ;;  %v2949_v21 = vmul.f32 0.5, %v3997_v7  ;;  %v7142_v59 = vadd.f32 %v8622_v24, %v2003_v63  ;;  %v3014_v1 = vmul.f32 0.5, %v2765_v2  ;;  %v3142_v0 = vmul.f32 0.5, %v2766_v39  ;;  %v7148_v11 = vpop.f32.mrb[58].mxu0 }
 0x208   : > { %v4001_v15 = vpop.eup %4000  ;;  %3460 = vst [vmem:[%s7138_s22] sm:$0xff] %v3428_v49  ;;  %v3077_v56 = vmul.f32 0.5, %v3999_v9  ;;  %4014 = vtanh.f32 %v2886_v6  ;;  %v2656_v61 = vmul.f32 %v8531_v57, %v2494_v44  ;;  %v2657_v49 = vmul.f32 %v8532_v8, %v2494_v44  ;;  %8625 = vst [vmem:[#allocation77_spill] sm:$0xff] %v7148_v11  ;;  %v7158_v6 = vpop.f32.mrb[59].mxu0 }
 0x209   : > { %8623 = vst [vmem:[#allocation71_spill] sm:$0xff] %v7142_v59  ;;  %v4003_v16 = vpop.eup %4002  ;;  %v2981_v7 = vadd.f32 0.5, %v2949_v21  ;;  %4016 = vtanh.f32 %v3014_v1  ;;  %v7150_v21 = vpop.f32.mrb[58].mxu1  ;;  %v8627_v38 = vunpack.c.h.bf16 %v7088_v18  ;;  %v2658_v24 = vmul.f32 %v8533_v12, %v2494_v44  ;;  %8628 = vst [vmem:[#allocation139_spill] sm:$0xff] %v7158_v6  ;;  %v8632_v59 = vld [vmem:[#allocation102_spill] sm:$0xff]  ;;  %v8652_v6 = vld [vmem:[#allocation248_spill] sm:$0xff] }
 0x20a   : > { %v4005_v32 = vpop.eup %4004  ;;  %v3109_v20 = vadd.f32 0.5, %v3077_v56  ;;  %8626 = vst [vmem:[#allocation137_spill] sm:$0xff] %v7150_v21  ;;  %4018 = vtanh.f32 %v3142_v0  ;;  %v7155_v56 = vld [vmem:[%s5820_s21 + $0x18] sm:$0xff]   ;;  %v3205_v46 = vmul.f32 0.5, %v4001_v15  ;;  %v8631_v0 = vld [vmem:[#allocation61_spill] sm:$0xff] }
 0x20b   : > { %v4007_v51 = vpop.eup %4006  ;;  %v3333_v9 = vmul.f32 %v4003_v16, %v2981_v7  ;;  %v2953_v40 = vmul.f32 0.5, %v4005_v32  ;;  %v7160_v16 = vpop.f32.mrb[59].mxu1  ;;  %4020 = vtanh.f32 %v2767_v53  ;;  %v2659_v32 = vmul.f32 %v8537_v37, %v2494_v44 }
 0x20c   : > { %v3301_v2 = vmul.f32 %v8627_v38, %v3109_v20  ;;  %v3081_v39 = vmul.f32 0.5, %v4007_v51  ;;  %8629 = vst [vmem:[#allocation81_spill] sm:$0xff] %v7160_v16  ;;  %v4009_v7 = vpop.eup %4008  ;;  %v8630_v20 = vld [vmem:[#allocation54_spill] sm:$0xff]  ;;  %v2785_v38 = vadd.f32 %v2657_v49, %v8631_v0  ;;  %v2786_v16 = vadd.f32 %v2658_v24, %v8632_v59  ;;  %v8635_v49 = vld [vmem:[#allocation16_spill] sm:$0xff] }
 0x20d   : > { %v2985_v1 = vadd.f32 0.5, %v2953_v40  ;;  %v2784_v51 = vadd.f32 %v2656_v61, %v8630_v20  ;;  %v2787_v22 = vadd.f32 %v2659_v32, %v8633_v34  ;;  %v8634_v44 = vunpack.c.h.bf16 %v7096_v4  ;;  %v8636_v34 = vld [vmem:[#allocation67_spill] sm:$0xff]  ;;  %v8637_v59 = vld [vmem:[#allocation156_spill] sm:$0xff] }
 0x20e   : > { %v3365_v63 = vadd.f32 %v3333_v9, %v3301_v2  ;;  %v3113_v18 = vadd.f32 0.5, %v3081_v39  ;;  %v4011_v21 = vpop.eup %4010  ;;  %v3237_v61 = vadd.f32 0.5, %v3205_v46  ;;  %v3019_v2 = vmul.f32 0.5, %v2785_v38 }
 0x20f   : > { %v3337_v11 = vmul.f32 %v4009_v7, %v2985_v1  ;;  %v3431_v15 = vmul.f32 %v4011_v21, %v3239_v54  ;;  %v2891_v9 = vmul.f32 0.5, %v2784_v51  ;;  %v4013_v40 = vpop.eup %4012  ;;  %v927_v39 = vadd.f32 %v8635_v49, %v4934_v50  ;;  %v2482_v21 = vpop.permute.xlu1 %2481  ;;  %v8638_v1 = vld [vmem:[#allocation129_spill] sm:$0xff]  ;;  %v8640_v51 = vld [vmem:[#allocation131_spill] sm:$0xff] }
 0x210   : > { %4022 = vtanh.f32 %v3365_v63  ;;  %3493 = vst [vmem:[%s7081_s20 + $0x8] sm:$0xff] %v3365_v63  ;;  %v3305_v53 = vmul.f32 %v8634_v44, %v3113_v18  ;;  %v1120_v54 = vadd.f32 %v8636_v34, %v4936_v31  ;;  %v929_v63 = vadd.f32 %v8637_v59, %v4938_v17  ;;  %v8641_v44 = vld [vmem:[#allocation23_spill] sm:$0xff]  ;;  %v8644_v59 = vld [vmem:[#allocation22_spill] sm:$0xff] }
 0x211   : > { %4024 = vtanh.f32 %v2787_v22  ;;  %3463 = vst [vmem:[%s7138_s22 + $0x18] sm:$0xff] %v3431_v15  ;;  %v3147_v24 = vmul.f32 0.5, %v2786_v16  ;;  %v1584_v46 = vadd.f32 %v8638_v1, %v927_v39  ;;  %v1122_v22 = vadd.f32 %v6719_v36, %v8231_v62  ;;  %v8643_v34 = vld [vmem:[#allocation195_spill] sm:$0xff] }
 0x212   : > { %v3369_v7 = vadd.f32 %v3337_v11, %v3305_v53  ;;  %4026 = vtanh.f32 %v2891_v9  ;;  %v4015_v32 = vpop.eup %4014  ;;  %v3209_v18 = vmul.f32 0.5, %v4013_v40  ;;  %v8639_v11 = vld [vmem:[#allocation130_spill] sm:$0xff]  ;;  %v1585_v0 = vadd.f32 %v8640_v51, %v929_v63  ;;  %v8642_v9 = vld [vmem:[#allocation140_spill] sm:$0xff]  ;;  %v8645_v63 = vld [vmem:[#allocation149_spill] sm:$0xff] }
 0x213   : > { %4028 = vtanh.f32 %v3019_v2  ;;  %v1586_v20 = vadd.f32 %v8639_v11, %v1120_v54  ;;  %v4017_v38 = vpop.eup %4016  ;;  %v2950_v15 = vmul.f32 0.5, %v4015_v32  ;;  %v2004_v53 = vadd.f32 %v8641_v44, %v1584_v46  ;;  %v8647_v32 = vld [vmem:[#allocation196_spill] sm:$0xff] }
 0x214   : > { %4030 = vtanh.f32 %v3369_v7  ;;  %3497 = vst [vmem:[%s7081_s20 + $0x28] sm:$0xff] %v3369_v7  ;;  %v1587_v2 = vadd.f32 %v8642_v9, %v1122_v22  ;;  %v2644_v16 = vmul.f32 %v8531_v57, %v2482_v21  ;;  %v4019_v49 = vpop.eup %4018  ;;  %v3078_v39 = vmul.f32 0.5, %v4017_v38  ;;  %v8648_v22 = vld [vmem:[#allocation246_spill] sm:$0xff]  ;;  %v8650_v9 = vld [vmem:[#allocation151_spill] sm:$0xff] }
 0x215   : > { %v2006_v36 = vadd.f32 %v8643_v34, %v1586_v20  ;;  %v2005_v40 = vadd.f32 %v8644_v59, %v1585_v0  ;;  %v2645_v7 = vmul.f32 %v8532_v8, %v2482_v21  ;;  %v4021_v1 = vpop.eup %4020  ;;  %v2982_v54 = vadd.f32 0.5, %v2950_v15  ;;  %v2502_v0 = vpop.permute.xlu0 %2501 }
 0x216   : > { %4032 = vtanh.f32 %v3147_v24  ;;  %v7191_v11 = vadd.f32 %v8645_v63, %v2004_v53  ;;  %v2007_v46 = vadd.f32 %v8647_v32, %v1587_v2  ;;  %v3110_v51 = vadd.f32 0.5, %v3078_v39  ;;  %v8656_v32 = vld [vmem:[#allocation50_spill] sm:$0xff] }
 0x217   : > { %v7195_v44 = vadd.f32 %v8648_v22, %v2006_v36  ;;  %v7198_v38 = vadd.f32 %v8650_v9, %v2005_v40  ;;  %v2646_v20 = vmul.f32 %v8533_v12, %v2482_v21  ;;  %v3241_v34 = vadd.f32 0.5, %v3209_v18  ;;  %v8655_v36 = vld [vmem:[#allocation244_spill] sm:$0xff]  ;;  %v8657_v22 = vld [vmem:[#allocation245_spill] sm:$0xff] }
 0x218   : > { %8646 = vst [vmem:[#allocation82_spill] sm:$0xff] %v7191_v11  ;;  %v3334_v59 = vmul.f32 %v4021_v1, %v2982_v54  ;;  %v7202_v15 = vadd.f32 %v8652_v6, %v2007_v46  ;;  %v2647_v24 = vmul.f32 %v8537_v37, %v2482_v21  ;;  %v8654_v2 = vunpack.c.l.bf16 %v7045_v42  ;;  %v8658_v1 = vld [vmem:[#allocation52_spill] sm:$0xff] }
 0x219   : > { %8649 = vst [vmem:[#allocation106_spill] sm:$0xff] %v7195_v44  ;;  %8651 = vst [vmem:[#allocation107_spill] sm:$0xff] %v7198_v38  ;;  %v2772_v63 = vadd.f32 %v2644_v16, %v8655_v36  ;;  %v2773_v40 = vadd.f32 %v2645_v7, %v8656_v32  ;;  %v2774_v9 = vadd.f32 %v2646_v20, %v8657_v22  ;;  %v3206_v18 = vmul.f32 0.5, %v4019_v49  ;;  %v8660_v36 = vld [vmem:[#allocation117_spill] sm:$0xff]  ;;  %v7221_v32 = vpop.f32.mrb[60].mxu1 }
 0x21a   : > { %8653 = vst [vmem:[#allocation108_spill] sm:$0xff] %v7202_v15  ;;  %v4023_v53 = vpop.eup %4022  ;;  %v3302_v39 = vmul.f32 %v8654_v2, %v3110_v51  ;;  %v2775_v6 = vadd.f32 %v2647_v24, %v8658_v1  ;;  %v2664_v54 = vmul.f32 %v8531_v57, %v2502_v0  ;;  %v2665_v7 = vmul.f32 %v8532_v8, %v2502_v0 }
 0x21b   : > { %v4025_v44 = vpop.eup %4024  ;;  %v3429_v38 = vmul.f32 %v4023_v53, %v3237_v61  ;;  %v2888_v15 = vmul.f32 0.5, %v2772_v63  ;;  %v3016_v42 = vmul.f32 0.5, %v2773_v40  ;;  %v3144_v11 = vmul.f32 0.5, %v2774_v9  ;;  %v8659_v53 = vld [vmem:[#allocation65_spill] sm:$0xff]  ;;  %v7219_v63 = vpop.f32.mrb[60].mxu0  ;;  %v8661_v9 = vld [vmem:[#allocation66_spill] sm:$0xff] }
 0x21c   : > { %v4027_v21 = vpop.eup %4026  ;;  %v3366_v46 = vadd.f32 %v3334_v59, %v3302_v39  ;;  %4034 = vtanh.f32 %v2775_v6  ;;  %v2666_v20 = vmul.f32 %v8533_v12, %v2502_v0  ;;  %v2667_v24 = vmul.f32 %v8537_v37, %v2502_v0  ;;  %v7225_v6 = vpop.f32.mrb[61].mxu0 }
 0x21d   : > { %v4029_v51 = vpop.eup %4028  ;;  %3461 = vst [vmem:[%s7138_s22 + $0x8] sm:$0xff] %v3429_v38  ;;  %v2955_v16 = vmul.f32 0.5, %v4027_v21  ;;  %v2792_v59 = vadd.f32 %v2664_v54, %v8659_v53  ;;  %v2793_v38 = vadd.f32 %v2665_v7, %v8660_v36  ;;  %v3774_v22 = vunpack.c.l.bf16 %v7096_v4  ;;  %v7227_v0 = vpop.f32.mrb[61].mxu1 }
 0x21e   : > { %v4031_v61 = vpop.eup %4030  ;;  %4036 = vtanh.f32 %v3366_v46  ;;  %3494 = vst [vmem:[%s7081_s20 + $0x10] sm:$0xff] %v3366_v46  ;;  %v3083_v49 = vmul.f32 0.5, %v4029_v51  ;;  %v2794_v1 = vadd.f32 %v2666_v20, %v8661_v9  ;;  %8662 = vst [vmem:[#allocation112_spill] sm:$0xff] %v7227_v0  ;;  %v8663_v46 = vunpack.c.h.bf16 %v7155_v56 }
 0x21f   : > { %v3433_v2 = vmul.f32 %v4031_v61, %v3241_v34  ;;  %v2987_v39 = vadd.f32 0.5, %v2955_v16  ;;  %4038 = vtanh.f32 %v2888_v15  ;;  %v3238_v34 = vadd.f32 0.5, %v3206_v18  ;;  %v8664_v16 = vld [vmem:[#allocation119_spill] sm:$0xff] }
 0x220   : > { %v3115_v40 = vadd.f32 0.5, %v3083_v49  ;;  %4040 = vtanh.f32 %v3016_v42  ;;  %v4033_v54 = vpop.eup %4032  ;;  %v2893_v21 = vmul.f32 0.5, %v2792_v59  ;;  %v2795_v7 = vadd.f32 %v2667_v24, %v8664_v16  ;;  %v8665_v59 = vld [vmem:[#allocation126_spill] sm:$0xff] }
 0x221   : > { %3465 = vst [vmem:[%s7138_s22 + $0x28] sm:$0xff] %v3433_v2  ;;  %v3339_v15 = vmul.f32 %v4025_v44, %v2987_v39  ;;  %4042 = vtanh.f32 %v3144_v11  ;;  %v3021_v61 = vmul.f32 0.5, %v2793_v38  ;;  %v3149_v42 = vmul.f32 0.5, %v2794_v1  ;;  %v2490_v11 = vpop.permute.xlu1 %2489  ;;  %v8666_v39 = vld [vmem:[#allocation127_spill] sm:$0xff] }
 0x222   : > { %v3307_v51 = vmul.f32 %v8663_v46, %v3115_v40  ;;  %4044 = vtanh.f32 %v2893_v21  ;;  %v931_v20 = vadd.f32 %v6727_v41, %v4934_v50  ;;  %v1124_v49 = vadd.f32 %v6735_v30, %v4936_v31  ;;  %v8667_v41 = vld [vmem:[#allocation128_spill] sm:$0xff]  ;;  %v8671_v46 = vld [vmem:[#allocation198_spill] sm:$0xff] }
 0x223   : > { %v933_v44 = vadd.f32 %v6737_v55, %v4938_v17  ;;  %v3211_v18 = vmul.f32 0.5, %v4033_v54  ;;  %4046 = vtanh.f32 %v3021_v61  ;;  %v1126_v24 = vadd.f32 %v6747_v10, %v8231_v62  ;;  %v8668_v30 = vld [vmem:[#allocation132_spill] sm:$0xff]  ;;  %v8669_v54 = vld [vmem:[#allocation197_spill] sm:$0xff]  ;;  %v7252_v61 = vld [vmem:[%s5820_s21 + $0x20] sm:$0xff]  }
 0x224   : > { %v3371_v53 = vadd.f32 %v3339_v15, %v3307_v51  ;;  %4048 = vtanh.f32 %v3149_v42  ;;  %v1588_v2 = vadd.f32 %v8665_v59, %v931_v20  ;;  %v1590_v36 = vadd.f32 %v8666_v39, %v1124_v49  ;;  %v8670_v15 = vld [vmem:[#allocation199_spill] sm:$0xff]  ;;  %v8672_v42 = vld [vmem:[#allocation200_spill] sm:$0xff] }
 0x225   : > { %v1589_v38 = vadd.f32 %v8667_v41, %v933_v44  ;;  %v1591_v40 = vadd.f32 %v8668_v30, %v1126_v24  ;;  %v2652_v55 = vmul.f32 %v8531_v57, %v2490_v11  ;;  %v2653_v9 = vmul.f32 %v8532_v8, %v2490_v11 }
 0x226   : > { %4050 = vtanh.f32 %v3371_v53  ;;  %3499 = vst [vmem:[%s7081_s20 + $0x38] sm:$0xff] %v3371_v53  ;;  %v4035_v1 = vpop.eup %4034  ;;  %v2008_v10 = vadd.f32 %v8669_v54, %v1588_v2  ;;  %v2010_v21 = vadd.f32 %v8670_v15, %v1590_v36  ;;  %v2654_v49 = vmul.f32 %v8533_v12, %v2490_v11  ;;  %v8673_v53 = vld [vmem:[#allocation101_spill] sm:$0xff]  ;;  %v8675_v54 = vld [vmem:[#allocation103_spill] sm:$0xff]  ;;  %v2510_v15 = vpop.permute.xlu0 %2509 }
 0x227   : > { %4052 = vtanh.f32 %v2795_v7  ;;  %v2009_v51 = vadd.f32 %v8671_v46, %v1589_v38  ;;  %v2011_v20 = vadd.f32 %v8672_v42, %v1591_v40  ;;  %v2655_v44 = vmul.f32 %v8537_v37, %v2490_v11  ;;  %v8674_v40 = vld [vmem:[#allocation59_spill] sm:$0xff] }
 0x228   : > { %v4037_v16 = vpop.eup %4036  ;;  %v2780_v24 = vadd.f32 %v2652_v55, %v8673_v53  ;;  %v7259_v2 = vadd.f32 %v6771_v5, %v2008_v10  ;;  %v7262_v39 = vadd.f32 %v6777_v35, %v2010_v21  ;;  %v2781_v11 = vadd.f32 %v2653_v9, %v8674_v40  ;;  %v7282_v40 = vld [vmem:[%s5820_s21 + $0x28] sm:$0xff]  }
 0x229   : > { %v4039_v59 = vpop.eup %4038  ;;  %v3430_v7 = vmul.f32 %v4037_v16, %v3238_v34  ;;  %v7265_v36 = vadd.f32 %v6774_v28, %v2009_v51  ;;  %v7268_v30 = vadd.f32 %v6780_v43, %v2011_v20  ;;  %v2782_v55 = vadd.f32 %v2654_v49, %v8675_v54  ;;  %v8676_v28 = vld [vmem:[#allocation60_spill] sm:$0xff] }
 0x22a   : > { %v4041_v41 = vpop.eup %4040  ;;  %v2952_v38 = vmul.f32 0.5, %v4039_v59  ;;  %v3243_v5 = vadd.f32 0.5, %v3211_v18  ;;  %v3783_v35 = vunpack.c.h.bf16 %v7252_v61  ;;  %v2890_v21 = vmul.f32 0.5, %v2780_v24 }
 0x22b   : > { %v4043_v34 = vpop.eup %4042  ;;  %3462 = vst [vmem:[%s7138_s22 + $0x10] sm:$0xff] %v3430_v7  ;;  %v3080_v10 = vmul.f32 0.5, %v4041_v41  ;;  %v2783_v51 = vadd.f32 %v2655_v44, %v8676_v28  ;;  %v3018_v16 = vmul.f32 0.5, %v2781_v11  ;;  %v3146_v42 = vmul.f32 0.5, %v2782_v55  ;;  %v7277_v41 = vpop.f32.mrb[62].mxu0 }
 0x22c   : > { %v2984_v46 = vadd.f32 0.5, %v2952_v38  ;;  %v4045_v43 = vpop.eup %4044  ;;  %v3208_v53 = vmul.f32 0.5, %v4043_v34  ;;  %4054 = vtanh.f32 %v2890_v21  ;;  %v2672_v9 = vmul.f32 %v8531_v57, %v2510_v15  ;;  %8677 = vst [vmem:[#allocation173_spill] sm:$0xff] %v7277_v41 }
 0x22d   : > { %v3112_v20 = vadd.f32 0.5, %v3080_v10  ;;  %v4047_v49 = vpop.eup %4046  ;;  %v2957_v7 = vmul.f32 0.5, %v4045_v43  ;;  %4056 = vtanh.f32 %v3018_v16  ;;  %v2673_v18 = vmul.f32 %v8532_v8, %v2510_v15  ;;  %v8679_v43 = vld [vmem:[#allocation134_spill] sm:$0xff] }
 0x22e   : > { %v3336_v59 = vmul.f32 %v4035_v1, %v2984_v46  ;;  %v4049_v24 = vpop.eup %4048  ;;  %v3085_v38 = vmul.f32 0.5, %v4047_v49  ;;  %4058 = vtanh.f32 %v3146_v42  ;;  %v2674_v11 = vmul.f32 %v8533_v12, %v2510_v15  ;;  %v8680_v49 = vld [vmem:[#allocation12_spill] sm:$0xff] }
 0x22f   : > { %v3304_v44 = vmul.f32 %v3774_v22, %v3112_v20  ;;  %v2989_v55 = vadd.f32 0.5, %v2957_v7  ;;  %4060 = vtanh.f32 %v2783_v51  ;;  %v2675_v34 = vmul.f32 %v8537_v37, %v2510_v15  ;;  %v8678_v22 = vld [vmem:[#allocation74_spill] sm:$0xff]  ;;  %v8681_v15 = vld [vmem:[#allocation75_spill] sm:$0xff] }
 0x230   : > { %v4051_v54 = vpop.eup %4050  ;;  %v3117_v4 = vadd.f32 0.5, %v3085_v38  ;;  %v2800_v28 = vadd.f32 %v2672_v9, %v8678_v22  ;;  %v3787_v42 = vunpack.c.h.bf16 %v7282_v40  ;;  %v2801_v20 = vadd.f32 %v2673_v18, %v8679_v43  ;;  %v8686_v22 = vld [vmem:[#allocation207_spill] sm:$0xff] }
 0x231   : > { %v4053_v10 = vpop.eup %4052  ;;  %v3435_v21 = vmul.f32 %v4051_v54, %v3243_v5  ;;  %v3368_v46 = vadd.f32 %v3336_v59, %v3304_v44  ;;  %v2802_v41 = vadd.f32 %v2674_v11, %v8680_v49  ;;  %v3240_v7 = vadd.f32 0.5, %v3208_v53  ;;  %v8682_v11 = vld [vmem:[#allocation11_spill] sm:$0xff]  ;;  %v8688_v49 = vld [vmem:[#allocation208_spill] sm:$0xff] }
 0x232   : > { %v3341_v16 = vmul.f32 %v4053_v10, %v2989_v55  ;;  %v3309_v51 = vmul.f32 %v3783_v35, %v3117_v4  ;;  %v2895_v1 = vmul.f32 0.5, %v2800_v28  ;;  %v2803_v0 = vadd.f32 %v2675_v34, %v8681_v15  ;;  %v2498_v35 = vpop.permute.xlu1 %2497  ;;  %v8683_v55 = vld [vmem:[#allocation25_spill] sm:$0xff] }
 0x233   : > { %3467 = vst [vmem:[%s7138_s22 + $0x38] sm:$0xff] %v3435_v21  ;;  %4062 = vtanh.f32 %v3368_v46  ;;  %3496 = vst [vmem:[%s7081_s20 + $0x20] sm:$0xff] %v3368_v46  ;;  %v3023_v5 = vmul.f32 0.5, %v2801_v20  ;;  %v937_v9 = vadd.f32 %v6784_v23, %v4934_v50  ;;  %v1130_v59 = vadd.f32 %v6797_v25, %v4936_v31  ;;  %v8684_v25 = vld [vmem:[#allocation143_spill] sm:$0xff] }
 0x234   : > { %v3373_v44 = vadd.f32 %v3341_v16, %v3309_v51  ;;  %4064 = vtanh.f32 %v2895_v1  ;;  %v939_v18 = vadd.f32 %v6799_v14, %v4938_v17  ;;  %v1132_v53 = vadd.f32 %v6811_v52, %v8231_v62  ;;  %v8685_v1 = vld [vmem:[#allocation152_spill] sm:$0xff]  ;;  %v8687_v52 = vld [vmem:[#allocation209_spill] sm:$0xff] }
 0x235   : > { %4066 = vtanh.f32 %v3023_v5  ;;  %v3151_v38 = vmul.f32 0.5, %v2802_v41  ;;  %v1592_v54 = vadd.f32 %v8682_v11, %v937_v9  ;;  %v1594_v34 = vadd.f32 %v8683_v55, %v1130_v59  ;;  %v8690_v59 = vld [vmem:[#allocation64_spill] sm:$0xff] }
 0x236   : > { %v4055_v10 = vpop.eup %4054  ;;  %v3213_v23 = vmul.f32 0.5, %v4049_v24  ;;  %4068 = vtanh.f32 %v3373_v44  ;;  %3501 = vst [vmem:[%s7081_s20 + $0x48] sm:$0xff] %v3373_v44  ;;  %v1593_v21 = vadd.f32 %v8684_v25, %v939_v18  ;;  %v1595_v46 = vadd.f32 %v8685_v1, %v1132_v53  ;;  %v8689_v24 = vld [vmem:[#allocation210_spill] sm:$0xff]  ;;  %v2518_v25 = vpop.permute.xlu0 %2517 }
 0x237   : > { %v4057_v4 = vpop.eup %4056  ;;  %v2954_v14 = vmul.f32 0.5, %v4055_v10  ;;  %v2012_v28 = vadd.f32 %v8686_v22, %v1592_v54  ;;  %v2014_v16 = vadd.f32 %v8687_v52, %v1594_v34  ;;  %v2660_v41 = vmul.f32 %v8531_v57, %v2498_v35  ;;  %v8692_v18 = vld [vmem:[#allocation86_spill] sm:$0xff]  ;;  %v8696_v34 = vld [vmem:[#allocation88_spill] sm:$0xff]  ;;  %v8699_v52 = vld [vmem:[#allocation189_spill] sm:$0xff] }
 0x238   : > { %v4059_v43 = vpop.eup %4058  ;;  %v3082_v20 = vmul.f32 0.5, %v4057_v4  ;;  %4070 = vtanh.f32 %v2803_v0  ;;  %v2013_v51 = vadd.f32 %v8688_v49, %v1593_v21  ;;  %v2015_v15 = vadd.f32 %v8689_v24, %v1595_v46  ;;  %v8694_v54 = vld [vmem:[#allocation62_spill] sm:$0xff]  ;;  %v8701_v24 = vld [vmem:[#allocation191_spill] sm:$0xff] }
 0x239   : > { %v4061_v5 = vpop.eup %4060  ;;  %v2986_v9 = vadd.f32 0.5, %v2954_v14  ;;  %4072 = vtanh.f32 %v3151_v38  ;;  %v7313_v44 = vadd.f32 %v8690_v59, %v2012_v28  ;;  %v7316_v53 = vadd.f32 %v8692_v18, %v2014_v16  ;;  %v8702_v59 = vld [vmem:[#allocation192_spill] sm:$0xff] }
 0x23a   : > { %v3114_v11 = vadd.f32 0.5, %v3082_v20  ;;  %v7319_v55 = vadd.f32 %v8694_v54, %v2013_v51  ;;  %v7322_v10 = vadd.f32 %v8696_v34, %v2015_v15  ;;  %v2661_v0 = vmul.f32 %v8532_v8, %v2498_v35  ;;  %v8700_v20 = vld [vmem:[#allocation190_spill] sm:$0xff] }
 0x23b   : > { %8691 = vst [vmem:[#allocation175_spill] sm:$0xff] %v7313_v44  ;;  %8693 = vst [vmem:[#allocation174_spill] sm:$0xff] %v7316_v53  ;;  %v3245_v21 = vadd.f32 0.5, %v3213_v23  ;;  %v3338_v1 = vmul.f32 %v4061_v5, %v2986_v9  ;;  %v2662_v38 = vmul.f32 %v8533_v12, %v2498_v35  ;;  %v2663_v46 = vmul.f32 %v8537_v37, %v2498_v35 }
 0x23c   : > { %8695 = vst [vmem:[#allocation176_spill] sm:$0xff] %v7319_v55  ;;  %8697 = vst [vmem:[#allocation179_spill] sm:$0xff] %v7322_v10  ;;  %v3210_v14 = vmul.f32 0.5, %v4059_v43  ;;  %v8698_v22 = vunpack.c.l.bf16 %v7155_v56  ;;  %v2788_v16 = vadd.f32 %v2660_v41, %v8699_v52  ;;  %v2789_v49 = vadd.f32 %v2661_v0, %v8700_v20  ;;  %v8732_v55 = vld [vmem:[#allocation92_spill] sm:$0xff] }
 0x23d   : > { %v4063_v4 = vpop.eup %4062  ;;  %v2790_v15 = vadd.f32 %v2662_v38, %v8701_v24  ;;  %v2791_v23 = vadd.f32 %v2663_v46, %v8702_v59  ;;  %v2680_v5 = vmul.f32 %v8531_v57, %v2518_v25  ;;  %v2681_v43 = vmul.f32 %v8532_v8, %v2518_v25  ;;  %v8703_v46 = vld [vmem:[#allocation78_spill] sm:$0xff] }
 0x23e   : > { %v3306_v28 = vmul.f32 %v8698_v22, %v3114_v11  ;;  %v3432_v51 = vmul.f32 %v4063_v4, %v3240_v7  ;;  %v4065_v9 = vpop.eup %4064  ;;  %v2892_v18 = vmul.f32 0.5, %v2788_v16  ;;  %v3020_v54 = vmul.f32 0.5, %v2789_v49 }
 0x23f   : > { %v4067_v56 = vpop.eup %4066  ;;  %v2959_v11 = vmul.f32 0.5, %v4065_v9  ;;  %v3148_v41 = vmul.f32 0.5, %v2790_v15  ;;  %4074 = vtanh.f32 %v2791_v23  ;;  %v2682_v7 = vmul.f32 %v8533_v12, %v2518_v25 }
 0x240   : > { %v3370_v35 = vadd.f32 %v3338_v1, %v3306_v28  ;;  %3464 = vst [vmem:[%s7138_s22 + $0x20] sm:$0xff] %v3432_v51  ;;  %v4069_v34 = vpop.eup %4068  ;;  %v3087_v0 = vmul.f32 0.5, %v4067_v56  ;;  %v2683_v38 = vmul.f32 %v8537_v37, %v2518_v25  ;;  %v2808_v1 = vadd.f32 %v2680_v5, %v8703_v46  ;;  %v8704_v28 = vld [vmem:[#allocation80_spill] sm:$0xff]  ;;  %v8705_v51 = vld [vmem:[#allocation79_spill] sm:$0xff]  ;;  %v8708_v56 = vld [vmem:[#allocation98_spill] sm:$0xff] }
 0x241   : > { %v3437_v4 = vmul.f32 %v4069_v34, %v3245_v21  ;;  %v2991_v22 = vadd.f32 0.5, %v2959_v11  ;;  %v2809_v52 = vadd.f32 %v2681_v43, %v8704_v28  ;;  %v2810_v24 = vadd.f32 %v2682_v7, %v8705_v51  ;;  %v8706_v5 = vld [vmem:[#allocation84_spill] sm:$0xff]  ;;  %v8707_v43 = vld [vmem:[#allocation97_spill] sm:$0xff]  ;;  %v8713_v28 = vld [vmem:[#allocation142_spill] sm:$0xff] }
 0x242   : > { %4076 = vtanh.f32 %v3370_v35  ;;  %3498 = vst [vmem:[%s7081_s20 + $0x30] sm:$0xff] %v3370_v35  ;;  %v4071_v16 = vpop.eup %4070  ;;  %v3119_v20 = vadd.f32 0.5, %v3087_v0  ;;  %v3242_v59 = vadd.f32 0.5, %v3210_v14  ;;  %v2897_v25 = vmul.f32 0.5, %v2808_v1  ;;  %v8709_v14 = vld [vmem:[#allocation18_spill] sm:$0xff]  ;;  %v8711_v46 = vld [vmem:[#allocation24_spill] sm:$0xff] }
 0x243   : > { %4078 = vtanh.f32 %v2892_v18  ;;  %v4073_v15 = vpop.eup %4072  ;;  %3469 = vst [vmem:[%s7138_s22 + $0x48] sm:$0xff] %v3437_v4  ;;  %v3343_v23 = vmul.f32 %v4071_v16, %v2991_v22  ;;  %v2811_v9 = vadd.f32 %v2683_v38, %v8706_v5  ;;  %v3025_v35 = vmul.f32 0.5, %v2809_v52  ;;  %v8712_v4 = vld [vmem:[#allocation141_spill] sm:$0xff]  ;;  %v8714_v16 = vld [vmem:[#allocation144_spill] sm:$0xff] }
 0x244   : > { %4080 = vtanh.f32 %v3020_v54  ;;  %v3311_v21 = vmul.f32 %v3787_v42, %v3119_v20  ;;  %v3153_v18 = vmul.f32 0.5, %v2810_v24  ;;  %v941_v54 = vadd.f32 %v8707_v43, %v4934_v50  ;;  %v8710_v42 = vld [vmem:[#allocation164_spill] sm:$0xff] }
 0x245   : > { %4082 = vtanh.f32 %v3148_v41  ;;  %v1134_v11 = vadd.f32 %v8708_v56, %v4936_v31  ;;  %v943_v7 = vadd.f32 %v8709_v14, %v4938_v17  ;;  %v2506_v41 = vpop.permute.xlu1 %2505  ;;  %v3215_v34 = vmul.f32 0.5, %v4073_v15  ;;  %v8718_v56 = vld [vmem:[#allocation214_spill] sm:$0xff] }
 0x246   : > { %4084 = vtanh.f32 %v2897_v25  ;;  %v3375_v0 = vadd.f32 %v3343_v23, %v3311_v21  ;;  %v1136_v38 = vadd.f32 %v8710_v42, %v8231_v62  ;;  %v1596_v1 = vadd.f32 %v8711_v46, %v941_v54  ;;  %v8715_v23 = vld [vmem:[#allocation211_spill] sm:$0xff]  ;;  %v8716_v21 = vld [vmem:[#allocation213_spill] sm:$0xff] }
 0x247   : > { %4086 = vtanh.f32 %v3025_v35  ;;  %v1598_v22 = vadd.f32 %v8712_v4, %v1134_v11  ;;  %v1597_v52 = vadd.f32 %v8713_v28, %v943_v7  ;;  %v2668_v51 = vmul.f32 %v8531_v57, %v2506_v41  ;;  %v8717_v35 = vld [vmem:[#allocation212_spill] sm:$0xff]  ;;  %v7366_v54 = vld [vmem:[%s5820_s21 + $0x30] sm:$0xff]  }
 0x248   : > { %4088 = vtanh.f32 %v3153_v18  ;;  %3503 = vst [vmem:[%s7081_s20 + $0x58] sm:$0xff] %v3375_v0  ;;  %v1599_v20 = vadd.f32 %v8714_v16, %v1136_v38  ;;  %v2669_v24 = vmul.f32 %v8532_v8, %v2506_v41  ;;  %v2016_v25 = vadd.f32 %v8715_v23, %v1596_v1  ;;  %v8720_v46 = vld [vmem:[#allocation161_spill] sm:$0xff]  ;;  %v8721_v4 = vld [vmem:[#allocation120_spill] sm:$0xff] }
 0x249   : > { %4090 = vtanh.f32 %v3375_v0  ;;  %v4075_v15 = vpop.eup %4074  ;;  %v2018_v5 = vadd.f32 %v8716_v21, %v1598_v22  ;;  %v2017_v18 = vadd.f32 %v8717_v35, %v1597_v52  ;;  %v2670_v14 = vmul.f32 %v8533_v12, %v2506_v41  ;;  %v8719_v0 = vld [vmem:[#allocation201_spill] sm:$0xff]  ;;  %v8722_v28 = vld [vmem:[#allocation68_spill] sm:$0xff]  ;;  %v8724_v35 = vld [vmem:[#allocation202_spill] sm:$0xff] }
 0x24a   : > { %4092 = vtanh.f32 %v2811_v9  ;;  %v2019_v11 = vadd.f32 %v8718_v56, %v1599_v20  ;;  %v2671_v7 = vmul.f32 %v8537_v37, %v2506_v41  ;;  %v2796_v42 = vadd.f32 %v2668_v51, %v8719_v0  ;;  %v8723_v23 = vld [vmem:[#allocation193_spill] sm:$0xff]  ;;  %v8725_v56 = vld [vmem:[#allocation194_spill] sm:$0xff]  ;;  %v2526_v0 = vpop.permute.xlu0 %2525 }
 0x24b   : > { %v7373_v1 = vadd.f32 %v8720_v46, %v2016_v25  ;;  %v7376_v22 = vadd.f32 %v8721_v4, %v2018_v5  ;;  %v7379_v52 = vadd.f32 %v8722_v28, %v2017_v18  ;;  %v2797_v41 = vadd.f32 %v2669_v24, %v8724_v35  ;;  %v8726_v18 = vld [vmem:[#allocation73_spill] sm:$0xff] }
 0x24c   : > { %v4077_v43 = vpop.eup %4076  ;;  %v7382_v21 = vadd.f32 %v8723_v23, %v2019_v11  ;;  %v2798_v51 = vadd.f32 %v2670_v14, %v8725_v56  ;;  %v3247_v25 = vadd.f32 0.5, %v3215_v34  ;;  %v3791_v5 = vunpack.c.h.bf16 %v7366_v54  ;;  %v7390_v14 = vpop.f32.mrb[62].mxu1 }
 0x24d   : > { %v4079_v38 = vpop.eup %4078  ;;  %v3434_v9 = vmul.f32 %v4077_v43, %v3242_v59  ;;  %v2894_v46 = vmul.f32 0.5, %v2796_v42  ;;  %v2799_v28 = vadd.f32 %v2671_v7, %v8726_v18  ;;  %v3022_v49 = vmul.f32 0.5, %v2797_v41  ;;  %8727 = vst [vmem:[#allocation181_spill] sm:$0xff] %v7390_v14  ;;  %v7395_v7 = vpop.f32.mrb[63].mxu1 }
 0x24e   : > { %v4081_v16 = vpop.eup %4080  ;;  %v2956_v20 = vmul.f32 0.5, %v4079_v38  ;;  %v3150_v38 = vmul.f32 0.5, %v2798_v51  ;;  %v2688_v24 = vmul.f32 %v8531_v57, %v2526_v0  ;;  %v2689_v42 = vmul.f32 %v8532_v8, %v2526_v0  ;;  %8729 = vst [vmem:[#allocation188_spill] sm:$0xff] %v7395_v7  ;;  %v8733_v7 = vld [vmem:[#allocation155_spill] sm:$0xff] }
 0x24f   : > { %v4083_v59 = vpop.eup %4082  ;;  %3466 = vst [vmem:[%s7138_s22 + $0x30] sm:$0xff] %v3434_v9  ;;  %v3084_v43 = vmul.f32 0.5, %v4081_v16  ;;  %4094 = vtanh.f32 %v2894_v46  ;;  %v7392_v9 = vpop.f32.mrb[63].mxu0  ;;  %v8730_v41 = vunpack.c.l.bf16 %v7252_v61 }
 0x250   : > { %v2988_v4 = vadd.f32 0.5, %v2956_v20  ;;  %v4085_v53 = vpop.eup %4084  ;;  %v3212_v23 = vmul.f32 0.5, %v4083_v59  ;;  %8728 = vst [vmem:[#allocation180_spill] sm:$0xff] %v7392_v9  ;;  %4096 = vtanh.f32 %v3022_v49  ;;  %v7400_v59 = vld [vmem:[%s5820_s21 + $0x38] sm:$0xff]   ;;  %v2691_v49 = vmul.f32 %v8537_v37, %v2526_v0 }
 0x251   : > { %v3116_v11 = vadd.f32 0.5, %v3084_v43  ;;  %v4087_v34 = vpop.eup %4086  ;;  %v2961_v35 = vmul.f32 0.5, %v4085_v53  ;;  %4098 = vtanh.f32 %v3150_v38  ;;  %v2690_v43 = vmul.f32 %v8533_v12, %v2526_v0  ;;  %v8734_v0 = vld [vmem:[#allocation157_spill] sm:$0xff] }
 0x252   : > { %v3340_v16 = vmul.f32 %v4075_v15, %v2988_v4  ;;  %v4089_v20 = vpop.eup %4088  ;;  %v3089_v51 = vmul.f32 0.5, %v4087_v34  ;;  %4100 = vtanh.f32 %v2799_v28  ;;  %v2817_v44 = vadd.f32 %v2689_v42, %v8732_v55  ;;  %v8736_v55 = vld [vmem:[#allocation100_spill] sm:$0xff] }
 0x253   : > { %v3308_v56 = vmul.f32 %v8730_v41, %v3116_v11  ;;  %v4091_v46 = vpop.eup %4090  ;;  %v2993_v18 = vadd.f32 0.5, %v2961_v35  ;;  %v8731_v11 = vld [vmem:[#allocation118_spill] sm:$0xff]  ;;  %v2818_v9 = vadd.f32 %v2690_v43, %v8733_v7  ;;  %v3244_v35 = vadd.f32 0.5, %v3212_v23  ;;  %v8737_v23 = vld [vmem:[#allocation169_spill] sm:$0xff]  ;;  %v8738_v43 = vld [vmem:[#allocation27_spill] sm:$0xff] }
 0x254   : > { %v4093_v15 = vpop.eup %4092  ;;  %v3439_v4 = vmul.f32 %v4091_v46, %v3247_v25  ;;  %v3121_v61 = vadd.f32 0.5, %v3089_v51  ;;  %v2816_v34 = vadd.f32 %v2688_v24, %v8731_v11  ;;  %v2819_v14 = vadd.f32 %v2691_v49, %v8734_v0  ;;  %v8743_v0 = vld [vmem:[#allocation223_spill] sm:$0xff] }
 0x255   : > { %v3372_v10 = vadd.f32 %v3340_v16, %v3308_v56  ;;  %v3345_v38 = vmul.f32 %v4093_v15, %v2993_v18  ;;  %v3027_v25 = vmul.f32 0.5, %v2817_v44  ;;  %v947_v24 = vadd.f32 %v6861_v29, %v4934_v50  ;;  %v8735_v16 = vld [vmem:[#allocation96_spill] sm:$0xff]  ;;  %v8739_v44 = vld [vmem:[#allocation153_spill] sm:$0xff]  ;;  %v8740_v15 = vld [vmem:[#allocation154_spill] sm:$0xff] }
 0x256   : > { %3471 = vst [vmem:[%s7138_s22 + $0x58] sm:$0xff] %v3439_v4  ;;  %v3313_v28 = vmul.f32 %v3791_v5, %v3121_v61  ;;  %v2899_v53 = vmul.f32 0.5, %v2816_v34  ;;  %v1140_v56 = vadd.f32 %v8735_v16, %v4936_v31  ;;  %v949_v42 = vadd.f32 %v8736_v55, %v4938_v17  ;;  %v2514_v5 = vpop.permute.xlu1 %2513 }
 0x257   : > { %4102 = vtanh.f32 %v3372_v10  ;;  %3500 = vst [vmem:[%s7081_s20 + $0x40] sm:$0xff] %v3372_v10  ;;  %v1142_v10 = vadd.f32 %v8737_v23, %v8231_v62  ;;  %v3155_v7 = vmul.f32 0.5, %v2818_v9  ;;  %v1600_v46 = vadd.f32 %v8738_v43, %v947_v24 }
 0x258   : > { %v3377_v51 = vadd.f32 %v3345_v38, %v3313_v28  ;;  %4104 = vtanh.f32 %v2899_v53  ;;  %v1602_v18 = vadd.f32 %v8739_v44, %v1140_v56  ;;  %v3217_v29 = vmul.f32 0.5, %v4089_v20  ;;  %v8741_v53 = vld [vmem:[#allocation13_spill] sm:$0xff]  ;;  %v8744_v56 = vld [vmem:[#allocation222_spill] sm:$0xff]  ;;  %v8745_v20 = vld [vmem:[#allocation224_spill] sm:$0xff] }
 0x259   : > { %4106 = vtanh.f32 %v3027_v25  ;;  %v4095_v49 = vpop.eup %4094  ;;  %v1601_v4 = vadd.f32 %v8740_v15, %v949_v42  ;;  %v1603_v61 = vadd.f32 %v8741_v53, %v1142_v10  ;;  %v8742_v38 = vld [vmem:[#allocation221_spill] sm:$0xff]  ;;  %v2676_v9 = vmul.f32 %v8531_v57, %v2514_v5  ;;  %v8746_v42 = vld [vmem:[#allocation158_spill] sm:$0xff]  ;;  %v8747_v44 = vld [vmem:[#allocation63_spill] sm:$0xff] }
 0x25a   : > { %4108 = vtanh.f32 %v3377_v51  ;;  %3505 = vst [vmem:[%s7081_s20 + $0x68] sm:$0xff] %v3377_v51  ;;  %v4097_v11 = vpop.eup %4096  ;;  %v2958_v34 = vmul.f32 0.5, %v4095_v49  ;;  %v2020_v28 = vadd.f32 %v8742_v38, %v1600_v46  ;;  %v2022_v16 = vadd.f32 %v8743_v0, %v1602_v18  ;;  %v8748_v18 = vld [vmem:[#allocation160_spill] sm:$0xff]  ;;  %v8749_v53 = vld [vmem:[#allocation159_spill] sm:$0xff] }
 0x25b   : > { %v4099_v25 = vpop.eup %4098  ;;  %v3086_v24 = vmul.f32 0.5, %v4097_v11  ;;  %4110 = vtanh.f32 %v2819_v14  ;;  %v2021_v55 = vadd.f32 %v8744_v56, %v1601_v4  ;;  %v2023_v23 = vadd.f32 %v8745_v20, %v1603_v61  ;;  %v2534_v4 = vpop.permute.xlu0 %2533  ;;  %v8752_v56 = vld [vmem:[#allocation14_spill] sm:$0xff]  ;;  %v8753_v20 = vld [vmem:[#allocation83_spill] sm:$0xff] }
 0x25c   : > { %v4101_v51 = vpop.eup %4100  ;;  %v2990_v43 = vadd.f32 0.5, %v2958_v34  ;;  %4112 = vtanh.f32 %v3155_v7  ;;  %v7431_v10 = vadd.f32 %v8746_v42, %v2020_v28  ;;  %v7434_v49 = vadd.f32 %v8747_v44, %v2022_v16  ;;  %v8754_v44 = vld [vmem:[#allocation146_spill] sm:$0xff] }
 0x25d   : > { %v3118_v46 = vadd.f32 0.5, %v3086_v24  ;;  %v7437_v15 = vadd.f32 %v8748_v18, %v2021_v55  ;;  %v7440_v11 = vadd.f32 %v8749_v53, %v2023_v23  ;;  %v2677_v14 = vmul.f32 %v8532_v8, %v2514_v5  ;;  %v8755_v53 = vld [vmem:[#allocation85_spill] sm:$0xff] }
 0x25e   : > { %v3249_v61 = vadd.f32 0.5, %v3217_v29  ;;  %v3342_v38 = vmul.f32 %v4101_v51, %v2990_v43  ;;  %v2678_v7 = vmul.f32 %v8533_v12, %v2514_v5  ;;  %v2679_v34 = vmul.f32 %v8537_v37, %v2514_v5 }
 0x25f   : > { %8750 = vst [vmem:[#allocation121_spill] sm:$0xff] %v7440_v11  ;;  %v3214_v0 = vmul.f32 0.5, %v4099_v25  ;;  %v8751_v16 = vunpack.c.l.bf16 %v7282_v40  ;;  %v2804_v55 = vadd.f32 %v2676_v9, %v8752_v56  ;;  %v2805_v23 = vadd.f32 %v2677_v14, %v8753_v20  ;;  %v8757_v56 = vld [vmem:[#allocation252_spill] sm:$0xff] }
 0x260   : > { %v2806_v18 = vadd.f32 %v2678_v7, %v8754_v44  ;;  %v2807_v29 = vadd.f32 %v2679_v34, %v8755_v53  ;;  %v2696_v51 = vmul.f32 %v8531_v57, %v2534_v4  ;;  %v2697_v25 = vmul.f32 %v8532_v8, %v2534_v4  ;;  %v8758_v44 = vld [vmem:[#allocation167_spill] sm:$0xff] }
 0x261   : > { %v4103_v28 = vpop.eup %4102  ;;  %v3310_v24 = vmul.f32 %v8751_v16, %v3118_v46  ;;  %v2896_v41 = vmul.f32 0.5, %v2804_v55  ;;  %v3024_v11 = vmul.f32 0.5, %v2805_v23  ;;  %v2699_v34 = vmul.f32 %v8537_v37, %v2534_v4 }
 0x262   : > { %v3436_v42 = vmul.f32 %v4103_v28, %v3244_v35  ;;  %v4105_v43 = vpop.eup %4104  ;;  %v3152_v9 = vmul.f32 0.5, %v2806_v18  ;;  %4114 = vtanh.f32 %v2807_v29  ;;  %v2698_v35 = vmul.f32 %v8533_v12, %v2534_v4  ;;  %v8756_v28 = vld [vmem:[#allocation168_spill] sm:$0xff] }
 0x263   : > { %v3374_v5 = vadd.f32 %v3342_v38, %v3310_v24  ;;  %v4107_v40 = vpop.eup %4106  ;;  %v2963_v46 = vmul.f32 0.5, %v4105_v43  ;;  %v2824_v38 = vadd.f32 %v2696_v51, %v8756_v28  ;;  %v2825_v55 = vadd.f32 %v2697_v25, %v8757_v56 }
 0x264   : > { %3468 = vst [vmem:[%s7138_s22 + $0x40] sm:$0xff] %v3436_v42  ;;  %v4109_v14 = vpop.eup %4108  ;;  %v3091_v7 = vmul.f32 0.5, %v4107_v40  ;;  %v3790_v42 = vunpack.c.l.bf16 %v7366_v54  ;;  %v2826_v18 = vadd.f32 %v2698_v35, %v8758_v44  ;;  %v3246_v29 = vadd.f32 0.5, %v3214_v0  ;;  %v8766_v44 = vld [vmem:[#allocation228_spill] sm:$0xff] }
 0x265   : > { %4116 = vtanh.f32 %v3374_v5  ;;  %3502 = vst [vmem:[%s7081_s20 + $0x50] sm:$0xff] %v3374_v5  ;;  %v3441_v16 = vmul.f32 %v4109_v14, %v3249_v61  ;;  %v2995_v24 = vadd.f32 0.5, %v2963_v46  ;;  %v4111_v20 = vpop.eup %4110  ;;  %v2901_v4 = vmul.f32 0.5, %v2824_v38  ;;  %v8760_v5 = vld [vmem:[#allocation138_spill] sm:$0xff] }
 0x266   : > { %4118 = vtanh.f32 %v2896_v41  ;;  %v3123_v23 = vadd.f32 0.5, %v3091_v7  ;;  %v4113_v53 = vpop.eup %4112  ;;  %v8759_v51 = vunpack.c.h.bf16 %v7400_v59  ;;  %v2827_v41 = vadd.f32 %v2699_v34, %v8760_v5  ;;  %v8761_v34 = vld [vmem:[#allocation15_spill] sm:$0xff]  ;;  %v8762_v38 = vld [vmem:[#allocation26_spill] sm:$0xff] }
 0x267   : > { %4120 = vtanh.f32 %v3024_v11  ;;  %3473 = vst [vmem:[%s7138_s22 + $0x68] sm:$0xff] %v3441_v16  ;;  %v3347_v43 = vmul.f32 %v4111_v20, %v2995_v24  ;;  %v3029_v40 = vmul.f32 0.5, %v2825_v55  ;;  %v3157_v25 = vmul.f32 0.5, %v2826_v18 }
 0x268   : > { %4122 = vtanh.f32 %v3152_v9  ;;  %v3315_v61 = vmul.f32 %v8759_v51, %v3123_v23  ;;  %v951_v11 = vadd.f32 %v6978_v26, %v4934_v50  ;;  %v1144_v46 = vadd.f32 %v6980_v47, %v4936_v31  ;;  %v2522_v9 = vpop.permute.xlu1 %2521  ;;  %v8763_v26 = vld [vmem:[#allocation162_spill] sm:$0xff]  ;;  %v7484_v51 = vld [vmem:[%s5820_s21 + $0x40] sm:$0xff]  }
 0x269   : > { %4124 = vtanh.f32 %v2901_v4  ;;  %v953_v0 = vadd.f32 %v6985_v60, %v4938_v17  ;;  %v3219_v35 = vmul.f32 0.5, %v4113_v53  ;;  %v1146_v7 = vadd.f32 %v6987_v45, %v8231_v62  ;;  %v8764_v47 = vld [vmem:[#allocation170_spill] sm:$0xff]  ;;  %v8767_v53 = vld [vmem:[#allocation227_spill] sm:$0xff] }
 0x26a   : > { %v3379_v14 = vadd.f32 %v3347_v43, %v3315_v61  ;;  %4126 = vtanh.f32 %v3029_v40  ;;  %v1604_v28 = vadd.f32 %v8761_v34, %v951_v11  ;;  %v1606_v16 = vadd.f32 %v8762_v38, %v1144_v46  ;;  %v8765_v23 = vld [vmem:[#allocation226_spill] sm:$0xff]  ;;  %v8768_v61 = vld [vmem:[#allocation229_spill] sm:$0xff]  ;;  %v8769_v11 = vld [vmem:[#allocation91_spill] sm:$0xff] }
 0x26b   : > { %4128 = vtanh.f32 %v3157_v25  ;;  %v1605_v24 = vadd.f32 %v8763_v26, %v953_v0  ;;  %v1607_v56 = vadd.f32 %v8764_v47, %v1146_v7  ;;  %v2684_v60 = vmul.f32 %v8531_v57, %v2522_v9  ;;  %v8771_v34 = vld [vmem:[#allocation255_spill] sm:$0xff]  ;;  %v8772_v38 = vld [vmem:[#allocation254_spill] sm:$0xff]  ;;  %v8773_v47 = vld [vmem:[#allocation256_spill] sm:$0xff] }
 0x26c   : > { %4130 = vtanh.f32 %v3379_v14  ;;  %3507 = vst [vmem:[%s7081_s20 + $0x78] sm:$0xff] %v3379_v14  ;;  %v2685_v55 = vmul.f32 %v8532_v8, %v2522_v9  ;;  %v4115_v20 = vpop.eup %4114  ;;  %v2024_v45 = vadd.f32 %v8765_v23, %v1604_v28  ;;  %v2026_v18 = vadd.f32 %v8766_v44, %v1606_v16  ;;  %v8770_v14 = vld [vmem:[#allocation253_spill] sm:$0xff] }
 0x26d   : > { %4132 = vtanh.f32 %v2827_v41  ;;  %v2025_v43 = vadd.f32 %v8767_v53, %v1605_v24  ;;  %v2027_v5 = vadd.f32 %v8768_v61, %v1607_v56  ;;  %v2686_v40 = vmul.f32 %v8533_v12, %v2522_v9  ;;  %v8774_v23 = vld [vmem:[#allocation93_spill] sm:$0xff]  ;;  %v2542_v53 = vpop.permute.xlu0 %2541 }
 0x26e   : > { %v2687_v25 = vmul.f32 %v8537_v37, %v2522_v9  ;;  %v2812_v46 = vadd.f32 %v2684_v60, %v8769_v11  ;;  %v7491_v7 = vadd.f32 %v8770_v14, %v2024_v45  ;;  %v7494_v28 = vadd.f32 %v8771_v34, %v2026_v18  ;;  %v8775_v44 = vld [vmem:[#allocation69_spill] sm:$0xff] }
 0x26f   : > { %v4117_v4 = vpop.eup %4116  ;;  %v7497_v16 = vadd.f32 %v8772_v38, %v2025_v43  ;;  %v7500_v56 = vadd.f32 %v8773_v47, %v2027_v5  ;;  %v2813_v9 = vadd.f32 %v2685_v55, %v8774_v23  ;;  %v2814_v60 = vadd.f32 %v2686_v40, %v8775_v44  ;;  %v8776_v43 = vld [vmem:[#allocation87_spill] sm:$0xff] }
 0x270   : > { %v4119_v0 = vpop.eup %4118  ;;  %v3438_v41 = vmul.f32 %v4117_v4, %v3246_v29  ;;  %v3251_v45 = vadd.f32 0.5, %v3219_v35  ;;  %v3799_v18 = vunpack.c.h.bf16 %v7484_v51  ;;  %v2898_v61 = vmul.f32 0.5, %v2812_v46 }
 0x271   : > { %v4121_v26 = vpop.eup %4120  ;;  %v2960_v24 = vmul.f32 0.5, %v4119_v0  ;;  %v2815_v14 = vadd.f32 %v2687_v25, %v8776_v43  ;;  %v3026_v34 = vmul.f32 0.5, %v2813_v9  ;;  %v3154_v0 = vmul.f32 0.5, %v2814_v60 }
 0x272   : > { %v4123_v29 = vpop.eup %4122  ;;  %3470 = vst [vmem:[%s7138_s22 + $0x50] sm:$0xff] %v3438_v41  ;;  %v3088_v4 = vmul.f32 0.5, %v4121_v26  ;;  %4134 = vtanh.f32 %v2898_v61  ;;  %v2704_v55 = vmul.f32 %v8531_v57, %v2542_v53  ;;  %v2705_v35 = vmul.f32 %v8532_v8, %v2542_v53 }
 0x273   : > { %v2992_v11 = vadd.f32 0.5, %v2960_v24  ;;  %v4125_v5 = vpop.eup %4124  ;;  %v3216_v47 = vmul.f32 0.5, %v4123_v29  ;;  %4136 = vtanh.f32 %v3026_v34  ;;  %v7512_v24 = vld [vmem:[%s5820_s21 + $0x48] sm:$0xff]   ;;  %v2706_v9 = vmul.f32 %v8533_v12, %v2542_v53 }
 0x274   : > { %v3120_v38 = vadd.f32 0.5, %v3088_v4  ;;  %v4127_v40 = vpop.eup %4126  ;;  %v2965_v41 = vmul.f32 0.5, %v4125_v5  ;;  %4138 = vtanh.f32 %v3154_v0  ;;  %v2707_v29 = vmul.f32 %v8537_v37, %v2542_v53 }
 0x275   : > { %v3344_v23 = vmul.f32 %v4115_v20, %v2992_v11  ;;  %v4129_v26 = vpop.eup %4128  ;;  %v3093_v25 = vmul.f32 0.5, %v4127_v40  ;;  %v3794_v20 = vunpack.c.l.bf16 %v7400_v59  ;;  %4140 = vtanh.f32 %v2815_v14 }
 0x276   : > { %v3312_v46 = vmul.f32 %v3790_v42, %v3120_v38  ;;  %v4131_v44 = vpop.eup %4130  ;;  %v2997_v60 = vadd.f32 0.5, %v2965_v41  ;;  %v2832_v42 = vadd.f32 %v2704_v55, %v7002_v58  ;;  %v3803_v34 = vunpack.c.h.bf16 %v7512_v24 }
 0x277   : > { %v4133_v4 = vpop.eup %4132  ;;  %v3443_v61 = vmul.f32 %v4131_v44, %v3251_v45  ;;  %v3125_v54 = vadd.f32 0.5, %v3093_v25  ;;  %v2833_v0 = vadd.f32 %v2705_v35, %v7011_v19  ;;  %v2834_v5 = vadd.f32 %v2706_v9, %v7008_v27  ;;  %v8777_v19 = vld [vmem:[#allocation20_spill] sm:$0xff] }
 0x278   : > { %v3376_v11 = vadd.f32 %v3344_v23, %v3312_v46  ;;  %v3349_v43 = vmul.f32 %v4133_v4, %v2997_v60  ;;  %v3248_v38 = vadd.f32 0.5, %v3216_v47  ;;  %v2903_v40 = vmul.f32 0.5, %v2832_v42  ;;  %v8779_v46 = vld [vmem:[#allocation204_spill] sm:$0xff]  ;;  %v8781_v60 = vld [vmem:[#allocation206_spill] sm:$0xff] }
 0x279   : > { %3475 = vst [vmem:[%s7138_s22 + $0x78] sm:$0xff] %v3443_v61  ;;  %v3317_v14 = vmul.f32 %v3799_v18, %v3125_v54  ;;  %v2835_v53 = vadd.f32 %v2707_v29, %v7014_v13  ;;  %v3031_v45 = vmul.f32 0.5, %v2833_v0  ;;  %v957_v58 = vadd.f32 %v7091_v3, %v4934_v50  ;;  %v2530_v18 = vpop.permute.xlu1 %2529  ;;  %v8778_v13 = vld [vmem:[#allocation203_spill] sm:$0xff]  ;;  %v8782_v61 = vld [vmem:[#allocation32_spill] sm:$0xff]  ;;  %v8783_v54 = vld [vmem:[#allocation34_spill] sm:$0xff] }
 0x27a   : > { %4142 = vtanh.f32 %v3376_v11  ;;  %3504 = vst [vmem:[%s7081_s20 + $0x60] sm:$0xff] %v3376_v11  ;;  %v1150_v55 = vadd.f32 %v7093_v48, %v4936_v31  ;;  %v959_v27 = vadd.f32 %v7098_v33, %v4938_v17  ;;  %v1152_v47 = vadd.f32 %v8777_v19, %v8231_v62  ;;  %v8780_v48 = vld [vmem:[#allocation205_spill] sm:$0xff] }
 0x27b   : > { %v3381_v23 = vadd.f32 %v3349_v43, %v3317_v14  ;;  %4144 = vtanh.f32 %v2903_v40  ;;  %v3159_v41 = vmul.f32 0.5, %v2834_v5  ;;  %v1608_v35 = vadd.f32 %v8778_v13, %v957_v58  ;;  %v8784_v14 = vld [vmem:[#allocation33_spill] sm:$0xff] }
 0x27c   : > { %4146 = vtanh.f32 %v3031_v45  ;;  %v1610_v25 = vadd.f32 %v8779_v46, %v1150_v55  ;;  %v4135_v9 = vpop.eup %4134  ;;  %v3221_v3 = vmul.f32 0.5, %v4129_v26  ;;  %v1609_v44 = vadd.f32 %v8780_v48, %v959_v27  ;;  %v8785_v26 = vld [vmem:[#allocation36_spill] sm:$0xff]  ;;  %v8787_v19 = vld [vmem:[#allocation165_spill] sm:$0xff]  ;;  %v2550_v48 = vpop.permute.xlu0 %2549 }
 0x27d   : > { %4148 = vtanh.f32 %v3381_v23  ;;  %3509 = vst [vmem:[%s7081_s20 + $0x88] sm:$0xff] %v3381_v23  ;;  %v1611_v29 = vadd.f32 %v8781_v60, %v1152_v47  ;;  %v4137_v4 = vpop.eup %4136  ;;  %v2962_v33 = vmul.f32 0.5, %v4135_v9  ;;  %v2028_v11 = vadd.f32 %v8782_v61, %v1608_v35  ;;  %v8786_v23 = vld [vmem:[#allocation94_spill] sm:$0xff]  ;;  %v8789_v35 = vld [vmem:[#allocation95_spill] sm:$0xff] }
 0x27e   : > { %v2030_v42 = vadd.f32 %v8783_v54, %v1610_v25  ;;  %v2692_v43 = vmul.f32 %v8531_v57, %v2530_v18  ;;  %v4139_v0 = vpop.eup %4138  ;;  %v3090_v5 = vmul.f32 0.5, %v4137_v4  ;;  %4150 = vtanh.f32 %v2835_v53  ;;  %v8790_v25 = vld [vmem:[#allocation251_spill] sm:$0xff] }
 0x27f   : > { %v2029_v40 = vadd.f32 %v8784_v14, %v1609_v44  ;;  %v2031_v45 = vadd.f32 %v8785_v26, %v1611_v29  ;;  %v4141_v58 = vpop.eup %4140  ;;  %v2994_v55 = vadd.f32 0.5, %v2962_v33  ;;  %4152 = vtanh.f32 %v3159_v41 }
 0x280   : > { %v7543_v27 = vadd.f32 %v8786_v23, %v2028_v11  ;;  %v7546_v47 = vadd.f32 %v8787_v19, %v2030_v42  ;;  %v3122_v13 = vadd.f32 0.5, %v3090_v5  ;;  %v2693_v53 = vmul.f32 %v8532_v8, %v2530_v18  ;;  %v8791_v11 = vld [vmem:[#allocation99_spill] sm:$0xff] }
 0x281   : > { %v7549_v46 = vadd.f32 %v8789_v35, %v2029_v40  ;;  %v7552_v9 = vadd.f32 %v8790_v25, %v2031_v45  ;;  %v3253_v44 = vadd.f32 0.5, %v3221_v3  ;;  %v3346_v60 = vmul.f32 %v4141_v58, %v2994_v55  ;;  %v8792_v42 = vld [vmem:[#allocation163_spill] sm:$0xff]  ;;  %v8793_v40 = vld [vmem:[#allocation105_spill] sm:$0xff]  ;;  %v8794_v45 = vld [vmem:[#allocation166_spill] sm:$0xff] }
 0x282   : > { %8788 = vst [vmem:[#allocation122_spill] sm:$0xff] %v7546_v47  ;;  %v2694_v41 = vmul.f32 %v8533_v12, %v2530_v18  ;;  %v2695_v29 = vmul.f32 %v8537_v37, %v2530_v18  ;;  %v3218_v33 = vmul.f32 0.5, %v4139_v0  ;;  %v3314_v61 = vmul.f32 %v3794_v20, %v3122_v13 }
 0x283   : > { %v2820_v54 = vadd.f32 %v2692_v43, %v8791_v11  ;;  %v2821_v5 = vadd.f32 %v2693_v53, %v8792_v42  ;;  %v2712_v58 = vmul.f32 %v8531_v57, %v2550_v48  ;;  %v2713_v0 = vmul.f32 %v8532_v8, %v2550_v48  ;;  %v8795_v53 = vld [vmem:[#allocation172_spill] sm:$0xff] }
 0x284   : > { %v4143_v4 = vpop.eup %4142  ;;  %v2822_v26 = vadd.f32 %v2694_v41, %v8793_v40  ;;  %v2823_v3 = vadd.f32 %v2695_v29, %v8794_v45  ;;  %v3378_v18 = vadd.f32 %v3346_v60, %v3314_v61  ;;  %v2715_v25 = vmul.f32 %v8537_v37, %v2550_v48  ;;  %v8798_v42 = vld [vmem:[#allocation48_spill] sm:$0xff]  ;;  %v8799_v40 = vld [vmem:[#allocation133_spill] sm:$0xff] }
 0x285   : > { %v3440_v14 = vmul.f32 %v4143_v4, %v3248_v38  ;;  %v4145_v55 = vpop.eup %4144  ;;  %v2900_v23 = vmul.f32 0.5, %v2820_v54  ;;  %v3028_v19 = vmul.f32 0.5, %v2821_v5  ;;  %v2714_v38 = vmul.f32 %v8533_v12, %v2550_v48  ;;  %v8796_v4 = vld [vmem:[#allocation178_spill] sm:$0xff]  ;;  %v8797_v54 = vld [vmem:[#allocation219_spill] sm:$0xff] }
 0x286   : > { %v4147_v59 = vpop.eup %4146  ;;  %v2967_v20 = vmul.f32 0.5, %v4145_v55  ;;  %v3156_v43 = vmul.f32 0.5, %v2822_v26  ;;  %4154 = vtanh.f32 %v2823_v3  ;;  %3506 = vst [vmem:[%s7081_s20 + $0x70] sm:$0xff] %v3378_v18  ;;  %v2840_v60 = vadd.f32 %v2712_v58, %v8795_v53  ;;  %v8800_v55 = vld [vmem:[#allocation71_spill] sm:$0xff] }
 0x287   : > { %3472 = vst [vmem:[%s7138_s22 + $0x60] sm:$0xff] %v3440_v14  ;;  %v4149_v13 = vpop.eup %4148  ;;  %4156 = vtanh.f32 %v3378_v18  ;;  %v3095_v35 = vmul.f32 0.5, %v4147_v59  ;;  %v2841_v61 = vadd.f32 %v2713_v0, %v8796_v4  ;;  %v7573_v5 = vmul.f32 %v8798_v42, %v8797_v54  ;;  %v8801_v59 = vld [vmem:[#allocation77_spill] sm:$0xff]  ;;  %v8808_v54 = vld [vmem:[#allocation220_spill] sm:$0xff] }
 0x288   : > { %v3445_v41 = vmul.f32 %v4149_v13, %v3253_v44  ;;  %v2999_v29 = vadd.f32 0.5, %v2967_v20  ;;  %4158 = vtanh.f32 %v2900_v23  ;;  %v4151_v11 = vpop.eup %4150  ;;  %v2842_v26 = vadd.f32 %v2714_v38, %v8799_v40  ;;  %v8802_v20 = vld [vmem:[#allocation137_spill] sm:$0xff] }
 0x289   : > { %v3127_v14 = vadd.f32 0.5, %v3095_v35  ;;  %4160 = vtanh.f32 %v3028_v19  ;;  %v4153_v45 = vpop.eup %4152  ;;  %v3250_v3 = vadd.f32 0.5, %v3218_v33  ;;  %v2905_v58 = vmul.f32 0.5, %v2840_v60  ;;  %v8803_v33 = vld [vmem:[#allocation139_spill] sm:$0xff] }
 0x28a   : > { %3477 = vst [vmem:[%s7138_s22 + $0x88] sm:$0xff] %v3445_v41  ;;  %v3351_v48 = vmul.f32 %v4151_v11, %v2999_v29  ;;  %4162 = vtanh.f32 %v3156_v43  ;;  %v2843_v18 = vadd.f32 %v2715_v25, %v8800_v55  ;;  %v3033_v23 = vmul.f32 0.5, %v2841_v61  ;;  %v2538_v43 = vpop.permute.xlu1 %2537  ;;  %v8805_v60 = vld [vmem:[#allocation215_spill] sm:$0xff]  ;;  %v8806_v29 = vld [vmem:[#allocation216_spill] sm:$0xff]  ;;  %v8807_v61 = vld [vmem:[#allocation217_spill] sm:$0xff] }
 0x28b   : > { %v3319_v44 = vmul.f32 %v3803_v34, %v3127_v14  ;;  %v3161_v0 = vmul.f32 0.5, %v2842_v26  ;;  %4164 = vtanh.f32 %v2905_v58  ;;  %v961_v19 = vadd.f32 %v8801_v59, %v4934_v50  ;;  %v8804_v34 = vld [vmem:[#allocation81_spill] sm:$0xff]  ;;  %v8810_v58 = vld [vmem:[#allocation231_spill] sm:$0xff] }
 0x28c   : > { %v1154_v38 = vadd.f32 %v8802_v20, %v4936_v31  ;;  %v963_v13 = vadd.f32 %v8803_v33, %v4938_v17  ;;  %v3223_v35 = vmul.f32 0.5, %v4153_v45  ;;  %4166 = vtanh.f32 %v3033_v23  ;;  %v8809_v45 = vld [vmem:[#allocation46_spill] sm:$0xff]  ;;  %v8811_v55 = vld [vmem:[#allocation47_spill] sm:$0xff]  ;;  %v7599_v59 = vld [vmem:[%s5820_s21 + $0x50] sm:$0xff]  }
 0x28d   : > { %v3383_v53 = vadd.f32 %v3351_v48, %v3319_v44  ;;  %v1156_v25 = vadd.f32 %v8804_v34, %v8231_v62  ;;  %4168 = vtanh.f32 %v3161_v0  ;;  %v1612_v41 = vadd.f32 %v8805_v60, %v961_v19  ;;  %v8812_v19 = vld [vmem:[#allocation232_spill] sm:$0xff] }
 0x28e   : > { %v1614_v4 = vadd.f32 %v8806_v29, %v1154_v38  ;;  %v1613_v11 = vadd.f32 %v8807_v61, %v963_v13  ;;  %v2700_v14 = vmul.f32 %v8531_v57, %v2538_v43  ;;  %v2701_v40 = vmul.f32 %v8532_v8, %v2538_v43  ;;  %v8813_v13 = vld [vmem:[#allocation109_spill] sm:$0xff] }
 0x28f   : > { %4170 = vtanh.f32 %v3383_v53  ;;  %3511 = vst [vmem:[%s7081_s20 + $0x98] sm:$0xff] %v3383_v53  ;;  %v1615_v42 = vadd.f32 %v8808_v54, %v1156_v25  ;;  %v2032_v48 = vadd.f32 %v8809_v45, %v1612_v41  ;;  %v2702_v38 = vmul.f32 %v8533_v12, %v2538_v43  ;;  %v8814_v25 = vld [vmem:[#allocation135_spill] sm:$0xff]  ;;  %v8815_v41 = vld [vmem:[#allocation17_spill] sm:$0xff] }
 0x290   : > { %v4155_v26 = vpop.eup %4154  ;;  %4172 = vtanh.f32 %v2843_v18  ;;  %v2034_v44 = vadd.f32 %v8810_v58, %v1614_v4  ;;  %v2033_v23 = vadd.f32 %v8811_v55, %v1613_v11  ;;  %v2703_v33 = vmul.f32 %v8537_v37, %v2538_v43  ;;  %v8816_v4 = vld [vmem:[#allocation230_spill] sm:$0xff]  ;;  %v8819_v55 = vld [vmem:[#allocation136_spill] sm:$0xff] }
 0x291   : > { %v4157_v0 = vpop.eup %4156  ;;  %v2035_v20 = vadd.f32 %v8812_v19, %v1615_v42  ;;  %v2828_v53 = vadd.f32 %v2700_v14, %v8813_v13  ;;  %v7606_v60 = vadd.f32 %v8814_v25, %v2032_v48  ;;  %v8817_v42 = vld [vmem:[#allocation111_spill] sm:$0xff]  ;;  %v8818_v58 = vld [vmem:[#allocation110_spill] sm:$0xff]  ;;  %v2830_v14 = vadd.f32 %v2702_v38, %v8819_v55  ;;  %v2558_v19 = vpop.permute.xlu0 %2557 }
 0x292   : > { %v4159_v34 = vpop.eup %4158  ;;  %v3442_v18 = vmul.f32 %v4157_v0, %v3250_v3  ;;  %v7609_v29 = vadd.f32 %v8815_v41, %v2034_v44  ;;  %v7612_v61 = vadd.f32 %v8816_v4, %v2033_v23  ;;  %v2829_v43 = vadd.f32 %v2701_v40, %v8818_v58  ;;  %v8820_v25 = vld [vmem:[#allocation218_spill] sm:$0xff] }
 0x293   : > { %v4161_v11 = vpop.eup %4160  ;;  %v2964_v54 = vmul.f32 0.5, %v4159_v34  ;;  %v7615_v45 = vadd.f32 %v8817_v42, %v2035_v20  ;;  %v3798_v48 = vunpack.c.l.bf16 %v7484_v51  ;;  %v3807_v44 = vunpack.c.h.bf16 %v7599_v59 }
 0x294   : > { %v4163_v3 = vpop.eup %4162  ;;  %3474 = vst [vmem:[%s7138_s22 + $0x70] sm:$0xff] %v3442_v18  ;;  %v3092_v0 = vmul.f32 0.5, %v4161_v11  ;;  %v2902_v13 = vmul.f32 0.5, %v2828_v53  ;;  %v2831_v41 = vadd.f32 %v2703_v33, %v8820_v25  ;;  %v3030_v34 = vmul.f32 0.5, %v2829_v43 }
 0x295   : > { %v2996_v23 = vadd.f32 0.5, %v2964_v54  ;;  %v3158_v4 = vmul.f32 0.5, %v2830_v14  ;;  %v4165_v20 = vpop.eup %4164  ;;  %v3255_v42 = vadd.f32 0.5, %v3223_v35  ;;  %v2720_v40 = vmul.f32 %v8531_v57, %v2558_v19 }
 0x296   : > { %v3124_v47 = vadd.f32 0.5, %v3092_v0  ;;  %4174 = vtanh.f32 %v2902_v13  ;;  %v4167_v38 = vpop.eup %4166  ;;  %v2969_v18 = vmul.f32 0.5, %v4165_v20  ;;  %v2721_v51 = vmul.f32 %v8532_v8, %v2558_v19 }
 0x297   : > { %v3348_v58 = vmul.f32 %v4155_v26, %v2996_v23  ;;  %4176 = vtanh.f32 %v3030_v34  ;;  %v4169_v11 = vpop.eup %4168  ;;  %v3097_v53 = vmul.f32 0.5, %v4167_v38  ;;  %v2722_v33 = vmul.f32 %v8533_v12, %v2558_v19 }
 0x298   : > { %v3316_v55 = vmul.f32 %v3798_v48, %v3124_v47  ;;  %4178 = vtanh.f32 %v3158_v4  ;;  %v3001_v35 = vadd.f32 0.5, %v2969_v18  ;;  %v3802_v43 = vunpack.c.l.bf16 %v7512_v24  ;;  %v8822_v18 = vld [vmem:[#allocation38_spill] sm:$0xff] }
 0x299   : > { %v4171_v54 = vpop.eup %4170  ;;  %4180 = vtanh.f32 %v2831_v41  ;;  %v2723_v14 = vmul.f32 %v8537_v37, %v2558_v19  ;;  %v3129_v23 = vadd.f32 0.5, %v3097_v53  ;;  %v2848_v25 = vadd.f32 %v2720_v40, %v7259_v2 }
 0x29a   : > { %v4173_v26 = vpop.eup %4172  ;;  %v3447_v0 = vmul.f32 %v4171_v54, %v3255_v42  ;;  %v3380_v13 = vadd.f32 %v3348_v58, %v3316_v55  ;;  %v3220_v47 = vmul.f32 0.5, %v4163_v3  ;;  %v2849_v34 = vadd.f32 %v2721_v51, %v7265_v36  ;;  %v2546_v36 = vpop.permute.xlu1 %2545  ;;  %v8823_v55 = vld [vmem:[#allocation39_spill] sm:$0xff] }
 0x29b   : > { %v3353_v48 = vmul.f32 %v4173_v26, %v3001_v35  ;;  %v2850_v4 = vadd.f32 %v2722_v33, %v7262_v39  ;;  %v3321_v20 = vmul.f32 %v3807_v44, %v3129_v23  ;;  %v2851_v41 = vadd.f32 %v2723_v14, %v7268_v30  ;;  %v8821_v44 = vld [vmem:[#allocation112_spill] sm:$0xff]  ;;  %v8825_v35 = vld [vmem:[#allocation42_spill] sm:$0xff]  ;;  %v8827_v23 = vld [vmem:[#allocation235_spill] sm:$0xff] }
 0x29c   : > { %3479 = vst [vmem:[%s7138_s22 + $0x98] sm:$0xff] %v3447_v0  ;;  %4182 = vtanh.f32 %v3380_v13  ;;  %3508 = vst [vmem:[%s7081_s20 + $0x80] sm:$0xff] %v3380_v13  ;;  %v2907_v38 = vmul.f32 0.5, %v2848_v25  ;;  %v3035_v19 = vmul.f32 0.5, %v2849_v34  ;;  %v967_v2 = vadd.f32 %v7219_v63, %v4934_v50  ;;  %v7646_v63 = vld [vmem:[%s5820_s21 + $0x58] sm:$0xff]  }
 0x29d   : > { %v3163_v42 = vmul.f32 0.5, %v2850_v4  ;;  %v1160_v3 = vadd.f32 %v7221_v32, %v4936_v31  ;;  %v3385_v40 = vadd.f32 %v3353_v48, %v3321_v20  ;;  %v969_v39 = vadd.f32 %v7225_v6, %v4938_v17  ;;  %v8824_v32 = vld [vmem:[#allocation40_spill] sm:$0xff]  ;;  %v8828_v4 = vld [vmem:[#allocation234_spill] sm:$0xff] }
 0x29e   : > { %4184 = vtanh.f32 %v2907_v38  ;;  %v1162_v30 = vadd.f32 %v8821_v44, %v8231_v62  ;;  %v3225_v58 = vmul.f32 0.5, %v4169_v11  ;;  %v1616_v51 = vadd.f32 %v8822_v18, %v967_v2  ;;  %v8826_v11 = vld [vmem:[#allocation233_spill] sm:$0xff]  ;;  %v8829_v38 = vld [vmem:[#allocation236_spill] sm:$0xff] }
 0x29f   : > { %4186 = vtanh.f32 %v3035_v19  ;;  %v1618_v53 = vadd.f32 %v8823_v55, %v1160_v3  ;;  %3513 = vst [vmem:[%s7081_s20 + $0xa8] sm:$0xff] %v3385_v40  ;;  %v1617_v54 = vadd.f32 %v8824_v32, %v969_v39  ;;  %v2708_v6 = vmul.f32 %v8531_v57, %v2546_v36  ;;  %v8830_v39 = vld [vmem:[#allocation76_spill] sm:$0xff]  ;;  %v2566_v32 = vpop.permute.xlu0 %2565 }
 0x2a0   : > { %v4175_v33 = vpop.eup %4174  ;;  %4188 = vtanh.f32 %v3385_v40  ;;  %v1619_v14 = vadd.f32 %v8825_v35, %v1162_v30  ;;  %v2036_v13 = vadd.f32 %v8826_v11, %v1616_v51  ;;  %v3811_v40 = vunpack.c.h.bf16 %v7646_v63  ;;  %v8831_v30 = vld [vmem:[#allocation258_spill] sm:$0xff]  ;;  %v8832_v51 = vld [vmem:[#allocation257_spill] sm:$0xff] }
 0x2a1   : > { %v4177_v26 = vpop.eup %4176  ;;  %v2966_v0 = vmul.f32 0.5, %v4175_v33  ;;  %4190 = vtanh.f32 %v3163_v42  ;;  %v2038_v25 = vadd.f32 %v8827_v23, %v1618_v53  ;;  %v2037_v20 = vadd.f32 %v8828_v4, %v1617_v54  ;;  %v8833_v53 = vld [vmem:[#allocation72_spill] sm:$0xff]  ;;  %v8834_v23 = vld [vmem:[#allocation51_spill] sm:$0xff] }
 0x2a2   : > { %v4179_v48 = vpop.eup %4178  ;;  %v3094_v34 = vmul.f32 0.5, %v4177_v26  ;;  %4192 = vtanh.f32 %v2851_v41  ;;  %v2039_v19 = vadd.f32 %v8829_v38, %v1619_v14  ;;  %v7657_v44 = vadd.f32 %v8830_v39, %v2036_v13 }
 0x2a3   : > { %v4181_v2 = vpop.eup %4180  ;;  %v2998_v3 = vadd.f32 0.5, %v2966_v0  ;;  %v7660_v42 = vadd.f32 %v8831_v30, %v2038_v25  ;;  %v7663_v55 = vadd.f32 %v8832_v51, %v2037_v20  ;;  %v2709_v33 = vmul.f32 %v8532_v8, %v2546_v36 }
 0x2a4   : > { %v3126_v18 = vadd.f32 0.5, %v3094_v34  ;;  %v7666_v41 = vadd.f32 %v8833_v53, %v2039_v19  ;;  %v3252_v54 = vadd.f32 0.5, %v3220_v47  ;;  %v2710_v14 = vmul.f32 %v8533_v12, %v2546_v36  ;;  %v8835_v34 = vld [vmem:[#allocation177_spill] sm:$0xff] }
 0x2a5   : > { %v3350_v35 = vmul.f32 %v4181_v2, %v2998_v3  ;;  %v2711_v26 = vmul.f32 %v8537_v37, %v2546_v36  ;;  %v3257_v11 = vadd.f32 0.5, %v3225_v58  ;;  %v2836_v25 = vadd.f32 %v2708_v6, %v8834_v23  ;;  %v8836_v19 = vld [vmem:[#allocation53_spill] sm:$0xff]  ;;  %v8837_v6 = vld [vmem:[#allocation70_spill] sm:$0xff] }
 0x2a6   : > { %v4183_v0 = vpop.eup %4182  ;;  %v3318_v13 = vmul.f32 %v3802_v43, %v3126_v18  ;;  %v2837_v4 = vadd.f32 %v2709_v33, %v8835_v34  ;;  %v3222_v38 = vmul.f32 0.5, %v4179_v48  ;;  %v2838_v47 = vadd.f32 %v2710_v14, %v8836_v19 }
 0x2a7   : > { %v3444_v20 = vmul.f32 %v4183_v0, %v3252_v54  ;;  %v2728_v2 = vmul.f32 %v8531_v57, %v2566_v32  ;;  %v2904_v36 = vmul.f32 0.5, %v2836_v25  ;;  %v2729_v58 = vmul.f32 %v8532_v8, %v2566_v32 }
 0x2a8   : > { %v4185_v3 = vpop.eup %4184  ;;  %v3382_v39 = vadd.f32 %v3350_v35, %v3318_v13  ;;  %v3032_v30 = vmul.f32 0.5, %v2837_v4  ;;  %v3806_v43 = vunpack.c.l.bf16 %v7599_v59  ;;  %v2839_v18 = vadd.f32 %v2711_v26, %v8837_v6  ;;  %v2554_v6 = vpop.permute.xlu1 %2553 }
 0x2a9   : > { %v4187_v51 = vpop.eup %4186  ;;  %3476 = vst [vmem:[%s7138_s22 + $0x80] sm:$0xff] %v3444_v20  ;;  %v2971_v24 = vmul.f32 0.5, %v4185_v3  ;;  %v2730_v48 = vmul.f32 %v8533_v12, %v2566_v32  ;;  %v2731_v54 = vmul.f32 %v8537_v37, %v2566_v32  ;;  %v2856_v35 = vadd.f32 %v2728_v2, %v7373_v1 }
 0x2aa   : > { %v4189_v53 = vpop.eup %4188  ;;  %4194 = vtanh.f32 %v3382_v39  ;;  %3510 = vst [vmem:[%s7081_s20 + $0x90] sm:$0xff] %v3382_v39  ;;  %v3099_v33 = vmul.f32 0.5, %v4187_v51  ;;  %v2857_v23 = vadd.f32 %v2729_v58, %v7379_v52  ;;  %v3254_v34 = vadd.f32 0.5, %v3222_v38  ;;  %v8838_v52 = vld [vmem:[#allocation173_spill] sm:$0xff] }
 0x2ab   : > { %v4191_v14 = vpop.eup %4190  ;;  %v3449_v0 = vmul.f32 %v4189_v53, %v3257_v11  ;;  %v3003_v13 = vadd.f32 0.5, %v2971_v24  ;;  %4196 = vtanh.f32 %v2904_v36  ;;  %v3160_v4 = vmul.f32 0.5, %v2838_v47  ;;  %v8839_v39 = vld [vmem:[#allocation37_spill] sm:$0xff]  ;;  %v8840_v36 = vld [vmem:[#allocation28_spill] sm:$0xff] }
 0x2ac   : > { %v4193_v25 = vpop.eup %4192  ;;  %v3131_v26 = vadd.f32 0.5, %v3099_v33  ;;  %4198 = vtanh.f32 %v3032_v30  ;;  %v7687_v20 = vmul.f32 0.5, %v4191_v14  ;;  %v2909_v3 = vmul.f32 0.5, %v2856_v35  ;;  %v8841_v30 = vld [vmem:[#allocation181_spill] sm:$0xff]  ;;  %v8845_v53 = vld [vmem:[#allocation188_spill] sm:$0xff]  ;;  %v8846_v35 = vld [vmem:[#allocation31_spill] sm:$0xff] }
 0x2ad   : > { %3481 = vst [vmem:[%s7138_s22 + $0xa8] sm:$0xff] %v3449_v0  ;;  %v3355_v19 = vmul.f32 %v4193_v25, %v3003_v13  ;;  %4200 = vtanh.f32 %v2839_v18  ;;  %v2858_v1 = vadd.f32 %v2730_v48, %v7376_v22  ;;  %v2859_v11 = vadd.f32 %v2731_v54, %v7382_v21  ;;  %v8843_v22 = vld [vmem:[#allocation180_spill] sm:$0xff]  ;;  %v8844_v48 = vld [vmem:[#allocation30_spill] sm:$0xff]  ;;  %v8847_v0 = vld [vmem:[#allocation237_spill] sm:$0xff] }
 0x2ae   : > { %v3323_v32 = vmul.f32 %v3811_v40, %v3131_v26  ;;  %v3037_v2 = vmul.f32 0.5, %v2857_v23  ;;  %4202 = vtanh.f32 %v2909_v3  ;;  %v971_v38 = vadd.f32 %v8838_v52, %v4934_v50  ;;  %v8842_v40 = vld [vmem:[#allocation29_spill] sm:$0xff]  ;;  %v8848_v26 = vld [vmem:[#allocation239_spill] sm:$0xff] }
 0x2af   : > { %v1492_v47 = vmul.f32 %v8840_v36, %v8839_v39  ;;  %v1164_v58 = vadd.f32 %v8841_v30, %v4936_v31  ;;  %v1494_v24 = vmul.f32 %v8842_v40, %v8839_v39  ;;  %v973_v21 = vadd.f32 %v8843_v22, %v4938_v17  ;;  %v8851_v30 = vld [vmem:[#allocation171_spill] sm:$0xff] }
 0x2b0   : > { %v3387_v51 = vadd.f32 %v3355_v19, %v3323_v32  ;;  %4204 = vtanh.f32 %v3037_v2  ;;  %v1493_v50 = vmul.f32 %v8844_v48, %v8839_v39  ;;  %v1166_v33 = vadd.f32 %v8845_v53, %v8231_v62  ;;  %v8849_v2 = vld [vmem:[#allocation113_spill] sm:$0xff]  ;;  %v8854_v48 = vld [vmem:[#allocation35_spill] sm:$0xff] }
 0x2b1   : > { %4206 = vtanh.f32 %v3160_v4  ;;  %v1620_v18 = vadd.f32 %v1492_v47, %v971_v38  ;;  %v3165_v31 = vmul.f32 0.5, %v2858_v1  ;;  %v1622_v54 = vadd.f32 %v1494_v24, %v1164_v58  ;;  %v8853_v24 = vld [vmem:[#allocation82_spill] sm:$0xff]  ;;  %v8855_v53 = vld [vmem:[#allocation107_spill] sm:$0xff] }
 0x2b2   : > { %4208 = vtanh.f32 %v3387_v51  ;;  %3515 = vst [vmem:[%s7081_s20 + $0xb8] sm:$0xff] %v3387_v51  ;;  %v1495_v14 = vmul.f32 %v8846_v35, %v8839_v39  ;;  %v1621_v17 = vadd.f32 %v1493_v50, %v973_v21  ;;  %v2716_v23 = vmul.f32 %v8531_v57, %v2554_v6  ;;  %v8852_v51 = vld [vmem:[#allocation240_spill] sm:$0xff] }
 0x2b3   : > { %4210 = vtanh.f32 %v2859_v11  ;;  %v2040_v13 = vadd.f32 %v8847_v0, %v1620_v18  ;;  %v2042_v4 = vadd.f32 %v8848_v26, %v1622_v54  ;;  %v2717_v62 = vmul.f32 %v8532_v8, %v2554_v6  ;;  %v8850_v11 = vld [vmem:[#allocation238_spill] sm:$0xff] }
 0x2b4   : > { %v4195_v25 = vpop.eup %4194  ;;  %v1623_v19 = vadd.f32 %v1495_v14, %v1166_v33  ;;  %v2718_v3 = vmul.f32 %v8533_v12, %v2554_v6  ;;  %v2041_v38 = vadd.f32 %v8850_v11, %v1621_v17  ;;  %v2719_v39 = vmul.f32 %v8537_v37, %v2554_v6  ;;  %v8856_v0 = vld [vmem:[#allocation106_spill] sm:$0xff] }
 0x2b5   : > { %v4197_v32 = vpop.eup %4196  ;;  %v3446_v1 = vmul.f32 %v4195_v25, %v3254_v34  ;;  %v7714_v52 = vadd.f32 %v8849_v2, %v2040_v13  ;;  %v7719_v58 = vadd.f32 %v8851_v30, %v2042_v4  ;;  %v2844_v22 = vadd.f32 %v2716_v23, %v8853_v24  ;;  %v7725_v34 = vld [vmem:[%s5820_s21 + $0x60] sm:$0xff]   ;;  %v2574_v25 = vpop.permute.xlu0 %2573 }
 0x2b6   : > { %v4199_v36 = vpop.eup %4198  ;;  %v2968_v47 = vmul.f32 0.5, %v4197_v32  ;;  %v2043_v40 = vadd.f32 %v8852_v51, %v1623_v19  ;;  %4212 = vtanh.f32 %v3165_v31  ;;  %v7728_v50 = vadd.f32 %v8854_v48, %v2041_v38  ;;  %v8857_v32 = vld [vmem:[#allocation108_spill] sm:$0xff]  ;;  %v2562_v24 = vpop.permute.xlu1 %2561 }
 0x2b7   : > { %v4201_v21 = vpop.eup %4200  ;;  %3478 = vst [vmem:[%s7138_s22 + $0x90] sm:$0xff] %v3446_v1  ;;  %v3096_v18 = vmul.f32 0.5, %v4199_v36  ;;  %v2845_v6 = vadd.f32 %v2717_v62, %v8855_v53  ;;  %v2846_v13 = vadd.f32 %v2718_v3, %v8856_v0  ;;  %v2906_v17 = vmul.f32 0.5, %v2844_v22 }
 0x2b8   : > { %v3000_v33 = vadd.f32 0.5, %v2968_v47  ;;  %v7732_v54 = vadd.f32 %v7573_v5, %v2043_v40  ;;  %v4203_v35 = vpop.eup %4202  ;;  %v3815_v31 = vunpack.c.h.bf16 %v7725_v34  ;;  %v2847_v1 = vadd.f32 %v2719_v39, %v8857_v32 }
 0x2b9   : > { %v3128_v14 = vadd.f32 0.5, %v3096_v18  ;;  %v3034_v23 = vmul.f32 0.5, %v2845_v6  ;;  %v2973_v19 = vmul.f32 0.5, %v4203_v35  ;;  %v3259_v62 = vadd.f32 0.5, %v7687_v20 }
 0x2ba   : > { %v4205_v26 = vpop.eup %4204  ;;  %v3352_v4 = vmul.f32 %v4201_v21, %v3000_v33  ;;  %4214 = vtanh.f32 %v2906_v17  ;;  %v2736_v36 = vmul.f32 %v8531_v57, %v2574_v25  ;;  %v3162_v39 = vmul.f32 0.5, %v2846_v13  ;;  %v2582_v13 = vpop.permute.xlu0 %2581 }
 0x2bb   : > { %v4207_v2 = vpop.eup %4206  ;;  %v3320_v5 = vmul.f32 %v3806_v43, %v3128_v14  ;;  %v3101_v11 = vmul.f32 0.5, %v4205_v26  ;;  %v3005_v38 = vadd.f32 0.5, %v2973_v19  ;;  %4216 = vtanh.f32 %v3034_v23 }
 0x2bc   : > { %v4209_v3 = vpop.eup %4208  ;;  %4218 = vtanh.f32 %v2847_v1  ;;  %v2737_v59 = vmul.f32 %v8532_v8, %v2574_v25  ;;  %v2738_v43 = vmul.f32 %v8533_v12, %v2574_v25  ;;  %v2739_v21 = vmul.f32 %v8537_v37, %v2574_v25 }
 0x2bd   : > { %v4211_v47 = vpop.eup %4210  ;;  %v3451_v30 = vmul.f32 %v4209_v3, %v3259_v62  ;;  %v3384_v51 = vadd.f32 %v3352_v4, %v3320_v5  ;;  %v3133_v40 = vadd.f32 0.5, %v3101_v11  ;;  %v2864_v18 = vadd.f32 %v2736_v36, %v7491_v7  ;;  %v8859_v4 = vld [vmem:[#allocation176_spill] sm:$0xff] }
 0x2be   : > { %v3357_v22 = vmul.f32 %v4211_v47, %v3005_v38  ;;  %v2865_v48 = vadd.f32 %v2737_v59, %v7497_v16  ;;  %v2724_v53 = vmul.f32 %v8531_v57, %v2562_v24  ;;  %v3224_v33 = vmul.f32 0.5, %v4207_v2  ;;  %v8858_v16 = vld [vmem:[#allocation175_spill] sm:$0xff]  ;;  %v7760_v38 = vld [vmem:[%s5820_s21 + $0x68] sm:$0xff]  }
 0x2bf   : > { %3483 = vst [vmem:[%s7138_s22 + $0xb8] sm:$0xff] %v3451_v30  ;;  %4220 = vtanh.f32 %v3384_v51  ;;  %3512 = vst [vmem:[%s7081_s20 + $0xa0] sm:$0xff] %v3384_v51  ;;  %v3325_v20 = vmul.f32 %v3815_v31, %v3133_v40  ;;  %v2911_v14 = vmul.f32 0.5, %v2864_v18  ;;  %v2725_v0 = vmul.f32 %v8532_v8, %v2562_v24 }
 0x2c0   : > { %v4213_v6 = vpop.eup %4212  ;;  %4222 = vtanh.f32 %v3162_v39  ;;  %v2866_v17 = vadd.f32 %v2738_v43, %v7494_v28  ;;  %v2867_v23 = vadd.f32 %v2739_v21, %v7500_v56  ;;  %v3039_v26 = vmul.f32 0.5, %v2865_v48 }
 0x2c1   : > { %v3389_v35 = vadd.f32 %v3357_v22, %v3325_v20  ;;  %v2727_v7 = vmul.f32 %v8537_v37, %v2562_v24  ;;  %v2852_v25 = vadd.f32 %v2724_v53, %v8858_v16  ;;  %v2853_v31 = vadd.f32 %v2725_v0, %v8859_v4 }
 0x2c2   : > { %v3229_v19 = vmul.f32 0.5, %v4213_v6  ;;  %v3810_v32 = vunpack.c.l.bf16 %v7646_v63  ;;  %v2744_v1 = vmul.f32 %v8531_v57, %v2582_v13  ;;  %v2745_v62 = vmul.f32 %v8532_v8, %v2582_v13  ;;  %v8860_v63 = vld [vmem:[#allocation179_spill] sm:$0xff] }
 0x2c3   : > { %4224 = vtanh.f32 %v3389_v35  ;;  %3517 = vst [vmem:[%s7081_s20 + $0xc8] sm:$0xff] %v3389_v35  ;;  %v2908_v28 = vmul.f32 0.5, %v2852_v25  ;;  %v3036_v56 = vmul.f32 0.5, %v2853_v31  ;;  %v3256_v11 = vadd.f32 0.5, %v3224_v33 }
 0x2c4   : > { %4226 = vtanh.f32 %v2911_v14  ;;  %v4215_v2 = vpop.eup %4214  ;;  %v3167_v36 = vmul.f32 0.5, %v2866_v17  ;;  %v2726_v47 = vmul.f32 %v8533_v12, %v2562_v24  ;;  %v2855_v51 = vadd.f32 %v2727_v7, %v8860_v63  ;;  %v2570_v24 = vpop.permute.xlu1 %2569  ;;  %v8862_v63 = vld [vmem:[#allocation121_spill] sm:$0xff] }
 0x2c5   : > { %4228 = vtanh.f32 %v3039_v26  ;;  %v4217_v5 = vpop.eup %4216  ;;  %v2970_v3 = vmul.f32 0.5, %v4215_v2  ;;  %v2872_v40 = vadd.f32 %v2744_v1, %v7606_v60  ;;  %v2747_v59 = vmul.f32 %v8537_v37, %v2582_v13 }
 0x2c6   : > { %v3098_v30 = vmul.f32 0.5, %v4217_v5  ;;  %4230 = vtanh.f32 %v2867_v23  ;;  %v4219_v39 = vpop.eup %4218  ;;  %v2873_v43 = vadd.f32 %v2745_v62, %v7612_v61  ;;  %v3261_v21 = vadd.f32 0.5, %v3229_v19  ;;  %v8861_v61 = vld [vmem:[#allocation174_spill] sm:$0xff]  ;;  %v2590_v62 = vpop.permute.xlu0 %2589 }
 0x2c7   : > { %v3002_v22 = vadd.f32 0.5, %v2970_v3  ;;  %4232 = vtanh.f32 %v2908_v28  ;;  %v3819_v48 = vunpack.c.h.bf16 %v7760_v38  ;;  %v3814_v60 = vunpack.c.l.bf16 %v7725_v34 }
 0x2c8   : > { %v3130_v18 = vadd.f32 0.5, %v3098_v30  ;;  %4234 = vtanh.f32 %v3036_v56  ;;  %v2746_v35 = vmul.f32 %v8533_v12, %v2582_v13  ;;  %v2913_v14 = vmul.f32 0.5, %v2872_v40 }
 0x2c9   : > { %v4221_v20 = vpop.eup %4220  ;;  %v3354_v6 = vmul.f32 %v4219_v39, %v3002_v22  ;;  %4236 = vtanh.f32 %v3167_v36  ;;  %v3041_v0 = vmul.f32 0.5, %v2873_v43  ;;  %v2854_v23 = vadd.f32 %v2726_v47, %v8861_v61 }
 0x2ca   : > { %v3448_v53 = vmul.f32 %v4221_v20, %v3256_v11  ;;  %v3322_v33 = vmul.f32 %v3810_v32, %v3130_v18  ;;  %v4223_v17 = vpop.eup %4222  ;;  %4238 = vtanh.f32 %v2855_v51  ;;  %v2875_v26 = vadd.f32 %v2747_v59, %v7615_v45 }
 0x2cb   : > { %v2732_v7 = vmul.f32 %v8531_v57, %v2570_v24  ;;  %4240 = vtanh.f32 %v2913_v14  ;;  %v2733_v4 = vmul.f32 %v8532_v8, %v2570_v24  ;;  %v2734_v13 = vmul.f32 %v8533_v12, %v2570_v24 }
 0x2cc   : > { %3480 = vst [vmem:[%s7138_s22 + $0xa0] sm:$0xff] %v3448_v53  ;;  %v3386_v25 = vadd.f32 %v3354_v6, %v3322_v33  ;;  %4242 = vtanh.f32 %v3041_v0  ;;  %v2735_v32 = vmul.f32 %v8537_v37, %v2570_v24  ;;  %v2874_v28 = vadd.f32 %v2746_v35, %v7609_v29 }
 0x2cd   : > { %v4225_v16 = vpop.eup %4224  ;;  %v2860_v1 = vadd.f32 %v2732_v7, %v7431_v10  ;;  %v2861_v56 = vadd.f32 %v2733_v4, %v7437_v15  ;;  %v3164_v11 = vmul.f32 0.5, %v2854_v23  ;;  %v2862_v30 = vadd.f32 %v2734_v13, %v7434_v49  ;;  %v7786_v49 = vld [vmem:[%s5820_s21 + $0x70] sm:$0xff]  }
 0x2ce   : > { %v4227_v31 = vpop.eup %4226  ;;  %v3453_v19 = vmul.f32 %v4225_v16, %v3261_v21  ;;  %4244 = vtanh.f32 %v3386_v25  ;;  %3514 = vst [vmem:[%s7081_s20 + $0xb0] sm:$0xff] %v3386_v25  ;;  %v2863_v10 = vadd.f32 %v2735_v32, %v8862_v63  ;;  %v3226_v39 = vmul.f32 0.5, %v4223_v17 }
 0x2cf   : > { %v4229_v2 = vpop.eup %4228  ;;  %v2975_v45 = vmul.f32 0.5, %v4227_v31  ;;  %4246 = vtanh.f32 %v2875_v26  ;;  %v2910_v3 = vmul.f32 0.5, %v2860_v1  ;;  %v3038_v51 = vmul.f32 0.5, %v2861_v56  ;;  %v2578_v1 = vpop.permute.xlu1 %2577 }
 0x2d0   : > { %3485 = vst [vmem:[%s7138_s22 + $0xc8] sm:$0xff] %v3453_v19  ;;  %v3103_v5 = vmul.f32 0.5, %v4229_v2  ;;  %v4231_v36 = vpop.eup %4230  ;;  %v2752_v15 = vmul.f32 %v8531_v57, %v2590_v62  ;;  %v3169_v20 = vmul.f32 0.5, %v2874_v28  ;;  %v2753_v53 = vmul.f32 %v8532_v8, %v2590_v62 }
 0x2d1   : > { %v3007_v47 = vadd.f32 0.5, %v2975_v45  ;;  %v4233_v40 = vpop.eup %4232  ;;  %4248 = vtanh.f32 %v2910_v3  ;;  %v3166_v33 = vmul.f32 0.5, %v2862_v30  ;;  %v2755_v17 = vmul.f32 %v8537_v37, %v2590_v62 }
 0x2d2   : > { %v3135_v22 = vadd.f32 0.5, %v3103_v5  ;;  %v4235_v29 = vpop.eup %4234  ;;  %v2972_v43 = vmul.f32 0.5, %v4233_v40  ;;  %4250 = vtanh.f32 %v3038_v51  ;;  %v2880_v61 = vadd.f32 %v2752_v15, %v7714_v52 }
 0x2d3   : > { %v3359_v59 = vmul.f32 %v4231_v36, %v3007_v47  ;;  %v4237_v21 = vpop.eup %4236  ;;  %v3100_v24 = vmul.f32 0.5, %v4235_v29  ;;  %4252 = vtanh.f32 %v3164_v11  ;;  %v2881_v7 = vadd.f32 %v2753_v53, %v7728_v50 }
 0x2d4   : > { %v3327_v18 = vmul.f32 %v3819_v48, %v3135_v22  ;;  %v3004_v6 = vadd.f32 0.5, %v2972_v43  ;;  %4254 = vtanh.f32 %v2863_v10  ;;  %v4239_v35 = vpop.eup %4238  ;;  %v3823_v48 = vunpack.c.h.bf16 %v7786_v49 }
 0x2d5   : > { %v3132_v0 = vadd.f32 0.5, %v3100_v24  ;;  %v4241_v23 = vpop.eup %4240  ;;  %4256 = vtanh.f32 %v3169_v20  ;;  %v3258_v25 = vadd.f32 0.5, %v3226_v39  ;;  %v2915_v52 = vmul.f32 0.5, %v2880_v61 }
 0x2d6   : > { %v3391_v14 = vadd.f32 %v3359_v59, %v3327_v18  ;;  %v3356_v26 = vmul.f32 %v4239_v35, %v3004_v6  ;;  %v4243_v16 = vpop.eup %4242  ;;  %v2977_v13 = vmul.f32 0.5, %v4241_v23  ;;  %v3043_v32 = vmul.f32 0.5, %v2881_v7  ;;  %v2586_v18 = vpop.permute.xlu1 %2585 }
 0x2d7   : > { %v3324_v4 = vmul.f32 %v3814_v60, %v3132_v0  ;;  %v3105_v19 = vmul.f32 0.5, %v4243_v16  ;;  %v2883_v56 = vadd.f32 %v2755_v17, %v7732_v54  ;;  %v3231_v5 = vmul.f32 0.5, %v4237_v21 }
 0x2d8   : > { %4258 = vtanh.f32 %v3391_v14  ;;  %3519 = vst [vmem:[%s7081_s20 + $0xd8] sm:$0xff] %v3391_v14  ;;  %v4245_v31 = vpop.eup %4244  ;;  %v3009_v50 = vadd.f32 0.5, %v2977_v13  ;;  %v2754_v34 = vmul.f32 %v8533_v12, %v2590_v62  ;;  %v2740_v36 = vmul.f32 %v8531_v57, %v2578_v1  ;;  %v7809_v14 = vld [vmem:[%s5820_s21 + $0x78] sm:$0xff]   ;;  %s4342_s21 = scalar_lea.vmem %s4341_s18, 8192 }
 0x2d9   : > { %4260 = vtanh.f32 %v3166_v33  ;;  %v4247_v2 = vpop.eup %4246  ;;  %v3450_v45 = vmul.f32 %v4245_v31, %v3258_v25  ;;  %v3388_v28 = vadd.f32 %v3356_v26, %v3324_v4  ;;  %v3137_v11 = vadd.f32 0.5, %v3105_v19  ;;  %p4344_p3 = scmp.lt.s32.totalorder %s4342_s21, %s4336_s13 }
 0x2da   : > { %4262 = vtanh.f32 %v2915_v52  ;;  %v3361_v3 = vmul.f32 %v4247_v2, %v3009_v50  ;;  %v2741_v47 = vmul.f32 %v8532_v8, %v2578_v1  ;;  %v3818_v54 = vunpack.c.l.bf16 %v7760_v38 }
 0x2db   : > { %v4249_v60 = vpop.eup %4248  ;;  %3482 = vst [vmem:[%s7138_s22 + $0xb0] sm:$0xff] %v3450_v45  ;;  %4264 = vtanh.f32 %v3388_v28  ;;  %3516 = vst [vmem:[%s7081_s20 + $0xc0] sm:$0xff] %v3388_v28  ;;  %v3329_v63 = vmul.f32 %v3823_v48, %v3137_v11  ;;  %v2743_v15 = vmul.f32 %v8537_v37, %v2578_v1  ;;  %v2868_v29 = vadd.f32 %v2740_v36, %v7543_v27  ;;  %p4345_p4 = por %p4344_p3, %p4343_p2 }
 0x2dc   : > { %v4251_v30 = vpop.eup %4250  ;;  %v2974_v10 = vmul.f32 0.5, %v4249_v60  ;;  %4266 = vtanh.f32 %v3043_v32  ;;  %v3263_v59 = vadd.f32 0.5, %v3231_v5  ;;  %v2882_v20 = vadd.f32 %v2754_v34, %v7719_v58 }
 0x2dd   : > { %v4253_v51 = vpop.eup %4252  ;;  %v3102_v40 = vmul.f32 0.5, %v4251_v30  ;;  %4268 = vtanh.f32 %v2883_v56  ;;  %v3393_v39 = vadd.f32 %v3361_v3, %v3329_v63  ;;  %v2869_v21 = vadd.f32 %v2741_v47, %v7549_v46  ;;  %p4346_p7 = pnand %p4345_p4, %p4339_p12 }
 0x2de   : > { %v4255_v62 = vpop.eup %4254  ;;  %v3006_v22 = vadd.f32 0.5, %v2974_v10  ;;  %v3228_v38 = vmul.f32 0.5, %v4253_v51  ;;  %v2912_v6 = vmul.f32 0.5, %v2868_v29  ;;  %v2742_v27 = vmul.f32 %v8533_v12, %v2578_v1 }
 0x2df   : > { %v3134_v43 = vadd.f32 0.5, %v3102_v40  ;;  %v4257_v24 = vpop.eup %4256  ;;  %4270 = vtanh.f32 %v3393_v39  ;;  %3521 = vst [vmem:[%s7081_s20 + $0xe8] sm:$0xff] %v3393_v39  ;;  %v3040_v0 = vmul.f32 0.5, %v2869_v21  ;;  %v2871_v58 = vadd.f32 %v2743_v15, %v7552_v9 }
 0x2e0   : > { %v3358_v53 = vmul.f32 %v4255_v62, %v3006_v22  ;;  %4272 = vtanh.f32 %v2912_v6  ;;  %v2748_v46 = vmul.f32 %v8531_v57, %v2586_v18  ;;  %v3171_v26 = vmul.f32 0.5, %v2882_v20 }
 0x2e1   : > { %v3326_v35 = vmul.f32 %v3818_v54, %v3134_v43  ;;  %4274 = vtanh.f32 %v3040_v0  ;;  %v2749_v48 = vmul.f32 %v8532_v8, %v2586_v18  ;;  %v3260_v16 = vadd.f32 0.5, %v3228_v38  ;;  %v8863_v8 = vld [vmem:[#allocation122_spill] sm:$0xff] }
 0x2e2   : > { %v4259_v33 = vpop.eup %4258  ;;  %v3827_v25 = vunpack.c.h.bf16 %v7809_v14  ;;  %v2751_v4 = vmul.f32 %v8537_v37, %v2586_v18  ;;  %v2876_v13 = vadd.f32 %v2748_v46, %v7657_v44  ;;  %v3233_v9 = vmul.f32 0.5, %v4257_v24 }
 0x2e3   : > { %v4261_v17 = vpop.eup %4260  ;;  %v3455_v61 = vmul.f32 %v4259_v33, %v3263_v59  ;;  %v3390_v23 = vadd.f32 %v3358_v53, %v3326_v35  ;;  %v2877_v19 = vadd.f32 %v2749_v48, %v7663_v55  ;;  %v2870_v1 = vadd.f32 %v2742_v27, %v8863_v8 }
 0x2e4   : > { %v4263_v7 = vpop.eup %4262  ;;  %v2914_v2 = vmul.f32 0.5, %v2876_v13  ;;  %v2750_v44 = vmul.f32 %v8533_v12, %v2586_v18  ;;  %v2879_v56 = vadd.f32 %v2751_v4, %v7666_v41  ;;  %v3265_v5 = vadd.f32 0.5, %v3233_v9 }
 0x2e5   : > { %3487 = vst [vmem:[%s7138_s22 + $0xd8] sm:$0xff] %v3455_v61  ;;  %v4265_v31 = vpop.eup %4264  ;;  %4276 = vtanh.f32 %v3390_v23  ;;  %3518 = vst [vmem:[%s7081_s20 + $0xd0] sm:$0xff] %v3390_v23  ;;  %v2979_v57 = vmul.f32 0.5, %v4263_v7  ;;  %v3042_v37 = vmul.f32 0.5, %v2877_v19  ;;  %v3230_v60 = vmul.f32 0.5, %v4261_v17 }
 0x2e6   : > { %v4267_v52 = vpop.eup %4266  ;;  %v3452_v32 = vmul.f32 %v4265_v31, %v3260_v16  ;;  %4278 = vtanh.f32 %v2871_v58  ;;  %v3168_v3 = vmul.f32 0.5, %v2870_v1  ;;  %v2878_v63 = vadd.f32 %v2750_v44, %v7660_v42 }
 0x2e7   : > { %v4269_v45 = vpop.eup %4268  ;;  %v3011_v28 = vadd.f32 0.5, %v2979_v57  ;;  %v3107_v50 = vmul.f32 0.5, %v4267_v52  ;;  %4280 = vtanh.f32 %v3171_v26  ;;  %v3262_v41 = vadd.f32 0.5, %v3230_v60 }
 0x2e8   : > { %3484 = vst [vmem:[%s7138_s22 + $0xc0] sm:$0xff] %v3452_v32  ;;  %4282 = vtanh.f32 %v2914_v2  ;;  %v3822_v54 = vunpack.c.l.bf16 %v7786_v49  ;;  %v3170_v59 = vmul.f32 0.5, %v2878_v63  ;;  %v3826_v49 = vunpack.c.l.bf16 %v7809_v14 }
 0x2e9   : > { %v3139_v55 = vadd.f32 0.5, %v3107_v50  ;;  %v3363_v11 = vmul.f32 %v4269_v45, %v3011_v28  ;;  %4284 = vtanh.f32 %v3042_v37  ;;  %v4271_v34 = vpop.eup %4270 }
 0x2ea   : > { %v3457_v36 = vmul.f32 %v4271_v34, %v3265_v5  ;;  %v4273_v30 = vpop.eup %4272  ;;  %4286 = vtanh.f32 %v2879_v56 }
 0x2eb   : > { %v3331_v47 = vmul.f32 %v3827_v25, %v3139_v55  ;;  %v4275_v10 = vpop.eup %4274  ;;  %v2976_v51 = vmul.f32 0.5, %v4273_v30  ;;  %4288 = vtanh.f32 %v3168_v3 }
 0x2ec   : > { %3489 = vst [vmem:[%s7138_s22 + $0xe8] sm:$0xff] %v3457_v36  ;;  %v3104_v40 = vmul.f32 0.5, %v4275_v10 }
 0x2ed   : > { %v3395_v12 = vadd.f32 %v3363_v11, %v3331_v47  ;;  %v3008_v39 = vadd.f32 0.5, %v2976_v51 }
 0x2ee   : > { %v3136_v29 = vadd.f32 0.5, %v3104_v40 }
 0x2ef   : > { %v4277_v62 = vpop.eup %4276  ;;  %4290 = vtanh.f32 %v3395_v12  ;;  %3523 = vst [vmem:[%s7081_s20 + $0xf8] sm:$0xff] %v3395_v12 }
 0x2f0   : > { %v4279_v22 = vpop.eup %4278  ;;  %v3454_v15 = vmul.f32 %v4277_v62, %v3262_v41  ;;  %v3328_v21 = vmul.f32 %v3822_v54, %v3136_v29  ;;  %4292 = vtanh.f32 %v3170_v59 }
 0x2f1   : > { %v4281_v42 = vpop.eup %4280  ;;  %v3360_v43 = vmul.f32 %v4279_v22, %v3008_v39 }
 0x2f2   : > { %v4283_v20 = vpop.eup %4282  ;;  %3486 = vst [vmem:[%s7138_s22 + $0xd0] sm:$0xff] %v3454_v15  ;;  %v3235_v38 = vmul.f32 0.5, %v4281_v42 }
 0x2f3   : > { %v4285_v18 = vpop.eup %4284  ;;  %v2978_v24 = vmul.f32 0.5, %v4283_v20  ;;  %v3392_v53 = vadd.f32 %v3360_v43, %v3328_v21 }
 0x2f4   : > { %v3106_v6 = vmul.f32 0.5, %v4285_v18  ;;  %v4287_v35 = vpop.eup %4286  ;;  %v3267_v14 = vadd.f32 0.5, %v3235_v38 }
 0x2f5   : > { %v3010_v33 = vadd.f32 0.5, %v2978_v24  ;;  %4294 = vtanh.f32 %v3392_v53  ;;  %3520 = vst [vmem:[%s7081_s20 + $0xe0] sm:$0xff] %v3392_v53  ;;  %v4289_v17 = vpop.eup %4288 }
 0x2f6   : > { %v3138_v27 = vadd.f32 0.5, %v3106_v6  ;;  %v3232_v26 = vmul.f32 0.5, %v4289_v17 }
 0x2f7   : > { %v3362_v0 = vmul.f32 %v4287_v35, %v3010_v33 }
 0x2f8   : > { %v3330_v61 = vmul.f32 %v3826_v49, %v3138_v27 }
 0x2f9   : > { %v4291_v58 = vpop.eup %4290 }
 0x2fa   : > { %v3459_v46 = vmul.f32 %v4291_v58, %v3267_v14  ;;  %v3394_v23 = vadd.f32 %v3362_v0, %v3330_v61 }
 0x2fc   : > { %3491 = vst [vmem:[%s7138_s22 + $0xf8] sm:$0xff] %v3459_v46  ;;  %4296 = vtanh.f32 %v3394_v23  ;;  %3522 = vst [vmem:[%s7081_s20 + $0xf0] sm:$0xff] %v3394_v23 }
 0x2fd   : > { %4349 = shalt.err (!%p4346_p7)
}
 0x2fe   : > { %s4350_s19 = scalar_lea.hbm %s7839_s14, 4096  ;;  %s4354_s9 = scalar_lea.hbm %s7935_s7, 8192 }
 0x2ff   : > { %p4351_p8 = scmp.ne.s32.totalorder %s7839_s14, %s4350_s19  ;;  %p4355_p1 = scmp.lt.u32.totalorder %s7839_s14, %s7935_s7 }
 0x300   : > { %p4356_p0 = scmp.lt.u32.totalorder %s4354_s9, %s4350_s19  ;;  %p4358_p6 = scmp.lt.u32.totalorder %s4350_s19, %s7839_s14 }
 0x301   : > { %p4352_p11 = pnand %p4351_p8, %p8864_p9 }
 0x302   : > { %p4357_p5 = por %p4356_p0, %p4355_p1 }
 0x303   : > { %p4353_p13 = pneg %p4352_p11 }
 0x304   : > { %p4359_p10 = por %p4358_p6, %p4357_p5 }
 0x306   : > { %p4360_p12 = pnand %p4359_p10, %p4353_p13 }
 0x308   : > { %4363 = shalt.err (!%p4360_p12)
}
 0x309   : > { %s4444_s13 = smov 128   ;;  %s4445_s21 = smov 8   ;;  %v4293_v48 = vpop.eup %4292  ;;  %v3264_v7 = vadd.f32 0.5, %v3232_v26 }
 0x30a   : > { %3848 = dma.vmem_to_hbm [thread:$0]  (%p8864_p9), %s7841_s29, 4096, %s7839_s14, %s3530_s17, %s4444_s13, %s4444_s13, %s4445_s21   ;;  %v4295_v16 = vpop.eup %4294  ;;  %v3234_v4 = vmul.f32 0.5, %v4293_v48 }
 0x30b   : > { %v3456_v25 = vmul.f32 %v4295_v16, %v3264_v7  ;;  %s3543_s19 = sshll.u32 %s7138_s22, 4  ;;  %v4297_v31 = vpop.eup %4296  ;;  %s7879_s9 = scalar_lea.hbm %s7934_s6, %s3762_s23  ;;  %s7881_s19 = int_to_ptr.vmem [resolvable:$true] %s3543_s19 }
 0x30c   : > { %v3266_v13 = vadd.f32 0.5, %v3234_v4  ;;  %s3525_s29 = scalar_lea.sflag [#allocation4], %s7037_s16  ;;  %s4364_s14 = scalar_lea.vmem %s7881_s19, 4096 }
 0x30d   : > { %3488 = vst [vmem:[%s7138_s22 + $0xe0] sm:$0xff] %v3456_v25  ;;  %p4365_p2 = scmp.ne.s32.totalorder %s7881_s19, %s4364_s14  ;;  %s4446_s17 = smov [#allocation5]  }
 0x30e   : > { %v3458_v9 = vmul.f32 %v4297_v31, %v3266_v13  ;;  %s4368_s15 = sshll.u32 %s4446_s17, 4  ;;  %s4369_s15 = int_to_ptr.vmem [resolvable:$false] %s4368_s15 }
 0x30f   : > { %p4366_p3 = pnand %p4365_p2, %p8864_p9  ;;  %s4370_s28 = scalar_lea.vmem %s4369_s15, 8192 }
 0x310   : > { %3490 = vst [vmem:[%s7138_s22 + $0xf0] sm:$0xff] %v3458_v9  ;;  %p4371_p7 = scmp.lt.s32.totalorder %s7881_s19, %s4369_s15  ;;  %p4372_p8 = scmp.lt.s32.totalorder %s4370_s28, %s4364_s14 }
 0x311   : > { %p4367_p4 = pneg %p4366_p3 }
 0x312   : > { %p4373_p11 = por %p4372_p8, %p4371_p7 }
 0x314   : > { %p4374_p13 = pnand %p4373_p11, %p4367_p4 }
 0x316   : > { %4377 = shalt.err (!%p4374_p13)
}
 0x317   : > { %s4378_s22 = scalar_lea.hbm %s7879_s9, 4096  ;;  %s4382_s20 = scalar_lea.hbm %s7934_s6, 8192 }
 0x318   : > { %p4379_p1 = scmp.ne.s32.totalorder %s7879_s9, %s4378_s22  ;;  %p4383_p6 = scmp.lt.u32.totalorder %s7879_s9, %s7934_s6 }
 0x319   : > { %p4384_p10 = scmp.lt.u32.totalorder %s4382_s20, %s4378_s22  ;;  %p4386_p2 = scmp.lt.u32.totalorder %s4378_s22, %s7879_s9 }
 0x31a   : > { %p4380_p0 = pnand %p4379_p1, %p8864_p9 }
 0x31b   : > { %p4385_p12 = por %p4384_p10, %p4383_p6 }
 0x31c   : > { %p4381_p5 = pneg %p4380_p0 }
 0x31d   : > { %p4387_p3 = por %p4386_p2, %p4385_p12 }
 0x31f   : > { %p4388_p4 = pnand %p4387_p3, %p4381_p5 }
 0x321   : > { %4391 = shalt.err (!%p4388_p4)
}
 0x322   : > { %3847 = dma.vmem_to_hbm [thread:$0]  (%p8864_p9), %s7881_s19, 4096, %s7879_s9, %s3525_s29, %s4444_s13, %s4444_s13, %s4445_s21  }
 0x323 PF: > { %p3864_p7 = scmp.ge.s32.totalorder %s4434_s27, 2  ;;  %s3574_s14 = sand.u32 1, %s4422_s24  }
 0x324   : > { %p8865_p8 = scmp.ne.s32.totalorder %s7971_s12, 0  ;;  %s3575_s15 = scalar_lea.sflag [#allocation4], %s3574_s14 }
 0x326   : > { %p3856_p11 = pnand %p3864_p7, %p8865_p8 }
 0x328   : > { %4413 = dma.done.wait (!%p3856_p11), %s3575_s15, 4096  }
 0x329   : > { %4415 = vsyncadd (!%p3856_p11), %s3575_s15, 4294963200  ;;  %s3584_s11 = scalar_lea.sflag [#allocation7], %s3574_s14 }
 0x32a   : > { %4417 = dma.done.wait (!%p3856_p11), %s3584_s11, 4096  }
 0x32b   : > { %4419 = vsyncadd (!%p3856_p11), %s3584_s11, 4294963200  ;;  %p22_p9 = scmp.ge.s32.totalorder %s4512_s30, 4   ;;  %s8866_s24 = smov %s4426_s25 }
 0x32c   : > { %s8867_s25 = smov %s4430_s26  ;;  %s8868_s26 = smov %s4523_s10 }
 0x32d   : > { %s8869_s27 = smov %s4512_s30  ;;  %24 = sbr.rel (!%p22_p9) target bundleno = 6 (0x6), region = 107 }
 0x334   :  { %3589 = vsyncpa [#allocation3], 1 }
 0x335   :  { %3591 = vsyncpa [#allocation3 + $0x1], 1 }
 0x336   :  { %3592 = vsyncpa [#allocation4], 1 }
 0x337   :  { %3594 = vsyncpa [#allocation4 + $0x1], 1 }
 0x338   :  { %3595 = vsyncpa [#allocation7], 1 }
 0x339   :  { %3597 = vsyncpa [#allocation7 + $0x1], 1 }

</bundles_post_ra>
